<compile_context>
chip_gen: v6e
topology: v6e:2x2x1
jax: 0.10.0
libtpu: 0.0.40
codegen_flags: <defaults>
</compile_context>

<pallas_src>
import functools

import jax
import jax.numpy as jnp
from jax.experimental import pallas as pl
from jax.experimental.pallas import tpu as pltpu

HIDDEN = 1024    # fixed by the module definition: Conv2d(C_latent, 1024, 1)
H_CHUNK = 256    # hidden features processed per inner chunk


def _round_up(a, b):
    return ((a + b - 1) // b) * b


def _decoder_kernel(x_ref, w1_ref, b1_ref, w2_ref, b2_ref, o_ref):
    # Transposed layout: channels on sublanes, pixels on lanes.
    #   x_ref : (C_in, TM)
    #   w1_ref: (HIDDEN, C_in)   b1_ref: (HIDDEN, 1)   (torch conv1 weight/bias)
    #   w2_ref: (C_out, HIDDEN)  b2_ref: (C_out, 1)    (torch conv2 weight/bias)
    #   o_ref : (C_out, TM)
    x = x_ref[...]
    c_out, tm = o_ref.shape

    acc = jnp.zeros((c_out, tm), dtype=jnp.float32)
    # Stream HIDDEN in aligned chunks: produce -> SiLU -> contract.  Slice
    # offsets are static multiples of 256 (sublane- and lane-aligned).
    for c in range(HIDDEN // H_CHUNK):
        lo = c * H_CHUNK
        w1c = w1_ref[pl.ds(lo, H_CHUNK), :]                              # (HC, C_in)
        b1c = b1_ref[pl.ds(lo, H_CHUNK), :]                              # (HC, 1)
        h = jnp.dot(w1c, x, preferred_element_type=jnp.float32) + b1c    # (HC, TM)
        # SiLU(h) = h * sigmoid(h); sigmoid via one EUP tanh (EUP is the crit unit).
        h = h * (0.5 * jnp.tanh(0.5 * h) + 0.5)
        w2c = w2_ref[:, pl.ds(lo, H_CHUNK)]                              # (C_out, HC)
        acc = acc + jnp.dot(w2c, h, preferred_element_type=jnp.float32)

    o_ref[...] = (acc + b2_ref[...]).astype(o_ref.dtype)


@functools.partial(jax.jit, static_argnames=("tm",))
def decoder_forward(x_nchw, w1, b1, w2, b2, *, tm=1024):
    """Pixel-decoder forward.

    x_nchw: (N, C_latent, H, W) float32
    w1:     (HIDDEN, C_latent)  torch conv1 weight (out, in), 1x1 squeezed
    b1:     (HIDDEN,)           torch conv1 bias
    w2:     (C_euv, HIDDEN)     torch conv2 weight (out, in), 1x1 squeezed
    b2:     (C_euv,)            torch conv2 bias
    returns (N, C_euv, H, W)
    """
    N, C_in, H, W = x_nchw.shape
    C_out = w2.shape[0]
    assert w1.shape == (HIDDEN, C_in)
    assert w2.shape == (C_out, HIDDEN)
    assert b1.shape == (HIDDEN,) and b2.shape == (C_out,)

    P = H * W
    # Lane-dense pixel tile (multiple of 128), capped by the (padded) image size.
    tm_eff = min(_round_up(tm, 128), _round_up(P, 128))
    P_pad = _round_up(P, tm_eff)

    # NCHW -> (N, C_in, P): pure reshape (pixels already contiguous per channel),
    # so the pixel axis lands on lanes with no transpose.
    x3 = x_nchw.reshape(N, C_in, P)
    if P_pad != P:
        x3 = jnp.pad(x3, ((0, 0), (0, 0), (0, P_pad - P)))

    b1c = b1.reshape(HIDDEN, 1)
    b2c = b2.reshape(C_out, 1)

    grid = (N, P_pad // tm_eff)

    out3 = pl.pallas_call(
        _decoder_kernel,
        out_shape=jax.ShapeDtypeStruct((N, C_out, P_pad), x_nchw.dtype),
        grid_spec=pltpu.PrefetchScalarGridSpec(
            num_scalar_prefetch=0,
            grid=grid,
            in_specs=[
                # Batch dim squeezed out; kernel sees (C_in, tm_eff).
                pl.BlockSpec((None, C_in, tm_eff), lambda n, j: (n, 0, j)),
                # Weights/biases: full-array blocks, constant index map
                # (resident in VMEM across the whole grid).
                pl.BlockSpec((HIDDEN, C_in), lambda n, j: (0, 0)),
                pl.BlockSpec((HIDDEN, 1), lambda n, j: (0, 0)),
                pl.BlockSpec((C_out, HIDDEN), lambda n, j: (0, 0)),
                pl.BlockSpec((C_out, 1), lambda n, j: (0, 0)),
            ],
            out_specs=pl.BlockSpec((None, C_out, tm_eff), lambda n, j: (n, 0, j)),
        ),
        compiler_params=pltpu.CompilerParams(
            # Both grid axes are independent -> megacore (v7x) can shard them.
            dimension_semantics=("parallel", "parallel"),
            vmem_limit_bytes=32 * 1024 * 1024,
        ),
    )(x3, w1, b1c, w2, b2c)

    return out3[:, :, :P].reshape(N, C_out, H, W)


def _reference_forward(x_nchw, w1, b1, w2, b2):
    # Pure-JAX reference: two 1x1 convs (channel matmuls) with SiLU in between.
    h = jnp.einsum("oc,nchw->nohw", w1, x_nchw) + b1[None, :, None, None]
    h = h * jax.nn.sigmoid(h)
    o = jnp.einsum("oc,nchw->nohw", w2, h) + b2[None, :, None, None]
    return o


if __name__ == "__main__":
    # Decoder(num_euv_channels=4, num_latent_features=4, model_type='pixel');
    # input (N, C_latent, H, W).
    N, C_latent, C_euv, H, W = 2, 4, 4, 16, 16

    key = jax.random.PRNGKey(0)
    kx, k1, k2, k3, k4 = jax.random.split(key, 5)

    x = jax.random.normal(kx, (N, C_latent, H, W), dtype=jnp.float32)

    # Parameters in torch Conv2d (out, in) orientation (1x1 kernel squeezed).
    w1 = jax.random.normal(k1, (HIDDEN, C_latent), dtype=jnp.float32) * 0.05
    b1 = jax.random.normal(k2, (HIDDEN,), dtype=jnp.float32) * 0.05
    w2 = jax.random.normal(k3, (C_euv, HIDDEN), dtype=jnp.float32) * 0.05
    b2 = jax.random.normal(k4, (C_euv,), dtype=jnp.float32) * 0.05

    out = decoder_forward(x, w1, b1, w2, b2)
    out = jax.block_until_ready(out)

    ref = _reference_forward(x, w1, b1, w2, b2)
    assert out.shape == (N, C_euv, H, W)
    assert jnp.allclose(out, ref, atol=1e-3, rtol=1e-3), float(
        jnp.max(jnp.abs(out - ref))
    )

    # Ragged spatial size: exercises the lane-padding / tile-clipping path.
    xr = jax.random.normal(kx, (1, C_latent, 10, 12), dtype=jnp.float32)
    out_r = jax.block_until_ready(decoder_forward(xr, w1, b1, w2, b2))
    ref_r = _reference_forward(xr, w1, b1, w2, b2)
    assert out_r.shape == (1, C_euv, 10, 12)
    assert jnp.allclose(out_r, ref_r, atol=1e-3, rtol=1e-3), float(
        jnp.max(jnp.abs(out_r - ref_r))
    )

    print("KERNEL_OK")
</pallas_src>

<mosaic_0001>
module attributes {stable_mosaic.version = 11 : i64} {
  func.func @_decoder_kernel(%arg0: i32, %arg1: i32, %arg2: memref<1x4x256xf32, #tpu.memory_space<vmem>>, %arg3: memref<1024x4xf32, #tpu.memory_space<vmem>>, %arg4: memref<1024x1xf32, #tpu.memory_space<vmem>>, %arg5: memref<4x1024xf32, #tpu.memory_space<vmem>>, %arg6: memref<4x1xf32, #tpu.memory_space<vmem>>, %arg7: memref<1x4x256xf32, #tpu.memory_space<vmem>>) attributes {dimension_semantics = [#tpu.dimension_semantics<parallel>, #tpu.dimension_semantics<parallel>], iteration_bounds = array<i64: 2, 1>, scalar_prefetch = 0 : i64, scratch_operands = 0 : i64, tpu.core_type = #tpu.core_type<tc>, window_params = [{transform_indices = @transform_0, window_bounds = array<i64: 1, 4, 256>}, {pipeline_mode = #tpu.pipeline_mode<synchronous>, transform_indices = @transform_1, window_bounds = array<i64: 1024, 4>}, {pipeline_mode = #tpu.pipeline_mode<synchronous>, transform_indices = @transform_2, window_bounds = array<i64: 1024, 1>}, {pipeline_mode = #tpu.pipeline_mode<synchronous>, transform_indices = @transform_3, window_bounds = array<i64: 4, 1024>}, {pipeline_mode = #tpu.pipeline_mode<synchronous>, transform_indices = @transform_4, window_bounds = array<i64: 4, 1>}, {transform_indices = @transform_5, window_bounds = array<i64: 1, 4, 256>}]} {
    %c0 = arith.constant 0 : index
    %c0_0 = arith.constant 0 : index
    %c0_1 = arith.constant 0 : index
    %0 = vector.load %arg2[%c0, %c0_0, %c0_1] : memref<1x4x256xf32, #tpu.memory_space<vmem>>, vector<1x4x256xf32>
    %1 = vector.shape_cast %0 : vector<1x4x256xf32> to vector<4x256xf32>
    %cst = arith.constant 0.000000e+00 : f32
    %2 = vector.broadcast %cst : f32 to vector<4x256xf32>
    %c0_2 = arith.constant 0 : index
    %c0_3 = arith.constant 0 : index
    %3 = vector.load %arg3[%c0_2, %c0_3] : memref<1024x4xf32, #tpu.memory_space<vmem>>, vector<256x4xf32>
    %c0_4 = arith.constant 0 : index
    %c0_5 = arith.constant 0 : index
    %4 = vector.load %arg4[%c0_4, %c0_5] : memref<1024x1xf32, #tpu.memory_space<vmem>>, vector<256x1xf32>
    %cst_6 = arith.constant dense<0.000000e+00> : vector<256x256xf32>
    %5 = tpu.matmul %3, %1, %cst_6 {dimension_numbers = #tpu.dot_dimension_numbers<[1], [0], [0], [1], [0, 0, 1, 1], [], []>} : vector<256x4xf32>, vector<4x256xf32>, vector<256x256xf32> -> vector<256x256xf32>
    %6 = vector.broadcast %4 : vector<256x1xf32> to vector<256x256xf32>
    %7 = arith.addf %5, %6 : vector<256x256xf32>
    %cst_7 = arith.constant 5.000000e-01 : f32
    %8 = vector.broadcast %cst_7 : f32 to vector<256x256xf32>
    %9 = arith.mulf %8, %7 : vector<256x256xf32>
    %10 = math.tanh %9 : vector<256x256xf32>
    %cst_8 = arith.constant 5.000000e-01 : f32
    %11 = vector.broadcast %cst_8 : f32 to vector<256x256xf32>
    %12 = arith.mulf %11, %10 : vector<256x256xf32>
    %cst_9 = arith.constant 5.000000e-01 : f32
    %13 = vector.broadcast %cst_9 : f32 to vector<256x256xf32>
    %14 = arith.addf %12, %13 : vector<256x256xf32>
    %15 = arith.mulf %7, %14 : vector<256x256xf32>
    %c0_10 = arith.constant 0 : index
    %c0_11 = arith.constant 0 : index
    %16 = vector.load %arg5[%c0_10, %c0_11] : memref<4x1024xf32, #tpu.memory_space<vmem>>, vector<4x256xf32>
    %cst_12 = arith.constant dense<0.000000e+00> : vector<4x256xf32>
    %17 = tpu.matmul %16, %15, %cst_12 {dimension_numbers = #tpu.dot_dimension_numbers<[1], [0], [0], [1], [0, 0, 1, 1], [], []>} : vector<4x256xf32>, vector<256x256xf32>, vector<4x256xf32> -> vector<4x256xf32>
    %18 = arith.addf %2, %17 : vector<4x256xf32>
    %c256 = arith.constant 256 : index
    %c0_13 = arith.constant 0 : index
    %19 = vector.load %arg3[%c256, %c0_13] : memref<1024x4xf32, #tpu.memory_space<vmem>>, vector<256x4xf32>
    %c256_14 = arith.constant 256 : index
    %c0_15 = arith.constant 0 : index
    %20 = vector.load %arg4[%c256_14, %c0_15] : memref<1024x1xf32, #tpu.memory_space<vmem>>, vector<256x1xf32>
    %cst_16 = arith.constant dense<0.000000e+00> : vector<256x256xf32>
    %21 = tpu.matmul %19, %1, %cst_16 {dimension_numbers = #tpu.dot_dimension_numbers<[1], [0], [0], [1], [0, 0, 1, 1], [], []>} : vector<256x4xf32>, vector<4x256xf32>, vector<256x256xf32> -> vector<256x256xf32>
    %22 = vector.broadcast %20 : vector<256x1xf32> to vector<256x256xf32>
    %23 = arith.addf %21, %22 : vector<256x256xf32>
    %cst_17 = arith.constant 5.000000e-01 : f32
    %24 = vector.broadcast %cst_17 : f32 to vector<256x256xf32>
    %25 = arith.mulf %24, %23 : vector<256x256xf32>
    %26 = math.tanh %25 : vector<256x256xf32>
    %cst_18 = arith.constant 5.000000e-01 : f32
    %27 = vector.broadcast %cst_18 : f32 to vector<256x256xf32>
    %28 = arith.mulf %27, %26 : vector<256x256xf32>
    %cst_19 = arith.constant 5.000000e-01 : f32
    %29 = vector.broadcast %cst_19 : f32 to vector<256x256xf32>
    %30 = arith.addf %28, %29 : vector<256x256xf32>
    %31 = arith.mulf %23, %30 : vector<256x256xf32>
    %c0_20 = arith.constant 0 : index
    %c256_21 = arith.constant 256 : index
    %32 = vector.load %arg5[%c0_20, %c256_21] : memref<4x1024xf32, #tpu.memory_space<vmem>>, vector<4x256xf32>
    %cst_22 = arith.constant dense<0.000000e+00> : vector<4x256xf32>
    %33 = tpu.matmul %32, %31, %cst_22 {dimension_numbers = #tpu.dot_dimension_numbers<[1], [0], [0], [1], [0, 0, 1, 1], [], []>} : vector<4x256xf32>, vector<256x256xf32>, vector<4x256xf32> -> vector<4x256xf32>
    %34 = arith.addf %18, %33 : vector<4x256xf32>
    %c512 = arith.constant 512 : index
    %c0_23 = arith.constant 0 : index
    %35 = vector.load %arg3[%c512, %c0_23] : memref<1024x4xf32, #tpu.memory_space<vmem>>, vector<256x4xf32>
    %c512_24 = arith.constant 512 : index
    %c0_25 = arith.constant 0 : index
    %36 = vector.load %arg4[%c512_24, %c0_25] : memref<1024x1xf32, #tpu.memory_space<vmem>>, vector<256x1xf32>
    %cst_26 = arith.constant dense<0.000000e+00> : vector<256x256xf32>
    %37 = tpu.matmul %35, %1, %cst_26 {dimension_numbers = #tpu.dot_dimension_numbers<[1], [0], [0], [1], [0, 0, 1, 1], [], []>} : vector<256x4xf32>, vector<4x256xf32>, vector<256x256xf32> -> vector<256x256xf32>
    %38 = vector.broadcast %36 : vector<256x1xf32> to vector<256x256xf32>
    %39 = arith.addf %37, %38 : vector<256x256xf32>
    %cst_27 = arith.constant 5.000000e-01 : f32
    %40 = vector.broadcast %cst_27 : f32 to vector<256x256xf32>
    %41 = arith.mulf %40, %39 : vector<256x256xf32>
    %42 = math.tanh %41 : vector<256x256xf32>
    %cst_28 = arith.constant 5.000000e-01 : f32
    %43 = vector.broadcast %cst_28 : f32 to vector<256x256xf32>
    %44 = arith.mulf %43, %42 : vector<256x256xf32>
    %cst_29 = arith.constant 5.000000e-01 : f32
    %45 = vector.broadcast %cst_29 : f32 to vector<256x256xf32>
    %46 = arith.addf %44, %45 : vector<256x256xf32>
    %47 = arith.mulf %39, %46 : vector<256x256xf32>
    %c0_30 = arith.constant 0 : index
    %c512_31 = arith.constant 512 : index
    %48 = vector.load %arg5[%c0_30, %c512_31] : memref<4x1024xf32, #tpu.memory_space<vmem>>, vector<4x256xf32>
    %cst_32 = arith.constant dense<0.000000e+00> : vector<4x256xf32>
    %49 = tpu.matmul %48, %47, %cst_32 {dimension_numbers = #tpu.dot_dimension_numbers<[1], [0], [0], [1], [0, 0, 1, 1], [], []>} : vector<4x256xf32>, vector<256x256xf32>, vector<4x256xf32> -> vector<4x256xf32>
    %50 = arith.addf %34, %49 : vector<4x256xf32>
    %c768 = arith.constant 768 : index
    %c0_33 = arith.constant 0 : index
    %51 = vector.load %arg3[%c768, %c0_33] : memref<1024x4xf32, #tpu.memory_space<vmem>>, vector<256x4xf32>
    %c768_34 = arith.constant 768 : index
    %c0_35 = arith.constant 0 : index
    %52 = vector.load %arg4[%c768_34, %c0_35] : memref<1024x1xf32, #tpu.memory_space<vmem>>, vector<256x1xf32>
    %cst_36 = arith.constant dense<0.000000e+00> : vector<256x256xf32>
    %53 = tpu.matmul %51, %1, %cst_36 {dimension_numbers = #tpu.dot_dimension_numbers<[1], [0], [0], [1], [0, 0, 1, 1], [], []>} : vector<256x4xf32>, vector<4x256xf32>, vector<256x256xf32> -> vector<256x256xf32>
    %54 = vector.broadcast %52 : vector<256x1xf32> to vector<256x256xf32>
    %55 = arith.addf %53, %54 : vector<256x256xf32>
    %cst_37 = arith.constant 5.000000e-01 : f32
    %56 = vector.broadcast %cst_37 : f32 to vector<256x256xf32>
    %57 = arith.mulf %56, %55 : vector<256x256xf32>
    %58 = math.tanh %57 : vector<256x256xf32>
    %cst_38 = arith.constant 5.000000e-01 : f32
    %59 = vector.broadcast %cst_38 : f32 to vector<256x256xf32>
    %60 = arith.mulf %59, %58 : vector<256x256xf32>
    %cst_39 = arith.constant 5.000000e-01 : f32
    %61 = vector.broadcast %cst_39 : f32 to vector<256x256xf32>
    %62 = arith.addf %60, %61 : vector<256x256xf32>
    %63 = arith.mulf %55, %62 : vector<256x256xf32>
    %c0_40 = arith.constant 0 : index
    %c768_41 = arith.constant 768 : index
    %64 = vector.load %arg5[%c0_40, %c768_41] : memref<4x1024xf32, #tpu.memory_space<vmem>>, vector<4x256xf32>
    %cst_42 = arith.constant dense<0.000000e+00> : vector<4x256xf32>
    %65 = tpu.matmul %64, %63, %cst_42 {dimension_numbers = #tpu.dot_dimension_numbers<[1], [0], [0], [1], [0, 0, 1, 1], [], []>} : vector<4x256xf32>, vector<256x256xf32>, vector<4x256xf32> -> vector<4x256xf32>
    %66 = arith.addf %50, %65 : vector<4x256xf32>
    %c0_43 = arith.constant 0 : index
    %c0_44 = arith.constant 0 : index
    %67 = vector.load %arg6[%c0_43, %c0_44] : memref<4x1xf32, #tpu.memory_space<vmem>>, vector<4x1xf32>
    %68 = vector.broadcast %67 : vector<4x1xf32> to vector<4x256xf32>
    %69 = arith.addf %66, %68 : vector<4x256xf32>
    %c0_45 = arith.constant 0 : index
    %c0_46 = arith.constant 0 : index
    %c0_47 = arith.constant 0 : index
    %70 = vector.load %arg7[%c0_45, %c0_46, %c0_47] : memref<1x4x256xf32, #tpu.memory_space<vmem>>, vector<1x4x256xf32>
    %71 = vector.shape_cast %70 : vector<1x4x256xf32> to vector<4x256xf32>
    %72 = vector.shape_cast %69 : vector<4x256xf32> to vector<1x4x256xf32>
    tpu.vector_store %arg7[%c0_45, %c0_46, %c0_47], %72 {strides = array<i32>} : memref<1x4x256xf32, #tpu.memory_space<vmem>>, vector<1x4x256xf32>,
    return
  }
  func.func @transform_0(%arg0: i32, %arg1: i32) -> (i32, i32, i32) {
    %c0_i32 = arith.constant 0 : i32
    %c0_i32_0 = arith.constant 0 : i32
    return %arg0, %c0_i32, %arg1 : i32, i32, i32
  }
  func.func @transform_1(%arg0: i32, %arg1: i32) -> (i32, i32) {
    %c0_i32 = arith.constant 0 : i32
    %c0_i32_0 = arith.constant 0 : i32
    %c0_i32_1 = arith.constant 0 : i32
    return %c0_i32, %c0_i32_0 : i32, i32
  }
  func.func @transform_2(%arg0: i32, %arg1: i32) -> (i32, i32) {
    %c0_i32 = arith.constant 0 : i32
    %c0_i32_0 = arith.constant 0 : i32
    %c0_i32_1 = arith.constant 0 : i32
    return %c0_i32, %c0_i32_0 : i32, i32
  }
  func.func @transform_3(%arg0: i32, %arg1: i32) -> (i32, i32) {
    %c0_i32 = arith.constant 0 : i32
    %c0_i32_0 = arith.constant 0 : i32
    %c0_i32_1 = arith.constant 0 : i32
    return %c0_i32, %c0_i32_0 : i32, i32
  }
  func.func @transform_4(%arg0: i32, %arg1: i32) -> (i32, i32) {
    %c0_i32 = arith.constant 0 : i32
    %c0_i32_0 = arith.constant 0 : i32
    %c0_i32_1 = arith.constant 0 : i32
    return %c0_i32, %c0_i32_0 : i32, i32
  }
  func.func @transform_5(%arg0: i32, %arg1: i32) -> (i32, i32, i32) {
    %c0_i32 = arith.constant 0 : i32
    %c0_i32_0 = arith.constant 0 : i32
    return %arg0, %c0_i32, %arg1 : i32, i32, i32
  }
}

</mosaic_0001>

<bundles_post_ra>
// kernel: decoder_forward.1
= control target key start
LH: loop header
LB: loop body
LE: loop exit
PB: predicated region body
PF: predicated region fallthrough
CT: control target
= control target key end

     0   :  { %s5019_s18 = smov 0   ;;  %s5021_s19 = smov 0   ;;  %s8696_s0 = inlined_call_operand.vmem [shape: f32[2,4,256], index: 0, kind: input, shape index: {}]   ;;  %s8697_s1 = inlined_call_operand.vmem [shape: f32[1024,4], index: 1, kind: input, shape index: {}]   ;;  %s8698_s2 = inlined_call_operand.vmem [shape: f32[1024,1], index: 2, kind: input, shape index: {}]   ;;  %s8699_s3 = inlined_call_operand.vmem [shape: f32[4,1024], index: 3, kind: input, shape index: {}]   ;;  %s8700_s4 = inlined_call_operand.vmem [shape: f32[4,1], index: 4, kind: input, shape index: {}]   ;;  %s8701_s5 = inlined_call_operand.vmem [shape: f32[2,4,256], index: 5, kind: output, shape index: {}]  }
   0x1   :  { %s5023_s20 = smov 0  }
   0x2 LB: > { %s27_s21 = sadd.s32 1, %s4981_s19  ;;  %p4269_p0 = scmp.ge.s32.totalorder %s4985_s20, 1  ;;  %s4985_s20 = sphi %s5023_s20, %s15_s20   ;;  %s4981_s19 = sphi %s5021_s19, %s9368_s19   ;;  %s4977_s18 = sphi %s5019_s18, %s9367_s18  }
   0x3   : > { %p29_p1 = scmp.ge.s32.totalorder %s27_s21, 2  ;;  %p208_p2 = scmp.lt.s32.totalorder %s4985_s20, 3 }
   0x5   : > { %s9370_s21 = smov (%p29_p1, %s27_s21), 0  ;;  %p209_p3 = pnand %p4269_p0, %p208_p2 }
   0x7   : > { %212 = sbr.rel (%p209_p3) target bundleno = 1420 (0x58c), region = 40 }
   0xc   : > { %v1216_v0 = vld [vmem:[%s8698_s2 + $0x168] sm:$0xff]  ;;  %v1218_v1 = vld [vmem:[%s8698_s2 + $0x178] sm:$0xff]  ;;  %p245_p4 = scmp.lt.s32.totalorder %s4977_s18, 1  ;;  %v4987_v2 = vmov 0   ;;  %v1215_v3 = vld [vmem:[%s8698_s2 + $0x160] sm:$0xff]  ;;  %v8702_v5 = vmov 0.0  }
   0xd   : > { %4441 = vset.pattern.permute.xlu1 %v4987_v2  ;;  %4440 = vset.pattern.permute.xlu0 %v4987_v2  ;;  %v1217_v4 = vld [vmem:[%s8698_s2 + $0x170] sm:$0xff]  ;;  %vm588_vm0 = vcmask 1043456   ;;  %v1214_v9 = vld [vmem:[%s8698_s2 + $0x158] sm:$0xff]  ;;  %v265_v10 = vld [vmem:[%s8697_s1] sm:$0xff]  ;;  %vm491_vm1 = vcmask 31744  }
   0xe   : > { %1302 = vperm.xlu1 %4441, %v1216_v0   ;;  %1312 = vperm.xlu0 %4440, %v1218_v1   ;;  %s9372_s18 = smov (!%p245_p4, %s4977_s18), 1  ;;  %v1213_v8 = vld [vmem:[%s8698_s2 + $0x150] sm:$0xff]  ;;  %v1171_v11 = vld [vmem:[%s8697_s1 + $0x100] sm:$0xff]  ;;  %v1212_v13 = vld [vmem:[%s8698_s2 + $0x148] sm:$0xff] }
   0xf   : > { %657 = vmatprep.mubr.f32.mxu0 %v8702_v5  ;;  %1555 = vmatprep.mubr.f32.mxu1 %v8702_v5  ;;  %s4412_s30 = sshll.u32 %s9372_s18, 3  ;;  %v1211_v12 = vld [vmem:[%s8698_s2 + $0x140] sm:$0xff]  ;;  %v266_v14 = vld [vmem:[%s8697_s1 + $0x8] sm:$0xff]  ;;  %v1209_v16 = vld [vmem:[%s8698_s2 + $0x130] sm:$0xff] }
  0x10   : > { %s5059_s8 = scalar_lea.vmem %s8696_s0, %s4412_s30  ;;  %v1172_v15 = vld [vmem:[%s8697_s1 + $0x108] sm:$0xff]  ;;  %v1210_v17 = vld [vmem:[%s8698_s2 + $0x138] sm:$0xff]  ;;  %v267_v18 = vld [vmem:[%s8697_s1 + $0x10] sm:$0xff]  ;;  %s262_s12 = scalar_lea.vmem %s8701_s5, %s4412_s30 }
  0x11   : > { %v264_v6 = vld [vmem:[%s5059_s8] sm:$0xff]  ;;  %v1173_v19 = vld [vmem:[%s8697_s1 + $0x110] sm:$0xff]  ;;  %v1208_v21 = vld [vmem:[%s8698_s2 + $0x128] sm:$0xff] }
  0x12   : > { %1297 = vperm.xlu1 %4441, %v1215_v3   ;;  %1307 = vperm.xlu0 %4440, %v1217_v4   ;;  %v5062_v7 = vcombine.high %v264_v6, %v264_v6  ;;  %v1207_v20 = vld [vmem:[%s8698_s2 + $0x120] sm:$0xff]  ;;  %v268_v22 = vld [vmem:[%s8697_s1 + $0x18] sm:$0xff]  ;;  %v1205_v24 = vld [vmem:[%s8698_s2 + $0x110] sm:$0xff] }
  0x13   : > { %v1174_v23 = vld [vmem:[%s8697_s1 + $0x118] sm:$0xff]  ;;  %v269_v26 = vld [vmem:[%s8697_s1 + $0x20] sm:$0xff]  ;;  %v1204_v29 = vld [vmem:[%s8698_s2 + $0x108] sm:$0xff] }
  0x14   : > { %8856 = vst [vmem:[#allocation2_spill] sm:$0xff] %v5062_v7  ;;  %4274 = vmatprep.subr.msk.mxu0 %vm588_vm0, %v5062_v7  ;;  %4308 = vmatprep.subr.msk.mxu1 %vm588_vm0, %v5062_v7  ;;  %v1206_v25 = vld [vmem:[%s8698_s2 + $0x118] sm:$0xff]  ;;  %v1175_v27 = vld [vmem:[%s8697_s1 + $0x120] sm:$0xff]  ;;  %v270_v30 = vld [vmem:[%s8697_s1 + $0x28] sm:$0xff] }
  0x15   : > { %4275 = vmatpush1.msk.msra.mxu0 %vm588_vm0, %v264_v6  ;;  %4309 = vmatpush1.msk.msra.mxu1 %vm588_vm0, %v264_v6  ;;  %v1203_v28 = vld [vmem:[%s8698_s2 + $0x100] sm:$0xff]  ;;  %v1176_v31 = vld [vmem:[%s8697_s1 + $0x128] sm:$0xff]  ;;  %v1233_v32 = vld [vmem:[%s8698_s2 + $0x1f0] sm:$0xff] }
  0x16   : > { %1287 = vperm.xlu1 %4441, %v1213_v8   ;;  %1292 = vperm.xlu0 %4440, %v1214_v9   ;;  %v1234_v33 = vld [vmem:[%s8698_s2 + $0x1f8] sm:$0xff]  ;;  %v271_v34 = vld [vmem:[%s8697_s1 + $0x30] sm:$0xff]  ;;  %v1231_v36 = vld [vmem:[%s8698_s2 + $0x1e0] sm:$0xff] }
  0x17   : > { %4276 = vmatmul.mubr.msk.f32.vlgmr.msra.gmra.mxu0 %vm491_vm1, %v265_v10  ;;  %4310 = vmatmul.mubr.msk.f32.vlgmr.msra.gmra.mxu1 %vm491_vm1, %v1171_v11  ;;  %v1177_v35 = vld [vmem:[%s8697_s1 + $0x130] sm:$0xff]  ;;  %v1232_v37 = vld [vmem:[%s8698_s2 + $0x1e8] sm:$0xff]  ;;  %v272_v38 = vld [vmem:[%s8697_s1 + $0x38] sm:$0xff] }
  0x18   : > { %663 = vmatprep.mubr.f32.mxu0 %v8702_v5  ;;  %1561 = vmatprep.mubr.f32.mxu1 %v8702_v5  ;;  %v1178_v39 = vld [vmem:[%s8697_s1 + $0x138] sm:$0xff]  ;;  %v1229_v40 = vld [vmem:[%s8698_s2 + $0x1d0] sm:$0xff]  ;;  %v273_v42 = vld [vmem:[%s8697_s1 + $0x40] sm:$0xff] }
  0x19   : > { %v1230_v41 = vld [vmem:[%s8698_s2 + $0x1d8] sm:$0xff]  ;;  %v1179_v43 = vld [vmem:[%s8697_s1 + $0x140] sm:$0xff]  ;;  %v1228_v45 = vld [vmem:[%s8698_s2 + $0x1c8] sm:$0xff] }
  0x1a   : > { %1277 = vperm.xlu1 %4441, %v1211_v12   ;;  %1282 = vperm.xlu0 %4440, %v1212_v13   ;;  %v1227_v44 = vld [vmem:[%s8698_s2 + $0x1c0] sm:$0xff]  ;;  %v274_v46 = vld [vmem:[%s8697_s1 + $0x48] sm:$0xff]  ;;  %v1225_v48 = vld [vmem:[%s8698_s2 + $0x1b0] sm:$0xff] }
  0x1b   : > { %4277 = vmatmul.mubr.msk.f32.gmra.mxu0 %vm491_vm1, %v266_v14  ;;  %4311 = vmatmul.mubr.msk.f32.gmra.mxu1 %vm491_vm1, %v1172_v15  ;;  %v1180_v47 = vld [vmem:[%s8697_s1 + $0x148] sm:$0xff]  ;;  %v1226_v49 = vld [vmem:[%s8698_s2 + $0x1b8] sm:$0xff]  ;;  %v275_v50 = vld [vmem:[%s8697_s1 + $0x50] sm:$0xff] }
  0x1c   : > { %669 = vmatprep.mubr.f32.mxu0 %v8702_v5  ;;  %1567 = vmatprep.mubr.f32.mxu1 %v8702_v5  ;;  %v1181_v51 = vld [vmem:[%s8697_s1 + $0x150] sm:$0xff]  ;;  %v1223_v52 = vld [vmem:[%s8698_s2 + $0x1a0] sm:$0xff]  ;;  %v1224_v53 = vld [vmem:[%s8698_s2 + $0x1a8] sm:$0xff] }
  0x1d   : > { %v276_v54 = vld [vmem:[%s8697_s1 + $0x58] sm:$0xff]  ;;  %v1221_v56 = vld [vmem:[%s8698_s2 + $0x190] sm:$0xff]  ;;  %v277_v58 = vld [vmem:[%s8697_s1 + $0x60] sm:$0xff] }
  0x1e   : > { %1267 = vperm.xlu1 %4441, %v1209_v16   ;;  %1272 = vperm.xlu0 %4440, %v1210_v17   ;;  %v1182_v55 = vld [vmem:[%s8697_s1 + $0x158] sm:$0xff]  ;;  %v1183_v59 = vld [vmem:[%s8697_s1 + $0x160] sm:$0xff]  ;;  %v1220_v61 = vld [vmem:[%s8698_s2 + $0x188] sm:$0xff] }
  0x1f   : > { %4278 = vmatmul.mubr.msk.f32.gmra.mxu0 %vm491_vm1, %v267_v18  ;;  %4312 = vmatmul.mubr.msk.f32.gmra.mxu1 %vm491_vm1, %v1173_v19  ;;  %v1222_v57 = vld [vmem:[%s8698_s2 + $0x198] sm:$0xff]  ;;  %v1219_v60 = vld [vmem:[%s8698_s2 + $0x180] sm:$0xff]  ;;  %v278_v62 = vld [vmem:[%s8697_s1 + $0x68] sm:$0xff] }
  0x20   : > { %675 = vmatprep.mubr.f32.mxu0 %v8702_v5  ;;  %1573 = vmatprep.mubr.f32.mxu1 %v8702_v5  ;;  %v1184_v63 = vld [vmem:[%s8697_s1 + $0x168] sm:$0xff]  ;;  %v312_v0 = vld [vmem:[%s8698_s2 + $0x78] sm:$0xff]  ;;  %v311_v1 = vld [vmem:[%s8698_s2 + $0x70] sm:$0xff] }
  0x21   : > { %v279_v2 = vld [vmem:[%s8697_s1 + $0x70] sm:$0xff]  ;;  %v310_v4 = vld [vmem:[%s8698_s2 + $0x68] sm:$0xff]  ;;  %v309_v6 = vld [vmem:[%s8698_s2 + $0x60] sm:$0xff] }
  0x22   : > { %1257 = vperm.xlu1 %4441, %v1207_v20   ;;  %1262 = vperm.xlu0 %4440, %v1208_v21   ;;  %v1185_v3 = vld [vmem:[%s8697_s1 + $0x170] sm:$0xff]  ;;  %v280_v8 = vld [vmem:[%s8697_s1 + $0x78] sm:$0xff]  ;;  %v281_v12 = vld [vmem:[%s8697_s1 + $0x80] sm:$0xff] }
  0x23   : > { %4279 = vmatmul.mubr.msk.f32.gmra.mxu0 %vm491_vm1, %v268_v22  ;;  %4313 = vmatmul.mubr.msk.f32.gmra.mxu1 %vm491_vm1, %v1174_v23  ;;  %v1186_v9 = vld [vmem:[%s8697_s1 + $0x178] sm:$0xff]  ;;  %v307_v11 = vld [vmem:[%s8698_s2 + $0x50] sm:$0xff]  ;;  %v1187_v13 = vld [vmem:[%s8697_s1 + $0x180] sm:$0xff] }
  0x24   : > { %681 = vmatprep.mubr.f32.mxu0 %v8702_v5  ;;  %1579 = vmatprep.mubr.f32.mxu1 %v8702_v5  ;;  %v308_v10 = vld [vmem:[%s8698_s2 + $0x58] sm:$0xff]  ;;  %v306_v14 = vld [vmem:[%s8698_s2 + $0x48] sm:$0xff]  ;;  %v305_v15 = vld [vmem:[%s8698_s2 + $0x40] sm:$0xff] }
  0x25   : > { %v282_v16 = vld [vmem:[%s8697_s1 + $0x88] sm:$0xff]  ;;  %v304_v18 = vld [vmem:[%s8698_s2 + $0x38] sm:$0xff]  ;;  %v303_v19 = vld [vmem:[%s8698_s2 + $0x30] sm:$0xff] }
  0x26   : > { %1247 = vperm.xlu1 %4441, %v1205_v24   ;;  %1252 = vperm.xlu0 %4440, %v1206_v25   ;;  %v1188_v17 = vld [vmem:[%s8697_s1 + $0x188] sm:$0xff]  ;;  %v283_v20 = vld [vmem:[%s8697_s1 + $0x90] sm:$0xff]  ;;  %v301_v23 = vld [vmem:[%s8698_s2 + $0x20] sm:$0xff] }
  0x27   : > { %4280 = vmatmul.mubr.msk.f32.gmra.mxu0 %vm491_vm1, %v269_v26  ;;  %4314 = vmatmul.mubr.msk.f32.gmra.mxu1 %vm491_vm1, %v1175_v27  ;;  %v1189_v21 = vld [vmem:[%s8697_s1 + $0x190] sm:$0xff]  ;;  %v302_v22 = vld [vmem:[%s8698_s2 + $0x28] sm:$0xff]  ;;  %v284_v24 = vld [vmem:[%s8697_s1 + $0x98] sm:$0xff] }
  0x28   : > { %687 = vmatprep.mubr.f32.mxu0 %v8702_v5  ;;  %1585 = vmatprep.mubr.f32.mxu1 %v8702_v5  ;;  %v1190_v25 = vld [vmem:[%s8697_s1 + $0x198] sm:$0xff]  ;;  %v299_v27 = vld [vmem:[%s8698_s2 + $0x10] sm:$0xff] }
  0x29   : > { %v300_v26 = vld [vmem:[%s8698_s2 + $0x18] sm:$0xff] }
  0x2a   : > { %1237 = vperm.xlu1 %4441, %v1203_v28   ;;  %1242 = vperm.xlu0 %4440, %v1204_v29   ;;  %v285_v28 = vld [vmem:[%s8697_s1 + $0xa0] sm:$0xff] }
  0x2b   : > { %4281 = vmatmul.mubr.msk.f32.gmra.mxu0 %vm491_vm1, %v270_v30  ;;  %4315 = vmatmul.mubr.msk.f32.gmra.mxu1 %vm491_vm1, %v1176_v31  ;;  %v1191_v29 = vld [vmem:[%s8697_s1 + $0x1a0] sm:$0xff]  ;;  %v298_v30 = vld [vmem:[%s8698_s2 + $0x8] sm:$0xff] }
  0x2c   : > { %693 = vmatprep.mubr.f32.mxu0 %v8702_v5  ;;  %1591 = vmatprep.mubr.f32.mxu1 %v8702_v5  ;;  %v297_v31 = vld [vmem:[%s8698_s2] sm:$0xff] }
  0x2e   : > { %1387 = vperm.xlu1 %4441, %v1233_v32   ;;  %1392 = vperm.xlu0 %4440, %v1234_v33   ;;  %v286_v32 = vld [vmem:[%s8697_s1 + $0xa8] sm:$0xff] }
  0x2f   : > { %4282 = vmatmul.mubr.msk.f32.gmra.mxu0 %vm491_vm1, %v271_v34  ;;  %4316 = vmatmul.mubr.msk.f32.gmra.mxu1 %vm491_vm1, %v1177_v35  ;;  %v1192_v33 = vld [vmem:[%s8697_s1 + $0x1a8] sm:$0xff]  ;;  %v328_v34 = vld [vmem:[%s8698_s2 + $0xf8] sm:$0xff]  ;;  %v327_v35 = vld [vmem:[%s8698_s2 + $0xf0] sm:$0xff] }
  0x30   : > { %699 = vmatprep.mubr.f32.mxu0 %v8702_v5  ;;  %1597 = vmatprep.mubr.f32.mxu1 %v8702_v5 }
  0x32   : > { %1377 = vperm.xlu1 %4441, %v1231_v36   ;;  %1382 = vperm.xlu0 %4440, %v1232_v37   ;;  %v287_v36 = vld [vmem:[%s8697_s1 + $0xb0] sm:$0xff] }
  0x33   : > { %4283 = vmatmul.mubr.msk.f32.gmra.mxu0 %vm491_vm1, %v272_v38  ;;  %4317 = vmatmul.mubr.msk.f32.gmra.mxu1 %vm491_vm1, %v1178_v39  ;;  %v1193_v37 = vld [vmem:[%s8697_s1 + $0x1b0] sm:$0xff]  ;;  %v326_v38 = vld [vmem:[%s8698_s2 + $0xe8] sm:$0xff]  ;;  %v325_v39 = vld [vmem:[%s8698_s2 + $0xe0] sm:$0xff] }
  0x34   : > { %705 = vmatprep.mubr.f32.mxu0 %v8702_v5  ;;  %1603 = vmatprep.mubr.f32.mxu1 %v8702_v5 }
  0x36   : > { %1367 = vperm.xlu1 %4441, %v1229_v40   ;;  %1372 = vperm.xlu0 %4440, %v1230_v41   ;;  %v288_v40 = vld [vmem:[%s8697_s1 + $0xb8] sm:$0xff] }
  0x37   : > { %4284 = vmatmul.mubr.msk.f32.gmra.mxu0 %vm491_vm1, %v273_v42  ;;  %4318 = vmatmul.mubr.msk.f32.gmra.mxu1 %vm491_vm1, %v1179_v43  ;;  %v1194_v41 = vld [vmem:[%s8697_s1 + $0x1b8] sm:$0xff]  ;;  %v323_v43 = vld [vmem:[%s8698_s2 + $0xd0] sm:$0xff] }
  0x38   : > { %711 = vmatprep.mubr.f32.mxu0 %v8702_v5  ;;  %1609 = vmatprep.mubr.f32.mxu1 %v8702_v5  ;;  %v324_v42 = vld [vmem:[%s8698_s2 + $0xd8] sm:$0xff] }
  0x3a   : > { %1357 = vperm.xlu1 %4441, %v1227_v44   ;;  %1362 = vperm.xlu0 %4440, %v1228_v45   ;;  %v289_v44 = vld [vmem:[%s8697_s1 + $0xc0] sm:$0xff] }
  0x3b   : > { %4285 = vmatmul.mubr.msk.f32.gmra.mxu0 %vm491_vm1, %v274_v46  ;;  %4319 = vmatmul.mubr.msk.f32.gmra.mxu1 %vm491_vm1, %v1180_v47  ;;  %v1195_v45 = vld [vmem:[%s8697_s1 + $0x1c0] sm:$0xff]  ;;  %v322_v46 = vld [vmem:[%s8698_s2 + $0xc8] sm:$0xff] }
  0x3c   : > { %717 = vmatprep.mubr.f32.mxu0 %v8702_v5  ;;  %1615 = vmatprep.mubr.f32.mxu1 %v8702_v5  ;;  %v321_v47 = vld [vmem:[%s8698_s2 + $0xc0] sm:$0xff] }
  0x3e   : > { %1347 = vperm.xlu1 %4441, %v1225_v48   ;;  %1352 = vperm.xlu0 %4440, %v1226_v49   ;;  %v290_v48 = vld [vmem:[%s8697_s1 + $0xc8] sm:$0xff] }
  0x3f   : > { %4286 = vmatmul.mubr.msk.f32.gmra.mxu0 %vm491_vm1, %v275_v50  ;;  %4320 = vmatmul.mubr.msk.f32.gmra.mxu1 %vm491_vm1, %v1181_v51  ;;  %v1196_v49 = vld [vmem:[%s8697_s1 + $0x1c8] sm:$0xff]  ;;  %v320_v50 = vld [vmem:[%s8698_s2 + $0xb8] sm:$0xff]  ;;  %v319_v51 = vld [vmem:[%s8698_s2 + $0xb0] sm:$0xff] }
  0x40   : > { %723 = vmatprep.mubr.f32.mxu0 %v8702_v5  ;;  %1621 = vmatprep.mubr.f32.mxu1 %v8702_v5 }
  0x42   : > { %1337 = vperm.xlu1 %4441, %v1223_v52   ;;  %1342 = vperm.xlu0 %4440, %v1224_v53   ;;  %v291_v52 = vld [vmem:[%s8697_s1 + $0xd0] sm:$0xff] }
  0x43   : > { %4287 = vmatmul.mubr.msk.f32.gmra.mxu0 %vm491_vm1, %v276_v54  ;;  %4321 = vmatmul.mubr.msk.f32.gmra.mxu1 %vm491_vm1, %v1182_v55  ;;  %v1197_v53 = vld [vmem:[%s8697_s1 + $0x1d0] sm:$0xff]  ;;  %v318_v54 = vld [vmem:[%s8698_s2 + $0xa8] sm:$0xff]  ;;  %v317_v55 = vld [vmem:[%s8698_s2 + $0xa0] sm:$0xff] }
  0x44   : > { %729 = vmatprep.mubr.f32.mxu0 %v8702_v5  ;;  %1627 = vmatprep.mubr.f32.mxu1 %v8702_v5 }
  0x46   : > { %1327 = vperm.xlu1 %4441, %v1221_v56   ;;  %1332 = vperm.xlu0 %4440, %v1222_v57   ;;  %v292_v56 = vld [vmem:[%s8697_s1 + $0xd8] sm:$0xff] }
  0x47   : > { %4288 = vmatmul.mubr.msk.f32.gmra.mxu0 %vm491_vm1, %v277_v58  ;;  %4322 = vmatmul.mubr.msk.f32.gmra.mxu1 %vm491_vm1, %v1183_v59  ;;  %v1198_v57 = vld [vmem:[%s8697_s1 + $0x1d8] sm:$0xff]  ;;  %v315_v59 = vld [vmem:[%s8698_s2 + $0x90] sm:$0xff] }
  0x48   : > { %735 = vmatprep.mubr.f32.mxu0 %v8702_v5  ;;  %1633 = vmatprep.mubr.f32.mxu1 %v8702_v5  ;;  %v316_v58 = vld [vmem:[%s8698_s2 + $0x98] sm:$0xff] }
  0x4a   : > { %1317 = vperm.xlu1 %4441, %v1219_v60   ;;  %1322 = vperm.xlu0 %4440, %v1220_v61   ;;  %v293_v60 = vld [vmem:[%s8697_s1 + $0xe0] sm:$0xff] }
  0x4b   : > { %4289 = vmatmul.mubr.msk.f32.gmra.mxu0 %vm491_vm1, %v278_v62  ;;  %4323 = vmatmul.mubr.msk.f32.gmra.mxu1 %vm491_vm1, %v1184_v63  ;;  %v1199_v61 = vld [vmem:[%s8697_s1 + $0x1e0] sm:$0xff]  ;;  %v314_v62 = vld [vmem:[%s8698_s2 + $0x88] sm:$0xff] }
  0x4c   : > { %741 = vmatprep.mubr.f32.mxu0 %v8702_v5  ;;  %1639 = vmatprep.mubr.f32.mxu1 %v8702_v5  ;;  %v313_v63 = vld [vmem:[%s8698_s2 + $0x80] sm:$0xff] }
  0x4e   : > { %406 = vperm.xlu0 %4440, %v312_v0   ;;  %401 = vperm.xlu1 %4441, %v311_v1  }
  0x4f   : > { %4290 = vmatmul.mubr.msk.f32.gmra.mxu0 %vm491_vm1, %v279_v2  ;;  %4324 = vmatmul.mubr.msk.f32.gmra.mxu1 %vm491_vm1, %v1185_v3  ;;  %v294_v2 = vld [vmem:[%s8697_s1 + $0xe8] sm:$0xff] }
  0x50   : > { %747 = vmatprep.mubr.f32.mxu0 %v8702_v5  ;;  %1645 = vmatprep.mubr.f32.mxu1 %v8702_v5  ;;  %v1200_v3 = vld [vmem:[%s8697_s1 + $0x1e8] sm:$0xff] }
  0x52   : > { %396 = vperm.xlu0 %4440, %v310_v4   ;;  %391 = vperm.xlu1 %4441, %v309_v6   ;;  %v2264_v4 = vld [vmem:[%s8698_s2 + $0x278] sm:$0xff]  ;;  %v2263_v6 = vld [vmem:[%s8698_s2 + $0x270] sm:$0xff] }
  0x53   : > { %4291 = vmatmul.mubr.msk.f32.gmra.mxu0 %vm491_vm1, %v280_v8  ;;  %4325 = vmatmul.mubr.msk.f32.gmra.mxu1 %vm491_vm1, %v1186_v9 }
  0x54   : > { %753 = vmatprep.mubr.f32.mxu0 %v8702_v5  ;;  %1651 = vmatprep.mubr.f32.mxu1 %v8702_v5 }
  0x56   : > { %386 = vperm.xlu0 %4440, %v308_v10   ;;  %381 = vperm.xlu1 %4441, %v307_v11   ;;  %v295_v10 = vld [vmem:[%s8697_s1 + $0xf0] sm:$0xff] }
  0x57   : > { %4292 = vmatmul.mubr.msk.f32.gmra.mxu0 %vm491_vm1, %v281_v12  ;;  %4326 = vmatmul.mubr.msk.f32.gmra.mxu1 %vm491_vm1, %v1187_v13  ;;  %v1201_v11 = vld [vmem:[%s8697_s1 + $0x1f0] sm:$0xff]  ;;  %v2262_v12 = vld [vmem:[%s8698_s2 + $0x268] sm:$0xff]  ;;  %v2261_v13 = vld [vmem:[%s8698_s2 + $0x260] sm:$0xff] }
  0x58   : > { %759 = vmatprep.mubr.f32.mxu0 %v8702_v5  ;;  %1657 = vmatprep.mubr.f32.mxu1 %v8702_v5 }
  0x5a   : > { %376 = vperm.xlu0 %4440, %v306_v14   ;;  %371 = vperm.xlu1 %4441, %v305_v15  }
  0x5b   : > { %4293 = vmatmul.mubr.msk.f32.gmra.mxu0 %vm491_vm1, %v282_v16  ;;  %4327 = vmatmul.mubr.msk.f32.gmra.mxu1 %vm491_vm1, %v1188_v17  ;;  %v296_v16 = vld [vmem:[%s8697_s1 + $0xf8] sm:$0xff] }
  0x5c   : > { %765 = vmatprep.mubr.f32.mxu0 %v8702_v5  ;;  %1663 = vmatprep.mubr.f32.mxu1 %v8702_v5  ;;  %v1202_v17 = vld [vmem:[%s8697_s1 + $0x1f8] sm:$0xff] }
  0x5e   : > { %366 = vperm.xlu0 %4440, %v304_v18   ;;  %361 = vperm.xlu1 %4441, %v303_v19   ;;  %v2260_v18 = vld [vmem:[%s8698_s2 + $0x258] sm:$0xff]  ;;  %v2259_v19 = vld [vmem:[%s8698_s2 + $0x250] sm:$0xff] }
  0x5f   : > { %4294 = vmatmul.mubr.msk.f32.gmra.mxu0 %vm491_vm1, %v283_v20  ;;  %4328 = vmatmul.mubr.msk.f32.gmra.mxu1 %vm491_vm1, %v1189_v21 }
  0x60   : > { %771 = vmatprep.mubr.f32.mxu0 %v8702_v5  ;;  %1669 = vmatprep.mubr.f32.mxu1 %v8702_v5 }
  0x62   : > { %356 = vperm.xlu0 %4440, %v302_v22   ;;  %351 = vperm.xlu1 %4441, %v301_v23   ;;  %v2258_v22 = vld [vmem:[%s8698_s2 + $0x248] sm:$0xff]  ;;  %v2257_v23 = vld [vmem:[%s8698_s2 + $0x240] sm:$0xff] }
  0x63   : > { %4295 = vmatmul.mubr.msk.f32.gmra.mxu0 %vm491_vm1, %v284_v24  ;;  %4329 = vmatmul.mubr.msk.f32.gmra.mxu1 %vm491_vm1, %v1190_v25 }
  0x64   : > { %777 = vmatprep.mubr.f32.mxu0 %v8702_v5  ;;  %1675 = vmatprep.mubr.f32.mxu1 %v8702_v5 }
  0x66   : > { %346 = vperm.xlu0 %4440, %v300_v26   ;;  %341 = vperm.xlu1 %4441, %v299_v27   ;;  %v2256_v26 = vld [vmem:[%s8698_s2 + $0x238] sm:$0xff]  ;;  %v2255_v27 = vld [vmem:[%s8698_s2 + $0x230] sm:$0xff] }
  0x67   : > { %4296 = vmatmul.mubr.msk.f32.gmra.mxu0 %vm491_vm1, %v285_v28  ;;  %4330 = vmatmul.mubr.msk.f32.gmra.mxu1 %vm491_vm1, %v1191_v29 }
  0x68   : > { %783 = vmatprep.mubr.f32.mxu0 %v8702_v5  ;;  %1681 = vmatprep.mubr.f32.mxu1 %v8702_v5 }
  0x6a   : > { %336 = vperm.xlu0 %4440, %v298_v30   ;;  %331 = vperm.xlu1 %4441, %v297_v31   ;;  %v2254_v30 = vld [vmem:[%s8698_s2 + $0x228] sm:$0xff]  ;;  %v2253_v31 = vld [vmem:[%s8698_s2 + $0x220] sm:$0xff] }
  0x6b   : > { %4297 = vmatmul.mubr.msk.f32.gmra.mxu0 %vm491_vm1, %v286_v32  ;;  %4331 = vmatmul.mubr.msk.f32.gmra.mxu1 %vm491_vm1, %v1192_v33 }
  0x6c   : > { %789 = vmatprep.mubr.f32.mxu0 %v8702_v5  ;;  %1687 = vmatprep.mubr.f32.mxu1 %v8702_v5 }
  0x6e   : > { %486 = vperm.xlu0 %4440, %v328_v34   ;;  %481 = vperm.xlu1 %4441, %v327_v35   ;;  %v2252_v34 = vld [vmem:[%s8698_s2 + $0x218] sm:$0xff]  ;;  %v2251_v35 = vld [vmem:[%s8698_s2 + $0x210] sm:$0xff] }
  0x6f   : > { %4298 = vmatmul.mubr.msk.f32.gmra.mxu0 %vm491_vm1, %v287_v36  ;;  %4332 = vmatmul.mubr.msk.f32.gmra.mxu1 %vm491_vm1, %v1193_v37 }
  0x70   : > { %795 = vmatprep.mubr.f32.mxu0 %v8702_v5  ;;  %1693 = vmatprep.mubr.f32.mxu1 %v8702_v5 }
  0x72   : > { %476 = vperm.xlu0 %4440, %v326_v38   ;;  %471 = vperm.xlu1 %4441, %v325_v39   ;;  %v2250_v38 = vld [vmem:[%s8698_s2 + $0x208] sm:$0xff]  ;;  %v2249_v39 = vld [vmem:[%s8698_s2 + $0x200] sm:$0xff] }
  0x73   : > { %4299 = vmatmul.mubr.msk.f32.gmra.mxu0 %vm491_vm1, %v288_v40  ;;  %4333 = vmatmul.mubr.msk.f32.gmra.mxu1 %vm491_vm1, %v1194_v41 }
  0x74   : > { %801 = vmatprep.mubr.f32.mxu0 %v8702_v5  ;;  %1699 = vmatprep.mubr.f32.mxu1 %v8702_v5 }
  0x76   : > { %466 = vperm.xlu0 %4440, %v324_v42   ;;  %461 = vperm.xlu1 %4441, %v323_v43   ;;  %v2280_v42 = vld [vmem:[%s8698_s2 + $0x2f8] sm:$0xff]  ;;  %v2279_v43 = vld [vmem:[%s8698_s2 + $0x2f0] sm:$0xff] }
  0x77   : > { %4300 = vmatmul.mubr.msk.f32.gmra.mxu0 %vm491_vm1, %v289_v44  ;;  %4334 = vmatmul.mubr.msk.f32.gmra.mxu1 %vm491_vm1, %v1195_v45 }
  0x78   : > { %807 = vmatprep.mubr.f32.mxu0 %v8702_v5  ;;  %1705 = vmatprep.mubr.f32.mxu1 %v8702_v5 }
  0x7a   : > { %456 = vperm.xlu0 %4440, %v322_v46   ;;  %451 = vperm.xlu1 %4441, %v321_v47   ;;  %v2278_v46 = vld [vmem:[%s8698_s2 + $0x2e8] sm:$0xff]  ;;  %v2277_v47 = vld [vmem:[%s8698_s2 + $0x2e0] sm:$0xff] }
  0x7b   : > { %4301 = vmatmul.mubr.msk.f32.gmra.mxu0 %vm491_vm1, %v290_v48  ;;  %4335 = vmatmul.mubr.msk.f32.gmra.mxu1 %vm491_vm1, %v1196_v49 }
  0x7c   : > { %813 = vmatprep.mubr.f32.mxu0 %v8702_v5  ;;  %1711 = vmatprep.mubr.f32.mxu1 %v8702_v5 }
  0x7e   : > { %446 = vperm.xlu0 %4440, %v320_v50   ;;  %441 = vperm.xlu1 %4441, %v319_v51   ;;  %v2276_v50 = vld [vmem:[%s8698_s2 + $0x2d8] sm:$0xff]  ;;  %v2275_v51 = vld [vmem:[%s8698_s2 + $0x2d0] sm:$0xff] }
  0x7f   : > { %4302 = vmatmul.mubr.msk.f32.gmra.mxu0 %vm491_vm1, %v291_v52  ;;  %4336 = vmatmul.mubr.msk.f32.gmra.mxu1 %vm491_vm1, %v1197_v53 }
  0x80   : > { %819 = vmatprep.mubr.f32.mxu0 %v8702_v5  ;;  %1717 = vmatprep.mubr.f32.mxu1 %v8702_v5 }
  0x82   : > { %436 = vperm.xlu0 %4440, %v318_v54   ;;  %431 = vperm.xlu1 %4441, %v317_v55   ;;  %v2274_v54 = vld [vmem:[%s8698_s2 + $0x2c8] sm:$0xff]  ;;  %v2273_v55 = vld [vmem:[%s8698_s2 + $0x2c0] sm:$0xff] }
  0x83   : > { %4303 = vmatmul.mubr.msk.f32.gmra.mxu0 %vm491_vm1, %v292_v56  ;;  %4337 = vmatmul.mubr.msk.f32.gmra.mxu1 %vm491_vm1, %v1198_v57 }
  0x84   : > { %825 = vmatprep.mubr.f32.mxu0 %v8702_v5  ;;  %1723 = vmatprep.mubr.f32.mxu1 %v8702_v5 }
  0x86   : > { %426 = vperm.xlu0 %4440, %v316_v58   ;;  %421 = vperm.xlu1 %4441, %v315_v59   ;;  %v2272_v58 = vld [vmem:[%s8698_s2 + $0x2b8] sm:$0xff]  ;;  %v2271_v59 = vld [vmem:[%s8698_s2 + $0x2b0] sm:$0xff] }
  0x87   : > { %4304 = vmatmul.mubr.msk.f32.gmra.mxu0 %vm491_vm1, %v293_v60  ;;  %4338 = vmatmul.mubr.msk.f32.gmra.mxu1 %vm491_vm1, %v1199_v61  ;;  %v2270_v61 = vld [vmem:[%s8698_s2 + $0x2a8] sm:$0xff] }
  0x88   : > { %831 = vmatprep.mubr.f32.mxu0 %v8702_v5  ;;  %1729 = vmatprep.mubr.f32.mxu1 %v8702_v5 }
  0x89   : > { %v5538_v0 = vpop.permute.xlu1 %1302  ;;  %v5540_v1 = vpop.permute.xlu0 %1312 }
  0x8a   : > { %8857 = vst [vmem:[#allocation3_spill] sm:$0xff] %v5538_v0  ;;  %8858 = vst [vmem:[#allocation4_spill] sm:$0xff] %v5540_v1  ;;  %416 = vperm.xlu0 %4440, %v314_v62   ;;  %411 = vperm.xlu1 %4441, %v313_v63   ;;  %v2269_v62 = vld [vmem:[%s8698_s2 + $0x2a0] sm:$0xff] }
  0x8b   : > { %4305 = vmatmul.mubr.msk.f32.gmra.mxu0 %vm491_vm1, %v294_v2  ;;  %4339 = vmatmul.mubr.msk.f32.gmra.mxu1 %vm491_vm1, %v1200_v3  ;;  %v2268_v2 = vld [vmem:[%s8698_s2 + $0x298] sm:$0xff]  ;;  %v2267_v3 = vld [vmem:[%s8698_s2 + $0x290] sm:$0xff] }
  0x8c   : > { %837 = vmatprep.mubr.f32.mxu0 %v8702_v5  ;;  %1735 = vmatprep.mubr.f32.mxu1 %v8702_v5 }
  0x8d   : > { %v5558_v8 = vpop.permute.xlu1 %1297  ;;  %v5560_v9 = vpop.permute.xlu0 %1307 }
  0x8e   : > { %8859 = vst [vmem:[#allocation5_spill] sm:$0xff] %v5558_v8  ;;  %8860 = vst [vmem:[#allocation6_spill] sm:$0xff] %v5560_v9  ;;  %2358 = vperm.xlu0 %4440, %v2264_v4   ;;  %2353 = vperm.xlu1 %4441, %v2263_v6  }
  0x8f   : > { %4306 = vmatmul.mubr.msk.f32.gmra.mxu0 %vm491_vm1, %v295_v10  ;;  %4340 = vmatmul.mubr.msk.f32.gmra.mxu1 %vm491_vm1, %v1201_v11  ;;  %v2266_v10 = vld [vmem:[%s8698_s2 + $0x288] sm:$0xff]  ;;  %v2265_v11 = vld [vmem:[%s8698_s2 + $0x280] sm:$0xff] }
  0x90   : > { %843 = vmatprep.mubr.f32.mxu0 %v8702_v5  ;;  %1741 = vmatprep.mubr.f32.mxu1 %v8702_v5 }
  0x91   : > { %v5578_v14 = vpop.permute.xlu1 %1287  ;;  %v5580_v15 = vpop.permute.xlu0 %1292 }
  0x92   : > { %8861 = vst [vmem:[#allocation7_spill] sm:$0xff] %v5580_v15  ;;  %2348 = vperm.xlu0 %4440, %v2262_v12   ;;  %2343 = vperm.xlu1 %4441, %v2261_v13   ;;  %v3238_v13 = vld [vmem:[%s8698_s2 + $0x378] sm:$0xff] }
  0x93   : > { %4307 = vmatmul.mubr.msk.f32.gmra.mxu0 %vm491_vm1, %v296_v16  ;;  %4341 = vmatmul.mubr.msk.f32.gmra.mxu1 %vm491_vm1, %v1202_v17  ;;  %v3237_v16 = vld [vmem:[%s8698_s2 + $0x370] sm:$0xff] }
  0x95   : > { %v5598_v20 = vpop.permute.xlu1 %1277  ;;  %v5600_v21 = vpop.permute.xlu0 %1282 }
  0x96   : > { %2338 = vperm.xlu0 %4440, %v2260_v18   ;;  %2333 = vperm.xlu1 %4441, %v2259_v19   ;;  %v3236_v18 = vld [vmem:[%s8698_s2 + $0x368] sm:$0xff]  ;;  %v3235_v19 = vld [vmem:[%s8698_s2 + $0x360] sm:$0xff] }
  0x99   : > { %v5608_v24 = vpop.permute.xlu1 %1267  ;;  %v5610_v25 = vpop.permute.xlu0 %1272 }
  0x9a   : > { %8862 = vst [vmem:[#allocation8_spill] sm:$0xff] %v5610_v25  ;;  %2328 = vperm.xlu0 %4440, %v2258_v22   ;;  %2323 = vperm.xlu1 %4441, %v2257_v23  }
  0x9d   : > { %v5618_v28 = vpop.permute.xlu1 %1257  ;;  %v5620_v29 = vpop.permute.xlu0 %1262 }
  0x9e   : > { %2318 = vperm.xlu0 %4440, %v2256_v26   ;;  %2313 = vperm.xlu1 %4441, %v2255_v27   ;;  %v3234_v26 = vld [vmem:[%s8698_s2 + $0x358] sm:$0xff]  ;;  %v3233_v27 = vld [vmem:[%s8698_s2 + $0x350] sm:$0xff] }
  0xa1   : > { %v5628_v32 = vpop.permute.xlu1 %1247  ;;  %v5630_v33 = vpop.permute.xlu0 %1252 }
  0xa2   : > { %2308 = vperm.xlu0 %4440, %v2254_v30   ;;  %2303 = vperm.xlu1 %4441, %v2253_v31   ;;  %v3232_v31 = vld [vmem:[%s8698_s2 + $0x348] sm:$0xff] }
  0xa5   : > { %v5638_v36 = vpop.permute.xlu1 %1237  ;;  %v5640_v37 = vpop.permute.xlu0 %1242 }
  0xa6   : > { %2298 = vperm.xlu0 %4440, %v2252_v34   ;;  %2293 = vperm.xlu1 %4441, %v2251_v35   ;;  %v3231_v34 = vld [vmem:[%s8698_s2 + $0x340] sm:$0xff] }
  0xa9   : > { %v5648_v40 = vpop.permute.xlu1 %1387  ;;  %v5650_v41 = vpop.permute.xlu0 %1392 }
  0xaa   : > { %8863 = vst [vmem:[#allocation9_spill] sm:$0xff] %v5648_v40  ;;  %8864 = vst [vmem:[#allocation10_spill] sm:$0xff] %v5650_v41  ;;  %2288 = vperm.xlu0 %4440, %v2250_v38   ;;  %2283 = vperm.xlu1 %4441, %v2249_v39   ;;  %v3253_v40 = vld [vmem:[%s8698_s2 + $0x3f0] sm:$0xff] }
  0xad   : > { %v5658_v44 = vpop.permute.xlu1 %1377  ;;  %v5660_v45 = vpop.permute.xlu0 %1382 }
  0xae   : > { %8865 = vst [vmem:[#allocation11_spill] sm:$0xff] %v5658_v44  ;;  %8866 = vst [vmem:[#allocation12_spill] sm:$0xff] %v5660_v45  ;;  %2438 = vperm.xlu0 %4440, %v2280_v42   ;;  %2433 = vperm.xlu1 %4441, %v2279_v43  }
  0xb1   : > { %v5668_v48 = vpop.permute.xlu1 %1367  ;;  %v5670_v49 = vpop.permute.xlu0 %1372 }
  0xb2   : > { %8867 = vst [vmem:[#allocation13_spill] sm:$0xff] %v5668_v48  ;;  %8868 = vst [vmem:[#allocation14_spill] sm:$0xff] %v5670_v49  ;;  %2428 = vperm.xlu0 %4440, %v2278_v46   ;;  %2423 = vperm.xlu1 %4441, %v2277_v47   ;;  %v3230_v46 = vld [vmem:[%s8698_s2 + $0x338] sm:$0xff]  ;;  %v3229_v47 = vld [vmem:[%s8698_s2 + $0x330] sm:$0xff] }
  0xb5   : > { %v5678_v52 = vpop.permute.xlu1 %1357  ;;  %v5680_v53 = vpop.permute.xlu0 %1362 }
  0xb6   : > { %8869 = vst [vmem:[#allocation15_spill] sm:$0xff] %v5678_v52  ;;  %8870 = vst [vmem:[#allocation16_spill] sm:$0xff] %v5680_v53  ;;  %2418 = vperm.xlu0 %4440, %v2276_v50   ;;  %2413 = vperm.xlu1 %4441, %v2275_v51   ;;  %v3251_v53 = vld [vmem:[%s8698_s2 + $0x3e0] sm:$0xff] }
  0xb9   : > { %v5688_v56 = vpop.permute.xlu0 %1352  ;;  %v5690_v57 = vpop.permute.xlu1 %1347 }
  0xba   : > { %8871 = vst [vmem:[#allocation17_spill] sm:$0xff] %v5688_v56  ;;  %2408 = vperm.xlu0 %4440, %v2274_v54   ;;  %2403 = vperm.xlu1 %4441, %v2273_v55   ;;  %8872 = vst [vmem:[#allocation18_spill] sm:$0xff] %v5690_v57 }
  0xbd   : > { %v5698_v60 = vpop.permute.xlu0 %1342  ;;  %v5706_v63 = vpop.permute.xlu1 %1337 }
  0xbe   : > { %2398 = vperm.xlu0 %4440, %v2272_v58   ;;  %2393 = vperm.xlu1 %4441, %v2271_v59   ;;  %8873 = vst [vmem:[#allocation19_spill] sm:$0xff] %v5698_v60  ;;  %8874 = vst [vmem:[#allocation20_spill] sm:$0xff] %v5706_v63  ;;  %v3250_v63 = vld [vmem:[%s8698_s2 + $0x3d8] sm:$0xff] }
  0xc1   : > { %v5714_v4 = vpop.permute.xlu0 %1332  ;;  %v5716_v6 = vpop.permute.xlu1 %1327 }
  0xc2   : > { %2388 = vperm.xlu0 %4440, %v2270_v61   ;;  %2383 = vperm.xlu1 %4441, %v2269_v62   ;;  %8875 = vst [vmem:[#allocation21_spill] sm:$0xff] %v5714_v4  ;;  %8876 = vst [vmem:[#allocation22_spill] sm:$0xff] %v5716_v6  ;;  %v3228_v61 = vld [vmem:[%s8698_s2 + $0x328] sm:$0xff]  ;;  %v3227_v62 = vld [vmem:[%s8698_s2 + $0x320] sm:$0xff] }
  0xc3   : > { %v3249_v4 = vld [vmem:[%s8698_s2 + $0x3d0] sm:$0xff] }
  0xc5   : > { %v5724_v12 = vpop.permute.xlu0 %1322  ;;  %v5732_v17 = vpop.permute.xlu1 %1317 }
  0xc6   : > { %2378 = vperm.xlu0 %4440, %v2268_v2   ;;  %2373 = vperm.xlu1 %4441, %v2267_v3   ;;  %8877 = vst [vmem:[#allocation23_spill] sm:$0xff] %v5724_v12  ;;  %8878 = vst [vmem:[#allocation24_spill] sm:$0xff] %v5732_v17 }
  0xc9   : > { %v5740_v22 = vpop.permute.xlu0 %406  ;;  %v5742_v23 = vpop.permute.xlu1 %401 }
  0xca   : > { %2368 = vperm.xlu0 %4440, %v2266_v10   ;;  %2363 = vperm.xlu1 %4441, %v2265_v11   ;;  %8879 = vst [vmem:[#allocation25_spill] sm:$0xff] %v5740_v22  ;;  %8880 = vst [vmem:[#allocation26_spill] sm:$0xff] %v5742_v23 }
  0xcd   : > { %v5750_v30 = vpop.permute.xlu0 %396  ;;  %v5760_v39 = vpop.permute.xlu1 %391 }
  0xce   : > { %3332 = vperm.xlu0 %4440, %v3238_v13   ;;  %3327 = vperm.xlu1 %4441, %v3237_v16   ;;  %8881 = vst [vmem:[#allocation27_spill] sm:$0xff] %v5750_v30  ;;  %8882 = vst [vmem:[#allocation28_spill] sm:$0xff] %v5760_v39  ;;  %v3226_v16 = vld [vmem:[%s8698_s2 + $0x318] sm:$0xff] }
  0xd1   : > { %v5772_v54 = vpop.permute.xlu0 %386  ;;  %v5776_v59 = vpop.permute.xlu1 %381 }
  0xd2   : > { %3322 = vperm.xlu0 %4440, %v3236_v18   ;;  %3317 = vperm.xlu1 %4441, %v3235_v19   ;;  %v3225_v18 = vld [vmem:[%s8698_s2 + $0x310] sm:$0xff] }
  0xd5   : > { %v5790_v13 = vpop.permute.xlu0 %376 }
  0xd6   : > { %3312 = vperm.xlu0 %4440, %v3234_v26   ;;  %3307 = vperm.xlu1 %4441, %v3233_v27   ;;  %v5802_v27 = vpop.permute.xlu1 %371 }
  0xd7   : > { %v5758_v35 = vpop.f32.mrf.mxu0  ;;  %v1557_v38 = vpop.f32.mrf.mxu1 }
  0xd9   : > { %v5762_v42 = vpop.f32.mrf.mxu0  ;;  %v1559_v43 = vpop.f32.mrf.mxu1 }
  0xda   : > { %3302 = vperm.xlu0 %4440, %v3232_v31   ;;  %3297 = vperm.xlu1 %4441, %v3231_v34   ;;  %v5818_v5 = vpop.permute.xlu0 %366  ;;  %v5868_v6 = vadd.f32 %v1559_v43, %v5638_v36 }
  0xdb   : > { %v5770_v50 = vpop.f32.mrf.mxu0  ;;  %v1563_v51 = vpop.f32.mrf.mxu1 }
  0xdd   : > { %v5774_v55 = vpop.f32.mrf.mxu0  ;;  %v1565_v58 = vpop.f32.mrf.mxu1 }
  0xde   : > { %3292 = vperm.xlu0 %4440, %v3230_v46   ;;  %3287 = vperm.xlu1 %4441, %v3229_v47   ;;  %v3224_v46 = vld [vmem:[%s8698_s2 + $0x308] sm:$0xff]  ;;  %v3223_v47 = vld [vmem:[%s8698_s2 + $0x300] sm:$0xff] }
  0xdf   : > { %v5784_v2 = vpop.f32.mrf.mxu0  ;;  %v1569_v3 = vpop.f32.mrf.mxu1 }
  0xe0   : > { %v5886_v43 = vadd.f32 %v1569_v3, %v5628_v32 }
  0xe1   : > { %v5786_v10 = vpop.f32.mrf.mxu0  ;;  %v5788_v11 = vpop.f32.mrf.mxu1 }
  0xe2   : > { %3282 = vperm.xlu0 %4440, %v3228_v61   ;;  %3277 = vperm.xlu1 %4441, %v3227_v62   ;;  %8886 = vst [vmem:[#allocation32_spill] sm:$0xff] %v5886_v43  ;;  %v5909_v0 = vadd.f32 %v5788_v11, %v5628_v32  ;;  %v3245_v32 = vld [vmem:[%s8698_s2 + $0x3b0] sm:$0xff] }
  0xe3   : > { %v5798_v19 = vpop.f32.mrf.mxu0  ;;  %v5800_v26 = vpop.f32.mrf.mxu1 }
  0xe5   : > { %v5804_v31 = vpop.f32.mrf.mxu0  ;;  %v5806_v34 = vpop.f32.mrf.mxu1 }
  0xe6   : > { %3272 = vperm.xlu0 %4440, %v3226_v16   ;;  %3267 = vperm.xlu1 %4441, %v3225_v18   ;;  %v5824_v16 = vpop.permute.xlu1 %361  ;;  %v3254_v18 = vld [vmem:[%s8698_s2 + $0x3f8] sm:$0xff] }
  0xe7   : > { %v5814_v61 = vpop.f32.mrf.mxu0  ;;  %v5816_v62 = vpop.f32.mrf.mxu1 }
  0xe9   : > { %v5820_v7 = vpop.f32.mrf.mxu0  ;;  %v5822_v41 = vpop.f32.mrf.mxu1 }
  0xea   : > { %3262 = vperm.xlu0 %4440, %v3224_v46   ;;  %3257 = vperm.xlu1 %4441, %v3223_v47   ;;  %v5840_v46 = vpop.permute.xlu0 %356  ;;  %v3252_v47 = vld [vmem:[%s8698_s2 + $0x3e8] sm:$0xff]  ;;  %v5852_v57 = vpop.permute.xlu1 %351 }
  0xeb   : > { %v5832_v45 = vpop.f32.mrf.mxu0  ;;  %v5834_v44 = vpop.f32.mrf.mxu1 }
  0xed   : > { %v5836_v49 = vpop.f32.mrf.mxu0  ;;  %v5838_v48 = vpop.f32.mrf.mxu1 }
  0xee   : > { %3412 = vperm.xlu0 %4440, %v3254_v18   ;;  %3407 = vperm.xlu1 %4441, %v3253_v40   ;;  %v5859_v40 = vadd.f32 %v1557_v38, %v5638_v36  ;;  %v347_v38 = vpop.permute.xlu0 %346  ;;  %v342_v9 = vpop.permute.xlu1 %341 }
  0xef   : > { %v5848_v52 = vpop.f32.mrf.mxu0  ;;  %v5850_v56 = vpop.f32.mrf.mxu1  ;;  %v5917_v39 = vadd.f32 %v5798_v19, %v347_v38 }
  0xf0   : > { %8883 = vst [vmem:[#allocation29_spill] sm:$0xff] %v5859_v40  ;;  %v1748_v36 = vmul.f32 0.5, %v5859_v40  ;;  %v5904_v40 = vadd.f32 %v5786_v10, %v342_v9  ;;  %v3246_v10 = vld [vmem:[%s8698_s2 + $0x3b8] sm:$0xff] }
  0xf1   : > { %v5854_v60 = vpop.f32.mrf.mxu0  ;;  %v5856_v18 = vpop.f32.mrf.mxu1  ;;  %8888 = vst [vmem:[#allocation34_spill] sm:$0xff] %v5917_v39 }
  0xf2   : > { %3402 = vperm.xlu0 %4440, %v3252_v47   ;;  %3397 = vperm.xlu1 %4441, %v3251_v53   ;;  %v5875_v53 = vadd.f32 %v1563_v51, %v5640_v37  ;;  %v5878_v47 = vadd.f32 %v1565_v58, %v5640_v37  ;;  %v3248_v51 = vld [vmem:[%s8698_s2 + $0x3c8] sm:$0xff]  ;;  %v3247_v37 = vld [vmem:[%s8698_s2 + $0x3c0] sm:$0xff]  ;;  %v1749_v58 = vmul.f32 0.5, %v5868_v6  ;;  %4447 = vtanh.f32 %v1748_v36 }
  0xf3   : > { %v5870_v12 = vpop.f32.mrf.mxu0  ;;  %v5872_v17 = vpop.f32.mrf.mxu1  ;;  %v5928_v36 = vadd.f32 %v5800_v26, %v5630_v33 }
  0xf4   : > { %8884 = vst [vmem:[#allocation30_spill] sm:$0xff] %v5872_v17  ;;  %8885 = vst [vmem:[#allocation31_spill] sm:$0xff] %v5878_v47  ;;  %v5896_v17 = vadd.f32 %v5784_v2, %v342_v9  ;;  %v1750_v3 = vmul.f32 0.5, %v5875_v53  ;;  %v1751_v23 = vmul.f32 0.5, %v5878_v47  ;;  %v1752_v2 = vmul.f32 0.5, %v5886_v43  ;;  %v337_v9 = vpop.permute.xlu0 %336  ;;  %v332_v47 = vpop.permute.xlu1 %331 }
  0xf5   : > { %v5880_v1 = vpop.f32.mrf.mxu0  ;;  %v5882_v22 = vpop.f32.mrf.mxu1  ;;  %4449 = vtanh.f32 %v1749_v58  ;;  %8889 = vst [vmem:[#allocation35_spill] sm:$0xff] %v5928_v36  ;;  %v5936_v43 = vadd.f32 %v5770_v50, %v337_v9  ;;  %v1753_v58 = vmul.f32 0.5, %v5909_v0  ;;  %v3243_v50 = vld [vmem:[%s8698_s2 + $0x3a0] sm:$0xff] }
  0xf6   : > { %3392 = vperm.xlu0 %4440, %v3250_v63   ;;  %3387 = vperm.xlu1 %4441, %v3249_v4   ;;  %8887 = vst [vmem:[#allocation33_spill] sm:$0xff] %v5896_v17  ;;  %v854_v11 = vmul.f32 0.5, %v5896_v17  ;;  %4451 = vtanh.f32 %v1750_v3  ;;  %v5940_v17 = vadd.f32 %v5774_v55, %v337_v9  ;;  %v856_v3 = vmul.f32 0.5, %v5917_v39 }
  0xf7   : > { %v5898_v63 = vpop.f32.mrf.mxu0  ;;  %v5900_v4 = vpop.f32.mrf.mxu1  ;;  %8891 = vst [vmem:[#allocation37_spill] sm:$0xff] %v5936_v43  ;;  %4453 = vtanh.f32 %v1751_v23  ;;  %v3244_v23 = vld [vmem:[%s8698_s2 + $0x3a8] sm:$0xff]  ;;  %v1754_v55 = vmul.f32 0.5, %v5928_v36  ;;  %v5958_v9 = vadd.f32 %v5762_v42, %v332_v47 }
  0xf8   : > { %8892 = vst [vmem:[#allocation38_spill] sm:$0xff] %v5940_v17  ;;  %4455 = vtanh.f32 %v1752_v2  ;;  %v853_v39 = vmul.f32 0.5, %v5940_v17 }
  0xf9   : > { %v5911_v30 = vpop.f32.mrf.mxu0  ;;  %v5913_v8 = vpop.f32.mrf.mxu1  ;;  %4457 = vtanh.f32 %v854_v11  ;;  %8894 = vst [vmem:[#allocation40_spill] sm:$0xff] %v5958_v9  ;;  %v5971_v11 = vadd.f32 %v5806_v34, %v5630_v33  ;;  %v3241_v33 = vld [vmem:[%s8698_s2 + $0x390] sm:$0xff]  ;;  %v851_v34 = vmul.f32 0.5, %v5958_v9 }
  0xfa   : > { %3382 = vperm.xlu0 %4440, %v3248_v51   ;;  %3377 = vperm.xlu1 %4441, %v3247_v37   ;;  %v855_v37 = vmul.f32 0.5, %v5904_v40 }
  0xfb   : > { %v5930_v51 = vpop.f32.mrf.mxu0  ;;  %v5932_v19 = vpop.f32.mrf.mxu1  ;;  %8896 = vst [vmem:[#allocation42_spill] sm:$0xff] %v5971_v11 }
  0xfc   : > { %8890 = vst [vmem:[#allocation36_spill] sm:$0xff] %v5932_v19  ;;  %v5948_v19 = vadd.f32 %v5758_v35, %v332_v47  ;;  %4459 = vtanh.f32 %v855_v37  ;;  %v852_v35 = vmul.f32 0.5, %v5936_v43  ;;  %v5991_v37 = vadd.f32 %v5816_v62, %v5618_v28 }
  0xfd   : > { %v5942_v15 = vpop.f32.mrf.mxu0  ;;  %v5944_v26 = vpop.f32.mrf.mxu1  ;;  %4461 = vtanh.f32 %v1753_v58  ;;  %v6034_v43 = vadd.f32 %v5836_v49, %v5840_v46 }
  0xfe   : > { %3372 = vperm.xlu0 %4440, %v3246_v10   ;;  %3367 = vperm.xlu1 %4441, %v3245_v32   ;;  %8893 = vst [vmem:[#allocation39_spill] sm:$0xff] %v5948_v19  ;;  %v5966_v32 = vadd.f32 %v5804_v31, %v347_v38  ;;  %4463 = vtanh.f32 %v856_v3  ;;  %v850_v47 = vmul.f32 0.5, %v5948_v19  ;;  %v5980_v31 = vadd.f32 %v5814_v61, %v5852_v57  ;;  %v3242_v38 = vld [vmem:[%s8698_s2 + $0x398] sm:$0xff] }
  0xff   : > { %v5960_v2 = vpop.f32.mrf.mxu0  ;;  %v5962_v10 = vpop.f32.mrf.mxu1  ;;  %4465 = vtanh.f32 %v1754_v55  ;;  %8898 = vst [vmem:[#allocation44_spill] sm:$0xff] %v5991_v37  ;;  %v6005_v55 = vadd.f32 %v5822_v41, %v5618_v28  ;;  %v3239_v28 = vld [vmem:[%s8698_s2 + $0x380] sm:$0xff]  ;;  %8903 = vst [vmem:[#allocation49_spill] sm:$0xff] %v6034_v43 }
 0x100   : > { %8895 = vst [vmem:[#allocation41_spill] sm:$0xff] %v5966_v32  ;;  %8897 = vst [vmem:[#allocation43_spill] sm:$0xff] %v5980_v31  ;;  %4467 = vtanh.f32 %v852_v35  ;;  %v857_v61 = vmul.f32 0.5, %v5966_v32  ;;  %v858_v35 = vmul.f32 0.5, %v5980_v31  ;;  %v4448_v41 = vpop.eup %4447 }
 0x101   : > { %v5973_v36 = vpop.f32.mrf.mxu0  ;;  %v5975_v42 = vpop.f32.mrf.mxu1  ;;  %4469 = vtanh.f32 %v853_v39  ;;  %8900 = vst [vmem:[#allocation46_spill] sm:$0xff] %v6005_v55  ;;  %v1756_v39 = vmul.f32 0.5, %v5991_v37 }
 0x102   : > { %3362 = vperm.xlu0 %4440, %v3244_v23   ;;  %3357 = vperm.xlu1 %4441, %v3243_v50   ;;  %v6000_v23 = vadd.f32 %v5820_v7, %v5852_v57  ;;  %v1755_v50 = vmul.f32 0.5, %v5971_v11  ;;  %4471 = vtanh.f32 %v850_v47  ;;  %v6014_v7 = vadd.f32 %v5832_v45, %v5840_v46  ;;  %v3240_v57 = vld [vmem:[%s8698_s2 + $0x388] sm:$0xff] }
 0x103   : > { %v5993_v58 = vpop.f32.mrf.mxu0  ;;  %v5995_v3 = vpop.f32.mrf.mxu1  ;;  %4473 = vtanh.f32 %v851_v34  ;;  %v6025_v47 = vadd.f32 %v5834_v44, %v5620_v29  ;;  %v1757_v34 = vmul.f32 0.5, %v6005_v55  ;;  %v6039_v44 = vadd.f32 %v5838_v48, %v5620_v29  ;;  %v4165_v29 = vld [vmem:[%s8700_s4] sm:$0xf] }
 0x104   : > { %8899 = vst [vmem:[#allocation45_spill] sm:$0xff] %v6000_v23  ;;  %8901 = vst [vmem:[#allocation47_spill] sm:$0xff] %v6014_v7  ;;  %4475 = vtanh.f32 %v857_v61  ;;  %v859_v9 = vmul.f32 0.5, %v6000_v23  ;;  %v860_v49 = vmul.f32 0.5, %v6014_v7  ;;  %v6050_v46 = vadd.f32 %v5848_v52, %v5824_v16 }
 0x105   : > { %v6007_v62 = vpop.f32.mrf.mxu0  ;;  %v6009_v19 = vpop.f32.mrf.mxu1  ;;  %8902 = vst [vmem:[#allocation48_spill] sm:$0xff] %v6025_v47  ;;  %4477 = vtanh.f32 %v1755_v50  ;;  %8904 = vst [vmem:[#allocation50_spill] sm:$0xff] %v6039_v44  ;;  %v1758_v50 = vmul.f32 0.5, %v6025_v47  ;;  %v861_v52 = vmul.f32 0.5, %v6034_v43  ;;  %v6071_v7 = vadd.f32 %v5854_v60, %v5824_v16 }
 0x106   : > { %3352 = vperm.xlu0 %4440, %v3242_v38   ;;  %3347 = vperm.xlu1 %4441, %v3241_v33   ;;  %v4450_v33 = vpop.eup %4449  ;;  %4479 = vtanh.f32 %v858_v35  ;;  %8905 = vst [vmem:[#allocation51_spill] sm:$0xff] %v6050_v46  ;;  %v1759_v47 = vmul.f32 0.5, %v6039_v44  ;;  %v862_v60 = vmul.f32 0.5, %v6050_v46  ;;  %v6089_v16 = vadd.f32 %v5870_v12, %v5818_v5 }
 0x107   : > { %v6027_v38 = vpop.f32.mrf.mxu0  ;;  %v6029_v45 = vpop.f32.mrf.mxu1  ;;  %4481 = vtanh.f32 %v1756_v39  ;;  %8907 = vst [vmem:[#allocation53_spill] sm:$0xff] %v6071_v7  ;;  %v863_v43 = vmul.f32 0.5, %v6071_v7  ;;  %v6107_v12 = vadd.f32 %v5882_v22, %v5610_v25  ;;  %v1876_v7 = vmul.f32 0.5, %v4448_v41 }
 0x108   : > { %v4452_v17 = vpop.eup %4451  ;;  %4483 = vtanh.f32 %v859_v9  ;;  %8909 = vst [vmem:[#allocation55_spill] sm:$0xff] %v6089_v16  ;;  %v864_v22 = vmul.f32 0.5, %v6089_v16  ;;  %v6132_v25 = vadd.f32 %v5911_v30, %v5802_v27  ;;  %v6143_v16 = vadd.f32 %v5913_v8, %v5598_v20 }
 0x109   : > { %v6041_v11 = vpop.f32.mrf.mxu0  ;;  %v6043_v37 = vpop.f32.mrf.mxu1  ;;  %8911 = vst [vmem:[#allocation57_spill] sm:$0xff] %v6107_v12 }
 0x10a   : > { %3342 = vperm.xlu0 %4440, %v3240_v57   ;;  %3337 = vperm.xlu1 %4441, %v3239_v28   ;;  %v6045_v61 = vpop.eup %4453  ;;  %v6060_v57 = vadd.f32 %v5850_v56, %v5608_v24  ;;  %4485 = vtanh.f32 %v1757_v34  ;;  %v6078_v56 = vadd.f32 %v5856_v18, %v5608_v24  ;;  %v6096_v18 = vadd.f32 %v5880_v1, %v5818_v5 }
 0x10b   : > { %v6055_v48 = vpop.eup %4455  ;;  %v6062_v35 = vpop.f32.mrf.mxu0  ;;  %4487 = vtanh.f32 %v860_v49  ;;  %v6114_v1 = vadd.f32 %v5898_v63, %v5802_v27  ;;  %8915 = vst [vmem:[#allocation61_spill] sm:$0xff] %v6132_v25  ;;  %8917 = vst [vmem:[#allocation63_spill] sm:$0xff] %v6143_v16  ;;  %v6150_v27 = vadd.f32 %v5930_v51, %v5790_v13  ;;  %v867_v51 = vmul.f32 0.5, %v6132_v25 }
 0x10c   : > { %8906 = vst [vmem:[#allocation52_spill] sm:$0xff] %v6060_v57  ;;  %v6064_v28 = vpop.f32.mrf.mxu1  ;;  %v6066_v55 = vpop.eup %4457  ;;  %8908 = vst [vmem:[#allocation54_spill] sm:$0xff] %v6078_v56  ;;  %4489 = vtanh.f32 %v1758_v50  ;;  %v1760_v24 = vmul.f32 0.5, %v6060_v57  ;;  %v1877_v57 = vmul.f32 0.5, %v4450_v33  ;;  %v1761_v5 = vmul.f32 0.5, %v6078_v56 }
 0x10d   : > { %v6073_v39 = vpop.eup %4459  ;;  %v6080_v23 = vpop.f32.mrf.mxu0  ;;  %8910 = vst [vmem:[#allocation56_spill] sm:$0xff] %v6096_v18  ;;  %4491 = vtanh.f32 %v861_v52  ;;  %8912 = vst [vmem:[#allocation58_spill] sm:$0xff] %v6114_v1  ;;  %v6125_v33 = vadd.f32 %v5900_v4, %v5598_v20  ;;  %v1878_v56 = vmul.f32 0.5, %v4452_v17  ;;  %v865_v63 = vmul.f32 0.5, %v6096_v18 }
 0x10e   : > { %v6082_v31 = vpop.f32.mrf.mxu1  ;;  %4168 = vperm.xlu0 %4440, %v4165_v29   ;;  %v6084_v9 = vpop.eup %4461  ;;  %4493 = vtanh.f32 %v1759_v47  ;;  %v1763_v4 = vmul.f32 0.5, %v6107_v12  ;;  %v866_v30 = vmul.f32 0.5, %v6114_v1  ;;  %8918 = vst [vmem:[#allocation64_spill] sm:$0xff] %v6150_v27  ;;  %v6158_v12 = vadd.f32 0.5, %v1876_v7 }
 0x10f   : > { %v6091_v34 = vpop.eup %4463  ;;  %v6098_v44 = vpop.f32.mrf.mxu0  ;;  %4495 = vtanh.f32 %v862_v60  ;;  %8914 = vst [vmem:[#allocation60_spill] sm:$0xff] %v6125_v33  ;;  %v1764_v8 = vmul.f32 0.5, %v6125_v33  ;;  %v6163_v20 = vadd.f32 %v5942_v15, %v5790_v13  ;;  %v6170_v1 = vadd.f32 %v5944_v26, %v5600_v21 }
 0x110   : > { %v6100_v29 = vpop.f32.mrf.mxu1  ;;  %v6102_v49 = vpop.eup %4465  ;;  %4497 = vtanh.f32 %v1760_v24  ;;  %v1941_v24 = vadd.f32 0.5, %v1877_v57  ;;  %8920 = vst [vmem:[#allocation66_spill] sm:$0xff] %v6158_v12  ;;  %v1765_v15 = vmul.f32 0.5, %v6143_v16  ;;  %v6180_v13 = vadd.f32 %v5960_v2, %v5776_v59 }
 0x111   : > { %v6109_v50 = vpop.eup %4467  ;;  %v6116_v46 = vpop.f32.mrf.mxu0  ;;  %4499 = vtanh.f32 %v863_v43  ;;  %8921 = vst [vmem:[#allocation67_spill] sm:$0xff] %v6163_v20  ;;  %8922 = vst [vmem:[#allocation68_spill] sm:$0xff] %v6170_v1  ;;  %v868_v12 = vmul.f32 0.5, %v6150_v27  ;;  %v1880_v2 = vmul.f32 0.5, %v6055_v48  ;;  %v869_v16 = vmul.f32 0.5, %v6163_v20  ;;  %v8945_v20 = vld [vmem:[#allocation27_spill] sm:$0xff] }
 0x112   : > { %v6118_v32 = vpop.f32.mrf.mxu1  ;;  %v6120_v52 = vpop.eup %4469  ;;  %4501 = vtanh.f32 %v1761_v5  ;;  %v1942_v5 = vadd.f32 0.5, %v1878_v56  ;;  %8924 = vst [vmem:[#allocation70_spill] sm:$0xff] %v6180_v13  ;;  %v6187_v26 = vmul.f32 %v1941_v24, %v5868_v6  ;;  %v6202_v6 = vadd.f32 %v5973_v36, %v5776_v59 }
 0x113   : > { %8913 = vst [vmem:[#allocation59_spill] sm:$0xff] %v6118_v32  ;;  %v6127_v47 = vpop.eup %4471  ;;  %v6134_v32 = vpop.f32.mrf.mxu0  ;;  %4503 = vtanh.f32 %v864_v22  ;;  %v1879_v22 = vmul.f32 0.5, %v6045_v61  ;;  %v6192_v61 = vadd.f32 %v5962_v10, %v5578_v14  ;;  %v1767_v10 = vmul.f32 0.5, %v6170_v1 }
 0x114   : > { %v6136_v41 = vpop.f32.mrf.mxu1  ;;  %v6138_v60 = vpop.eup %4473  ;;  %4505 = vtanh.f32 %v865_v63  ;;  %8926 = vst [vmem:[#allocation72_spill] sm:$0xff] %v6187_v26  ;;  %8929 = vst [vmem:[#allocation75_spill] sm:$0xff] %v6202_v6  ;;  %v6212_v26 = vadd.f32 %v5975_v42, %v5578_v14  ;;  %v6219_v59 = vadd.f32 %v5993_v58, %v5772_v54  ;;  %v8934_v42 = vld [vmem:[#allocation7_spill] sm:$0xff]  ;;  %v871_v58 = vmul.f32 0.5, %v6202_v6 }
 0x115   : > { %8916 = vst [vmem:[#allocation62_spill] sm:$0xff] %v6138_v60  ;;  %v6145_v17 = vpop.eup %4475  ;;  %v6152_v18 = vpop.f32.mrf.mxu0  ;;  %4507 = vtanh.f32 %v1763_v4  ;;  %8927 = vst [vmem:[#allocation73_spill] sm:$0xff] %v6192_v61  ;;  %v1768_v14 = vmul.f32 0.5, %v6192_v61  ;;  %v984_v27 = vmul.f32 0.5, %v6091_v34 }
 0x116   : > { %v6154_v60 = vpop.f32.mrf.mxu1  ;;  %v6156_v43 = vpop.eup %4477  ;;  %4509 = vtanh.f32 %v866_v30  ;;  %v6207_v30 = vmul.f32 %v1942_v5, %v5875_v53  ;;  %8931 = vst [vmem:[#allocation77_spill] sm:$0xff] %v6212_v26  ;;  %8932 = vst [vmem:[#allocation78_spill] sm:$0xff] %v6219_v59  ;;  %v982_v5 = vmul.f32 0.5, %v6066_v55 }
 0x117   : > { %8919 = vst [vmem:[#allocation65_spill] sm:$0xff] %v6154_v60  ;;  %v6165_v57 = vpop.eup %4479  ;;  %v6172_v60 = vpop.f32.mrf.mxu0  ;;  %4511 = vtanh.f32 %v1764_v8  ;;  %v1943_v8 = vadd.f32 0.5, %v1879_v22 }
 0x118   : > { %8923 = vst [vmem:[#allocation69_spill] sm:$0xff] %v6172_v60  ;;  %v6174_v7 = vpop.eup %4481  ;;  %v6182_v56 = vpop.f32.mrf.mxu1  ;;  %8930 = vst [vmem:[#allocation76_spill] sm:$0xff] %v6207_v30  ;;  %4513 = vtanh.f32 %v867_v51  ;;  %v6229_v51 = vadd.f32 %v5995_v3, %v8934_v42  ;;  %v1944_v30 = vadd.f32 0.5, %v1880_v2  ;;  %v1769_v3 = vmul.f32 0.5, %v6212_v26 }
 0x119   : > { %8925 = vst [vmem:[#allocation71_spill] sm:$0xff] %v6182_v56  ;;  %v6184_v63 = vpop.eup %4483  ;;  %v6194_v4 = vpop.f32.mrf.mxu0  ;;  %4515 = vtanh.f32 %v1765_v15  ;;  %v872_v2 = vmul.f32 0.5, %v6219_v59  ;;  %v1048_v26 = vadd.f32 0.5, %v984_v27 }
 0x11a   : > { %8928 = vst [vmem:[#allocation74_spill] sm:$0xff] %v6194_v4  ;;  %v6196_v33 = vpop.eup %4485  ;;  %v870_v4 = vmul.f32 0.5, %v6180_v13  ;;  %v6221_v36 = vpop.f32.mrf.mxu1  ;;  %4517 = vtanh.f32 %v868_v12  ;;  %8935 = vst [vmem:[#allocation7_spill] sm:$0xff] %v6229_v51  ;;  %v983_v12 = vmul.f32 0.5, %v6073_v39 }
 0x11b   : > { %v6204_v24 = vpop.eup %4487  ;;  %8933 = vst [vmem:[#allocation79_spill] sm:$0xff] %v6221_v36  ;;  %v6231_v22 = vpop.f32.mrf.mxu0  ;;  %4519 = vtanh.f32 %v869_v16  ;;  %v6238_v36 = vadd.f32 %v6007_v62, %v5772_v54  ;;  %v1881_v16 = vmul.f32 0.5, %v6084_v9  ;;  %v8939_v54 = vld [vmem:[#allocation28_spill] sm:$0xff] }
 0x11c   : > { %v6214_v48 = vpop.eup %4489  ;;  %8936 = vst [vmem:[#allocation80_spill] sm:$0xff] %v6231_v22  ;;  %4521 = vtanh.f32 %v1767_v10  ;;  %v6246_v22 = vadd.f32 %v6009_v19, %v8934_v42  ;;  %v6254_v62 = vadd.f32 %v6027_v38, %v8939_v54  ;;  %v6256_v60 = vpop.f32.mrf.mxu1  ;;  %v1046_v10 = vadd.f32 0.5, %v982_v5  ;;  %v8941_v42 = vld [vmem:[#allocation5_spill] sm:$0xff] }
 0x11d   : > { %v6223_v53 = vpop.eup %4491  ;;  %8937 = vst [vmem:[#allocation81_spill] sm:$0xff] %v6238_v36  ;;  %4523 = vtanh.f32 %v870_v4  ;;  %8940 = vst [vmem:[#allocation28_spill] sm:$0xff] %v6256_v60  ;;  %v1770_v19 = vmul.f32 0.5, %v6229_v51  ;;  %v6263_v1 = vadd.f32 %v6029_v45, %v8941_v42  ;;  %v6265_v9 = vpop.f32.mrf.mxu0  ;;  %v873_v38 = vmul.f32 0.5, %v6238_v36 }
 0x11e   : > { %v6233_v15 = vpop.eup %4493  ;;  %8938 = vst [vmem:[#allocation82_spill] sm:$0xff] %v6246_v22  ;;  %4525 = vtanh.f32 %v1768_v14  ;;  %8943 = vst [vmem:[#allocation83_spill] sm:$0xff] %v6265_v9  ;;  %v6273_v60 = vadd.f32 %v6041_v11, %v8939_v54  ;;  %v1047_v14 = vadd.f32 0.5, %v983_v12  ;;  %v1771_v45 = vmul.f32 0.5, %v6246_v22  ;;  %v6289_v54 = vpop.f32.mrf.mxu1  ;;  %v8950_v22 = vld [vmem:[#allocation32_spill] sm:$0xff] }
 0x11f   : > { %v6240_v55 = vpop.eup %4495  ;;  %8942 = vst [vmem:[#allocation5_spill] sm:$0xff] %v6263_v1  ;;  %4527 = vtanh.f32 %v871_v58  ;;  %v6280_v9 = vadd.f32 %v6043_v37, %v8941_v42  ;;  %v1945_v34 = vadd.f32 0.5, %v1881_v16  ;;  %v874_v58 = vmul.f32 0.5, %v6254_v62  ;;  %8946 = vst [vmem:[#allocation27_spill] sm:$0xff] %v6289_v54  ;;  %v6298_v16 = vpop.f32.mrf.mxu0 }
 0x120   : > { %v6248_v56 = vpop.eup %4497  ;;  %4529 = vtanh.f32 %v1769_v3  ;;  %v6287_v11 = vadd.f32 %v6062_v35, %v8945_v20  ;;  %v8947_v3 = vld [vmem:[#allocation31_spill] sm:$0xff]  ;;  %v1882_v37 = vmul.f32 0.5, %v6102_v49  ;;  %v1772_v42 = vmul.f32 0.5, %v6263_v1  ;;  %8949 = vst [vmem:[#allocation85_spill] sm:$0xff] %v6298_v16  ;;  %v6322_v16 = vpop.f32.mrf.mxu1 }
 0x121   : > { %v6258_v39 = vpop.eup %4499  ;;  %8944 = vst [vmem:[#allocation84_spill] sm:$0xff] %v6280_v9  ;;  %4531 = vtanh.f32 %v872_v2  ;;  %v6294_v25 = vmul.f32 %v1943_v8, %v8947_v3  ;;  %v980_v35 = vmul.f32 0.5, %v6109_v50  ;;  %v875_v54 = vmul.f32 0.5, %v6273_v60  ;;  %v8952_v3 = vld [vmem:[#allocation33_spill] sm:$0xff]  ;;  %8956 = vst [vmem:[#allocation88_spill] sm:$0xff] %v6322_v16 }
 0x122   : > { %v6267_v4 = vpop.eup %4501  ;;  %4533 = vtanh.f32 %v1770_v19  ;;  %v6307_v8 = vmul.f32 %v1944_v30, %v8950_v22  ;;  %v6310_v49 = vmul.f32 %v1046_v10, %v8952_v3  ;;  %v1773_v19 = vmul.f32 0.5, %v6280_v9 }
 0x123   : > { %v6275_v5 = vpop.eup %4503  ;;  %8948 = vst [vmem:[#allocation31_spill] sm:$0xff] %v6294_v25  ;;  %4535 = vtanh.f32 %v873_v38  ;;  %v6316_v27 = vmul.f32 %v1047_v14, %v5904_v40  ;;  %v6319_v50 = vmul.f32 %v1945_v34, %v5909_v0  ;;  %v876_v38 = vmul.f32 0.5, %v6287_v11  ;;  %v6333_v40 = vpop.f32.mrf.mxu0  ;;  %v8960_v14 = vld [vmem:[#allocation34_spill] sm:$0xff] }
 0x124   : > { %v6282_v61 = vpop.eup %4505  ;;  %8951 = vst [vmem:[#allocation32_spill] sm:$0xff] %v6307_v8  ;;  %8953 = vst [vmem:[#allocation33_spill] sm:$0xff] %v6310_v49  ;;  %4537 = vtanh.f32 %v1771_v45  ;;  %v1946_v22 = vadd.f32 0.5, %v1882_v37  ;;  %v6327_v10 = vmul.f32 0.5, %v6120_v52  ;;  %v8957_v45 = vld [vmem:[#allocation3_spill] sm:$0xff]  ;;  %v6338_v34 = vmul.f32 %v1048_v26, %v8960_v14  ;;  %v6342_v8 = vpop.permute.xlu1 %481 }
 0x125   : > { %v6291_v12 = vpop.eup %4507  ;;  %8954 = vst [vmem:[#allocation86_spill] sm:$0xff] %v6316_v27  ;;  %8955 = vst [vmem:[#allocation87_spill] sm:$0xff] %v6319_v50  ;;  %4539 = vtanh.f32 %v874_v58  ;;  %v6331_v3 = vadd.f32 %v6064_v28, %v8957_v45  ;;  %v6340_v58 = vadd.f32 0.5, %v980_v35  ;;  %v6346_v52 = vadd.f32 %v6080_v23, %v8945_v20  ;;  %v8965_v20 = vld [vmem:[#allocation26_spill] sm:$0xff] }
 0x126   : > { %v6300_v2 = vpop.eup %4509  ;;  %4541 = vtanh.f32 %v1772_v42  ;;  %8959 = vst [vmem:[#allocation89_spill] sm:$0xff] %v6333_v40  ;;  %8961 = vst [vmem:[#allocation34_spill] sm:$0xff] %v6338_v34  ;;  %v985_v28 = vmul.f32 0.5, %v6145_v17  ;;  %v6354_v26 = vadd.f32 %v6082_v31, %v8957_v45  ;;  %v6359_v14 = vmul.f32 0.5, %v6127_v47  ;;  %v6366_v17 = vpop.f32.mrf.mxu1  ;;  %v8969_v45 = vld [vmem:[#allocation6_spill] sm:$0xff] }
 0x127   : > { %v6304_v51 = vpop.eup %4511  ;;  %8958 = vst [vmem:[#allocation3_spill] sm:$0xff] %v6331_v3  ;;  %8962 = vst [vmem:[#allocation90_spill] sm:$0xff] %v6340_v58  ;;  %4543 = vtanh.f32 %v875_v54  ;;  %v1774_v42 = vmul.f32 0.5, %v6331_v3  ;;  %v877_v23 = vmul.f32 0.5, %v6346_v52  ;;  %v6364_v54 = vadd.f32 %v6098_v44, %v8965_v20  ;;  %v6383_v58 = vpop.permute.xlu0 %486  ;;  %v8979_v40 = vld [vmem:[#allocation30_spill] sm:$0xff]  ;;  %v8993_v3 = vld [vmem:[#allocation41_spill] sm:$0xff] }
 0x128   : > { %v6313_v25 = vpop.eup %4513  ;;  %8963 = vst [vmem:[#allocation91_spill] sm:$0xff] %v6342_v8  ;;  %4545 = vtanh.f32 %v1773_v19  ;;  %8964 = vst [vmem:[#allocation92_spill] sm:$0xff] %v6359_v14  ;;  %v8967_v8 = vld [vmem:[#allocation35_spill] sm:$0xff]  ;;  %v1775_v31 = vmul.f32 0.5, %v6354_v26  ;;  %v6376_v47 = vadd.f32 %v6100_v29, %v8969_v45  ;;  %v1883_v44 = vmul.f32 0.5, %v6156_v43 }
 0x129   : > { %v6324_v30 = vpop.eup %4515  ;;  %4547 = vtanh.f32 %v876_v38  ;;  %8966 = vst [vmem:[#allocation26_spill] sm:$0xff] %v6366_v17  ;;  %v6371_v49 = vmul.f32 %v1946_v22, %v8967_v8  ;;  %v6378_v38 = vpop.f32.mrf.mxu0  ;;  %8971 = vst [vmem:[#allocation93_spill] sm:$0xff] %v6383_v58  ;;  %v878_v27 = vmul.f32 0.5, %v6364_v54  ;;  %v6388_v8 = vadd.f32 %v6116_v46, %v8965_v20  ;;  %v8974_v20 = vld [vmem:[#allocation25_spill] sm:$0xff] }
 0x12a   : > { %v6335_v0 = vpop.eup %4517  ;;  %4549 = vtanh.f32 %v1774_v42  ;;  %8970 = vst [vmem:[#allocation6_spill] sm:$0xff] %v6378_v38  ;;  %v1049_v42 = vadd.f32 0.5, %v985_v28  ;;  %v1776_v29 = vmul.f32 0.5, %v6376_v47  ;;  %v6400_v58 = vpop.permute.xlu1 %471  ;;  %v6405_v14 = vadd.f32 %v6134_v32, %v8974_v20  ;;  %v8976_v38 = vld [vmem:[#allocation4_spill] sm:$0xff] }
 0x12b   : > { %v6348_v37 = vpop.eup %4519  ;;  %8968 = vst [vmem:[#allocation35_spill] sm:$0xff] %v6371_v49  ;;  %4551 = vtanh.f32 %v877_v23  ;;  %v8972_v49 = vld [vmem:[#allocation59_spill] sm:$0xff]  ;;  %v986_v23 = vmul.f32 0.5, %v6165_v57  ;;  %v879_v46 = vmul.f32 0.5, %v6388_v8  ;;  %v6407_v28 = vpop.f32.mrf.mxu1  ;;  %v6415_v57 = vadd.f32 %v6136_v41, %v8976_v38 }
 0x12c   : > { %v6356_v35 = vpop.eup %4521  ;;  %4553 = vtanh.f32 %v1775_v31  ;;  %v6395_v34 = vadd.f32 %v8972_v49, %v8969_v45  ;;  %8973 = vst [vmem:[#allocation59_spill] sm:$0xff] %v6400_v58  ;;  %8975 = vst [vmem:[#allocation25_spill] sm:$0xff] %v6407_v28  ;;  %v987_v49 = vmul.f32 0.5, %v6184_v63  ;;  %v988_v32 = vmul.f32 0.5, %v6204_v24  ;;  %v6441_v1 = vpop.permute.xlu0 %476 }
 0x12d   : > { %v6368_v19 = vpop.eup %4523  ;;  %4555 = vtanh.f32 %v878_v27  ;;  %v6417_v27 = vpop.f32.mrf.mxu0  ;;  %v880_v28 = vmul.f32 0.5, %v6405_v14  ;;  %v6425_v17 = vadd.f32 %v6152_v18, %v8974_v20  ;;  %v1778_v41 = vmul.f32 0.5, %v6415_v57  ;;  %8982 = vst [vmem:[#allocation30_spill] sm:$0xff] %v6441_v1  ;;  %v8983_v18 = vld [vmem:[#allocation36_spill] sm:$0xff] }
 0x12e   : > { %v6380_v50 = vpop.eup %4525  ;;  %4557 = vtanh.f32 %v1776_v29  ;;  %v1777_v45 = vmul.f32 0.5, %v6395_v34  ;;  %8977 = vst [vmem:[#allocation4_spill] sm:$0xff] %v6417_v27  ;;  %v8978_v29 = vld [vmem:[#allocation8_spill] sm:$0xff]  ;;  %v8981_v27 = vld [vmem:[#allocation65_spill] sm:$0xff]  ;;  %v6445_v20 = vadd.f32 %v8983_v18, %v5600_v21  ;;  %v1050_v6 = vadd.f32 0.5, %v986_v23  ;;  %v6459_v18 = vpop.permute.xlu1 %461 }
 0x12f   : > { %v6390_v22 = vpop.eup %4527  ;;  %4559 = vtanh.f32 %v879_v46  ;;  %v6431_v16 = vadd.f32 %v8979_v40, %v8978_v29  ;;  %v6436_v13 = vadd.f32 %v8981_v27, %v8976_v38  ;;  %v1884_v46 = vmul.f32 0.5, %v6174_v7  ;;  %v6454_v7 = vpop.f32.mrf.mxu0  ;;  %8987 = vst [vmem:[#allocation95_spill] sm:$0xff] %v6459_v18 }
 0x130   : > { %v6397_v43 = vpop.eup %4529  ;;  %4561 = vtanh.f32 %v1777_v45  ;;  %8984 = vst [vmem:[#allocation65_spill] sm:$0xff] %v6445_v20  ;;  %v881_v40 = vmul.f32 0.5, %v6425_v17  ;;  %v6448_v45 = vpop.f32.mrf.mxu1  ;;  %v1885_v38 = vmul.f32 0.5, %v6196_v33  ;;  %8986 = vst [vmem:[#allocation94_spill] sm:$0xff] %v6454_v7  ;;  %v1051_v9 = vadd.f32 0.5, %v987_v49  ;;  %v8989_v49 = vld [vmem:[#allocation62_spill] sm:$0xff] }
 0x131   : > { %v6409_v31 = vpop.eup %4531  ;;  %8980 = vst [vmem:[#allocation8_spill] sm:$0xff] %v6431_v16  ;;  %4563 = vtanh.f32 %v880_v28  ;;  %8985 = vst [vmem:[#allocation36_spill] sm:$0xff] %v6448_v45  ;;  %v1779_v27 = vmul.f32 0.5, %v6436_v13  ;;  %v1052_v21 = vadd.f32 0.5, %v988_v32  ;;  %v1886_v28 = vmul.f32 0.5, %v6214_v48 }
 0x132   : > { %v6419_v58 = vpop.eup %4533  ;;  %4565 = vtanh.f32 %v1778_v41  ;;  %v989_v23 = vmul.f32 0.5, %v6223_v53  ;;  %v1887_v33 = vmul.f32 0.5, %v6233_v15  ;;  %v1762_v41 = vmul.f32 0.5, %v6431_v16  ;;  %v6477_v18 = vpop.f32.mrf.mxu1  ;;  %v8995_v16 = vld [vmem:[#allocation43_spill] sm:$0xff] }
 0x133   : > { %v6427_v63 = vpop.eup %4535  ;;  %4567 = vtanh.f32 %v881_v40  ;;  %v6469_v7 = vadd.f32 0.5, %v6327_v10  ;;  %v6472_v32 = vmul.f32 0.5, %v8989_v49  ;;  %v6474_v48 = vadd.f32 0.5, %v1883_v44  ;;  %8992 = vst [vmem:[#allocation98_spill] sm:$0xff] %v6477_v18  ;;  %v9000_v44 = vld [vmem:[#allocation45_spill] sm:$0xff] }
 0x134   : > { %v6438_v24 = vpop.eup %4537  ;;  %4569 = vtanh.f32 %v1779_v27  ;;  %v1766_v40 = vmul.f32 0.5, %v6445_v20  ;;  %v6480_v15 = vmul.f32 %v1049_v42, %v8993_v3  ;;  %v6483_v27 = vmul.f32 %v1050_v6, %v8995_v16  ;;  %v6501_v3 = vpop.permute.xlu0 %466 }
 0x135   : > { %v6450_v29 = vpop.eup %4539  ;;  %8988 = vst [vmem:[#allocation96_spill] sm:$0xff] %v6469_v7  ;;  %8990 = vst [vmem:[#allocation62_spill] sm:$0xff] %v6472_v32  ;;  %v6485_v36 = vadd.f32 0.5, %v1884_v46  ;;  %v6487_v10 = vadd.f32 0.5, %v1885_v38  ;;  %v6489_v7 = vpop.f32.mrf.mxu0  ;;  %v6494_v32 = vmul.f32 %v1051_v9, %v9000_v44  ;;  %v6499_v20 = vadd.f32 0.5, %v1886_v28 }
 0x136   : > { %v6456_v1 = vpop.eup %4541  ;;  %8991 = vst [vmem:[#allocation97_spill] sm:$0xff] %v6474_v48  ;;  %8994 = vst [vmem:[#allocation41_spill] sm:$0xff] %v6480_v15  ;;  %v9002_v48 = vld [vmem:[#allocation47_spill] sm:$0xff]  ;;  %v994_v6 = vmul.f32 0.5, %v6300_v2  ;;  %v6504_v42 = vadd.f32 0.5, %v989_v23  ;;  %v6506_v46 = vadd.f32 0.5, %v1887_v33  ;;  %4571 = vtanh.f32 %v1762_v41  ;;  %v6520_v2 = vpop.permute.xlu1 %451 }
 0x137   : > { %v6461_v45 = vpop.eup %4543  ;;  %8996 = vst [vmem:[#allocation43_spill] sm:$0xff] %v6483_v27  ;;  %8997 = vst [vmem:[#allocation99_spill] sm:$0xff] %v6485_v36  ;;  %v6497_v18 = vmul.f32 %v1052_v21, %v9002_v48  ;;  %v6509_v38 = vmul.f32 0.5, %v6240_v55  ;;  %v6512_v44 = vmul.f32 0.5, %v6248_v56  ;;  %v6515_v21 = vmul.f32 0.5, %v6258_v39  ;;  %v6522_v23 = vpop.f32.mrf.mxu1 }
 0x138   : > { %v6466_v59 = vpop.eup %4545  ;;  %8998 = vst [vmem:[#allocation100_spill] sm:$0xff] %v6487_v10  ;;  %8999 = vst [vmem:[#allocation101_spill] sm:$0xff] %v6489_v7  ;;  %v6518_v28 = vmul.f32 0.5, %v6267_v4  ;;  %4573 = vtanh.f32 %v1766_v40  ;;  %v6525_v55 = vmul.f32 0.5, %v6275_v5  ;;  %v6528_v41 = vmul.f32 0.5, %v6282_v61  ;;  %v6536_v4 = vpop.f32.mrf.mxu0 }
 0x139   : > { %v4548_v53 = vpop.eup %4547  ;;  %9001 = vst [vmem:[#allocation45_spill] sm:$0xff] %v6494_v32  ;;  %9003 = vst [vmem:[#allocation47_spill] sm:$0xff] %v6497_v18  ;;  %v6531_v56 = vmul.f32 0.5, %v6291_v12  ;;  %v6534_v39 = vmul.f32 0.5, %v6304_v51  ;;  %v6541_v40 = vmul.f32 0.5, %v6313_v25  ;;  %v6544_v5 = vmul.f32 0.5, %v6324_v30 }
 0x13a   : > { %v6491_v49 = vpop.eup %4549  ;;  %9004 = vst [vmem:[#allocation102_spill] sm:$0xff] %v6499_v20  ;;  %9005 = vst [vmem:[#allocation103_spill] sm:$0xff] %v6501_v3  ;;  %v6538_v3 = vadd.f32 0.5, %v994_v6  ;;  %v6547_v61 = vmul.f32 0.5, %v6335_v0  ;;  %v6550_v12 = vmul.f32 0.5, %v6348_v37  ;;  %v6553_v51 = vmul.f32 0.5, %v6356_v35  ;;  %v6570_v35 = vpop.f32.mrf.mxu1 }
 0x13b   : > { %v4552_v16 = vpop.eup %4551  ;;  %9006 = vst [vmem:[#allocation104_spill] sm:$0xff] %v6504_v42  ;;  %9007 = vst [vmem:[#allocation105_spill] sm:$0xff] %v6506_v46  ;;  %v6559_v6 = vmul.f32 0.5, %v6380_v50  ;;  %v6564_v30 = vmul.f32 0.5, %v6390_v22  ;;  %v6567_v0 = vmul.f32 0.5, %v6397_v43  ;;  %v1000_v37 = vmul.f32 0.5, %v6409_v31  ;;  %v6579_v22 = vpop.f32.mrf.mxu0 }
 0x13c   : > { %v4554_v9 = vpop.eup %4553  ;;  %9008 = vst [vmem:[#allocation106_spill] sm:$0xff] %v6512_v44  ;;  %9009 = vst [vmem:[#allocation107_spill] sm:$0xff] %v6518_v28  ;;  %v1001_v50 = vmul.f32 0.5, %v6427_v63  ;;  %v6577_v27 = vmul.f32 0.5, %v6438_v24  ;;  %v6581_v43 = vpop.permute.xlu1 %441  ;;  %v1002_v31 = vmul.f32 0.5, %v6450_v29  ;;  %v1004_v10 = vmul.f32 0.5, %v4548_v53 }
 0x13d   : > { %9010 = vst [vmem:[#allocation108_spill] sm:$0xff] %v6520_v2  ;;  %9011 = vst [vmem:[#allocation109_spill] sm:$0xff] %v6522_v23  ;;  %v4556_v33 = vpop.eup %4555  ;;  %v6561_v23 = vpop.permute.xlu0 %456  ;;  %v1903_v29 = vmul.f32 0.5, %v4554_v9 }
 0x13e   : > { %9012 = vst [vmem:[#allocation110_spill] sm:$0xff] %v6536_v4  ;;  %v4558_v48 = vpop.eup %4557  ;;  %v6556_v4 = vmul.f32 0.5, %v6368_v19  ;;  %9013 = vst [vmem:[#allocation111_spill] sm:$0xff] %v6561_v23  ;;  %v6573_v19 = vmul.f32 0.5, %v6419_v58  ;;  %v1006_v23 = vmul.f32 0.5, %v4556_v33  ;;  %v1003_v58 = vmul.f32 0.5, %v6461_v45  ;;  %v6586_v44 = vpop.f32.mrf.mxu1 }
 0x13f   : > { %v4560_v2 = vpop.eup %4559  ;;  %9014 = vst [vmem:[#allocation112_spill] sm:$0xff] %v6570_v35  ;;  %9015 = vst [vmem:[#allocation113_spill] sm:$0xff] %v6579_v22  ;;  %v1005_v35 = vmul.f32 0.5, %v4552_v16  ;;  %v1904_v46 = vmul.f32 0.5, %v4558_v48  ;;  %v6589_v16 = vpop.f32.mrf.mxu0  ;;  %v1902_v45 = vmul.f32 0.5, %v6491_v49  ;;  %v1068_v48 = vadd.f32 0.5, %v1004_v10 }
 0x140   : > { %v4562_v25 = vpop.eup %4561  ;;  %v1007_v7 = vmul.f32 0.5, %v4560_v2  ;;  %9016 = vst [vmem:[#allocation114_spill] sm:$0xff] %v6581_v43  ;;  %v1900_v2 = vmul.f32 0.5, %v6456_v1  ;;  %9017 = vst [vmem:[#allocation115_spill] sm:$0xff] %v6586_v44  ;;  %v1901_v43 = vmul.f32 0.5, %v6466_v59  ;;  %v1070_v28 = vadd.f32 0.5, %v1006_v23  ;;  %v6597_v59 = vpop.permute.xlu1 %431 }
 0x141   : > { %v4564_v15 = vpop.eup %4563  ;;  %v1905_v63 = vmul.f32 0.5, %v4562_v25  ;;  %9018 = vst [vmem:[#allocation116_spill] sm:$0xff] %v6589_v16  ;;  %v1069_v53 = vadd.f32 0.5, %v1005_v35  ;;  %v1067_v9 = vadd.f32 0.5, %v1003_v58  ;;  %v1968_v23 = vadd.f32 0.5, %v1904_v46  ;;  %v6601_v16 = vpop.f32.mrf.mxu1 }
 0x142   : > { %v4566_v32 = vpop.eup %4565  ;;  %v1008_v36 = vmul.f32 0.5, %v4564_v15  ;;  %v1071_v33 = vadd.f32 0.5, %v1007_v7  ;;  %v6591_v15 = vpop.permute.xlu0 %446  ;;  %v1967_v35 = vadd.f32 0.5, %v1903_v29  ;;  %v1134_v10 = vmul.f32 %v1070_v28, %v6364_v54  ;;  %v9020_v29 = vld [vmem:[#allocation81_spill] sm:$0xff] }
 0x143   : > { %v4568_v18 = vpop.eup %4567  ;;  %v1906_v20 = vmul.f32 0.5, %v4566_v32  ;;  %9019 = vst [vmem:[#allocation117_spill] sm:$0xff] %v6591_v15  ;;  %v1969_v7 = vadd.f32 0.5, %v1905_v63  ;;  %v1966_v63 = vadd.f32 0.5, %v1902_v45  ;;  %v1133_v58 = vmul.f32 %v1069_v53, %v6346_v52  ;;  %v9023_v53 = vld [vmem:[#allocation84_spill] sm:$0xff] }
 0x144   : > { %v4570_v24 = vpop.eup %4569  ;;  %v1072_v42 = vadd.f32 0.5, %v1008_v36  ;;  %v1009_v22 = vmul.f32 0.5, %v4568_v18  ;;  %v1964_v28 = vadd.f32 0.5, %v1900_v2  ;;  %v2032_v52 = vmul.f32 %v1968_v23, %v6376_v47  ;;  %v9026_v23 = vld [vmem:[#allocation70_spill] sm:$0xff] }
 0x145   : > { %v1907_v1 = vmul.f32 0.5, %v4570_v24  ;;  %v1970_v32 = vadd.f32 0.5, %v1906_v20  ;;  %v6595_v44 = vpop.eup %4571  ;;  %v1135_v24 = vmul.f32 %v1071_v33, %v6388_v8  ;;  %v1066_v20 = vadd.f32 0.5, %v1002_v31 }
 0x146   : > { %v1073_v25 = vadd.f32 0.5, %v1009_v22  ;;  %v1136_v36 = vmul.f32 %v1072_v42, %v6405_v14  ;;  %v4574_v49 = vpop.eup %4573  ;;  %v6605_v42 = vpop.f32.mrf.mxu0  ;;  %v1065_v22 = vadd.f32 0.5, %v1001_v50  ;;  %v1064_v8 = vadd.f32 0.5, %v1000_v37 }
 0x147   : > { %v1971_v18 = vadd.f32 0.5, %v1907_v1  ;;  %v2034_v46 = vmul.f32 %v1970_v32, %v6415_v57  ;;  %v1132_v33 = vmul.f32 %v1068_v48, %v6287_v11  ;;  %v2033_v31 = vmul.f32 %v1969_v7, %v6395_v34  ;;  %v6611_v54 = vpop.permute.xlu0 %436  ;;  %v6616_v57 = vpop.f32.mrf.mxu1  ;;  %v9024_v48 = vld [vmem:[#allocation75_spill] sm:$0xff] }
 0x148   : > { %v1137_v15 = vmul.f32 %v1073_v25, %v6425_v17  ;;  %v1965_v17 = vadd.f32 0.5, %v1901_v43  ;;  %v1131_v50 = vmul.f32 %v1067_v9, %v6273_v60  ;;  %v1062_v37 = vadd.f32 0.5, %v6556_v4  ;;  %v6624_v60 = vpop.permute.xlu1 %421 }
 0x149   : > { %v2035_v14 = vmul.f32 %v1971_v18, %v6436_v13  ;;  %v1063_v13 = vadd.f32 0.5, %v6564_v30  ;;  %v1963_v11 = vadd.f32 0.5, %v6577_v27  ;;  %v1130_v34 = vmul.f32 %v1066_v20, %v6254_v62  ;;  %v6622_v30 = vpop.f32.mrf.mxu0  ;;  %v6637_v9 = vpop.f32.mrf.mxu1 }
 0x14a   : > { %2146 = vmatprep.subr.mxu1 %v1137_v15  ;;  %v2031_v43 = vmul.f32 %v1967_v35, %v6354_v26  ;;  %v1894_v2 = vmul.f32 0.5, %v4574_v49  ;;  %v1962_v47 = vadd.f32 0.5, %v6573_v19  ;;  %v1129_v1 = vmul.f32 %v1065_v22, %v9020_v29  ;;  %v9021_v15 = vld [vmem:[#allocation3_spill] sm:$0xff]  ;;  %v9022_v26 = vld [vmem:[#allocation78_spill] sm:$0xff] }
 0x14b   : > { %2072 = vmatprep.subr.mxu0 %v2035_v14  ;;  %2147 = vmatpush1.msra.mxu1 %v1136_v36  ;;  %v2030_v45 = vmul.f32 %v1966_v63, %v9021_v15  ;;  %v1059_v27 = vadd.f32 0.5, %v6541_v40  ;;  %v1961_v62 = vadd.f32 0.5, %v6567_v0  ;;  %v1128_v4 = vmul.f32 %v1064_v8, %v9022_v26  ;;  %v9025_v36 = vld [vmem:[#allocation5_spill] sm:$0xff]  ;;  %v9027_v49 = vld [vmem:[#allocation82_spill] sm:$0xff]  ;;  %v6647_v14 = vpop.permute.xlu0 %426  ;;  %v9028_v22 = vld [vmem:[#allocation7_spill] sm:$0xff] }
 0x14c   : > { %2073 = vmatpush1.msra.mxu0 %v2034_v46  ;;  %2148 = vmatprep.subr.mxu1 %v1135_v24  ;;  %v2029_v32 = vmul.f32 %v1965_v17, %v9023_v53  ;;  %v1061_v25 = vadd.f32 0.5, %v6550_v12  ;;  %v1960_v19 = vadd.f32 0.5, %v6559_v6  ;;  %v1127_v7 = vmul.f32 %v1063_v13, %v9024_v48  ;;  %v6643_v12 = vpop.f32.mrf.mxu0  ;;  %v9030_v8 = vld [vmem:[#allocation77_spill] sm:$0xff]  ;;  %v9042_v26 = vld [vmem:[#allocation107_spill] sm:$0xff] }
 0x14d   : > { %2074 = vmatprep.subr.mxu0 %v2033_v31  ;;  %2149 = vmatpush1.msra.mxu1 %v1134_v10  ;;  %v2028_v18 = vmul.f32 %v1964_v28, %v9025_v36  ;;  %v1060_v40 = vadd.f32 0.5, %v6547_v61  ;;  %v1959_v0 = vadd.f32 0.5, %v6553_v51  ;;  %v1126_v24 = vmul.f32 %v1062_v37, %v9026_v23  ;;  %v9029_v51 = vld [vmem:[#allocation58_spill] sm:$0xff]  ;;  %v9032_v31 = vld [vmem:[#allocation67_spill] sm:$0xff]  ;;  %v9033_v28 = vld [vmem:[#allocation73_spill] sm:$0xff]  ;;  %v6659_v37 = vpop.f32.mrf.mxu1 }
 0x14e   : > { %2075 = vmatpush1.msra.mxu0 %v2032_v52  ;;  %2150 = vmatprep.subr.mxu1 %v1133_v58  ;;  %v2027_v20 = vmul.f32 %v1963_v11, %v9027_v49  ;;  %v1056_v6 = vadd.f32 0.5, %v6525_v55  ;;  %v1890_v35 = vmul.f32 0.5, %v6595_v44  ;;  %v1958_v10 = vadd.f32 0.5, %v1894_v2  ;;  %v9031_v55 = vld [vmem:[#allocation61_spill] sm:$0xff]  ;;  %v412_v52 = vpop.permute.xlu1 %411  ;;  %v9035_v11 = vld [vmem:[#allocation68_spill] sm:$0xff]  ;;  %v9043_v53 = vld [vmem:[#allocation63_spill] sm:$0xff] }
 0x14f   : > { %2076 = vmatprep.subr.mxu0 %v2031_v43  ;;  %2151 = vmatpush1.msra.mxu1 %v1132_v33  ;;  %v2026_v63 = vmul.f32 %v1962_v47, %v9028_v22  ;;  %v1057_v61 = vadd.f32 0.5, %v6528_v41  ;;  %v1122_v58 = vmul.f32 %v6538_v3, %v9029_v51  ;;  %v1957_v46 = vadd.f32 0.5, %v6544_v5  ;;  %v9034_v41 = vld [vmem:[#allocation64_spill] sm:$0xff]  ;;  %v9036_v43 = vld [vmem:[#allocation69_spill] sm:$0xff]  ;;  %v9049_v23 = vld [vmem:[#allocation79_spill] sm:$0xff] }
 0x150   : > { %2077 = vmatpush1.msra.mxu0 %v2030_v45  ;;  %2152 = vmatprep.subr.mxu1 %v1131_v50  ;;  %v2025_v17 = vmul.f32 %v1961_v62, %v9030_v8  ;;  %v1956_v44 = vadd.f32 0.5, %v6534_v39  ;;  %v1123_v33 = vmul.f32 %v1059_v27, %v9031_v55  ;;  %v1125_v13 = vmul.f32 %v1061_v25, %v9032_v31  ;;  %v6667_v39 = vpop.f32.mrf.mxu0  ;;  %v9039_v45 = vld [vmem:[#allocation24_spill] sm:$0xff]  ;;  %v9040_v27 = vld [vmem:[#allocation71_spill] sm:$0xff]  ;;  %v9044_v25 = vld [vmem:[#allocation74_spill] sm:$0xff] }
 0x151   : > { %2078 = vmatprep.subr.mxu0 %v2029_v32  ;;  %2153 = vmatpush1.msra.mxu1 %v1130_v34  ;;  %v2024_v50 = vmul.f32 %v1960_v19, %v9033_v28  ;;  %v1955_v3 = vadd.f32 0.5, %v6531_v56  ;;  %v1124_v5 = vmul.f32 %v1060_v40, %v9034_v41  ;;  %v2023_v34 = vmul.f32 %v1959_v0, %v9035_v11  ;;  %v417_v0 = vpop.permute.xlu0 %416  ;;  %v9051_v49 = vld [vmem:[#allocation55_spill] sm:$0xff]  ;;  %v9058_v31 = vld [vmem:[#allocation28_spill] sm:$0xff] }
 0x152   : > { %2079 = vmatpush1.msra.mxu0 %v2028_v18  ;;  %2154 = vmatprep.subr.mxu1 %v1129_v1  ;;  %v6665_v2 = vadd.f32 %v9036_v43, %v412_v52  ;;  %v1055_v47 = vadd.f32 0.5, %v6515_v21  ;;  %v1954_v29 = vadd.f32 0.5, %v1890_v35  ;;  %v9038_v1 = vld [vmem:[#allocation65_spill] sm:$0xff]  ;;  %v6673_v62 = vadd.f32 %v9040_v27, %v9039_v45  ;;  %v9046_v21 = vld [vmem:[#allocation106_spill] sm:$0xff]  ;;  %v9048_v18 = vld [vmem:[#allocation60_spill] sm:$0xff] }
 0x153   : > { %2080 = vmatprep.subr.mxu0 %v2027_v20  ;;  %2155 = vmatpush1.msra.mxu1 %v1128_v4  ;;  %v2022_v15 = vmul.f32 %v1958_v10, %v9038_v1  ;;  %v1054_v56 = vadd.f32 0.5, %v6509_v38  ;;  %v1953_v4 = vadd.f32 0.5, %v9042_v26  ;;  %v2021_v32 = vmul.f32 %v1957_v46, %v9043_v53  ;;  %v6688_v38 = vpop.f32.mrf.mxu1  ;;  %v9052_v35 = vld [vmem:[#allocation57_spill] sm:$0xff]  ;;  %v9062_v41 = vld [vmem:[#allocation83_spill] sm:$0xff]  ;;  %v9065_v11 = vld [vmem:[#allocation104_spill] sm:$0xff] }
 0x154   : > { %2081 = vmatpush1.msra.mxu0 %v2026_v63  ;;  %2156 = vmatprep.subr.mxu1 %v1127_v7  ;;  %9037 = vst [vmem:[#allocation81_spill] sm:$0xff] %v6665_v2  ;;  %9041 = vst [vmem:[#allocation3_spill] sm:$0xff] %v6673_v62  ;;  %v6679_v19 = vadd.f32 %v9044_v25, %v412_v52  ;;  %v1952_v48 = vadd.f32 0.5, %v9046_v21  ;;  %v9047_v7 = vld [vmem:[#allocation56_spill] sm:$0xff]  ;;  %v2020_v40 = vmul.f32 %v1956_v44, %v9048_v18  ;;  %v9055_v46 = vld [vmem:[#allocation53_spill] sm:$0xff] }
 0x155   : > { %2082 = vmatprep.subr.mxu0 %v2025_v17  ;;  %2157 = vmatpush1.msra.mxu1 %v1126_v24  ;;  %v1121_v36 = vmul.f32 %v1057_v61, %v9047_v7  ;;  %v6686_v24 = vadd.f32 %v9049_v23, %v9039_v45  ;;  %v1120_v20 = vmul.f32 %v1056_v6, %v9051_v49  ;;  %v882_v22 = vmul.f32 0.5, %v6665_v2  ;;  %v9053_v63 = vld [vmem:[#allocation80_spill] sm:$0xff]  ;;  %v6696_v61 = vpop.f32.mrf.mxu0  ;;  %v9067_v1 = vld [vmem:[#allocation27_spill] sm:$0xff]  ;;  %v6719_v45 = vpop.f32.mrf.mxu1  ;;  %v9069_v27 = vld [vmem:[#allocation50_spill] sm:$0xff] }
 0x156   : > { %2083 = vmatpush1.msra.mxu0 %v2024_v50  ;;  %2158 = vmatprep.subr.mxu1 %v1125_v13  ;;  %9045 = vst [vmem:[#allocation78_spill] sm:$0xff] %v6679_v19  ;;  %v2019_v10 = vmul.f32 %v1955_v3, %v9052_v35  ;;  %v6694_v51 = vadd.f32 %v9053_v63, %v417_v0  ;;  %v9056_v17 = vld [vmem:[#allocation8_spill] sm:$0xff]  ;;  %v1780_v55 = vmul.f32 0.5, %v6673_v62  ;;  %v9060_v13 = vld [vmem:[#allocation51_spill] sm:$0xff]  ;;  %v9061_v50 = vld [vmem:[#allocation54_spill] sm:$0xff]  ;;  %v883_v3 = vmul.f32 0.5, %v6679_v19 }
 0x157   : > { %2084 = vmatprep.subr.mxu0 %v2023_v34  ;;  %2159 = vmatpush1.msra.mxu1 %v1124_v5  ;;  %9050 = vst [vmem:[#allocation84_spill] sm:$0xff] %v6686_v24  ;;  %v1119_v8 = vmul.f32 %v1055_v47, %v9055_v46  ;;  %v2018_v44 = vmul.f32 %v1954_v29, %v9056_v17  ;;  %v9064_v5 = vld [vmem:[#allocation49_spill] sm:$0xff]  ;;  %v9066_v43 = vld [vmem:[#allocation52_spill] sm:$0xff]  ;;  %v1781_v29 = vmul.f32 0.5, %v6686_v24  ;;  %4575 = vtanh.f32 %v882_v22  ;;  %v6728_v25 = vpop.f32.mrf.mxu0  ;;  %v9075_v18 = vld [vmem:[#allocation22_spill] sm:$0xff] }
 0x158   : > { %2085 = vmatpush1.msra.mxu0 %v2022_v15  ;;  %2160 = vmatprep.subr.mxu1 %v1123_v33  ;;  %9054 = vst [vmem:[#allocation75_spill] sm:$0xff] %v6694_v51  ;;  %v9057_v33 = vld [vmem:[#allocation23_spill] sm:$0xff]  ;;  %v1118_v28 = vmul.f32 %v1054_v56, %v9060_v13  ;;  %v2017_v52 = vmul.f32 %v1953_v4, %v9061_v50  ;;  %v9070_v56 = vld [vmem:[#allocation105_spill] sm:$0xff]  ;;  %v884_v4 = vmul.f32 0.5, %v6694_v51  ;;  %v9073_v21 = vld [vmem:[#allocation48_spill] sm:$0xff]  ;;  %4577 = vtanh.f32 %v1780_v55 }
 0x159   : > { %2086 = vmatprep.subr.mxu0 %v2021_v32  ;;  %2161 = vmatpush1.msra.mxu1 %v1122_v58  ;;  %v6703_v6 = vadd.f32 %v9058_v31, %v9057_v33  ;;  %v6709_v58 = vadd.f32 %v9062_v41, %v417_v0  ;;  %v1117_v34 = vmul.f32 %v9065_v11, %v9064_v5  ;;  %v9071_v53 = vld [vmem:[#allocation85_spill] sm:$0xff]  ;;  %v9078_v23 = vld [vmem:[#allocation46_spill] sm:$0xff]  ;;  %v9079_v49 = vld [vmem:[#allocation100_spill] sm:$0xff]  ;;  %4579 = vtanh.f32 %v883_v3  ;;  %v6752_v31 = vpop.f32.mrf.mxu1  ;;  %v6762_v5 = vpop.f32.mrf.mxu0 }
 0x15a   : > { %2087 = vmatpush1.msra.mxu0 %v2020_v40  ;;  %2162 = vmatprep.subr.mxu1 %v1121_v36  ;;  %v2016_v47 = vmul.f32 %v1952_v48, %v9066_v43  ;;  %v6717_v15 = vadd.f32 %v9067_v1, %v9057_v33  ;;  %v2015_v26 = vmul.f32 %v9070_v56, %v9069_v27  ;;  %v9074_v48 = vld [vmem:[#allocation102_spill] sm:$0xff]  ;;  %v9076_v40 = vld [vmem:[#allocation88_spill] sm:$0xff]  ;;  %v9082_v63 = vld [vmem:[#allocation47_spill] sm:$0xff]  ;;  %4581 = vtanh.f32 %v1781_v29 }
 0x15b   : > { %9059 = vst [vmem:[#allocation5_spill] sm:$0xff] %v6703_v6  ;;  %9063 = vst [vmem:[#allocation70_spill] sm:$0xff] %v6709_v58  ;;  %2088 = vmatprep.subr.mxu0 %v2019_v10  ;;  %2163 = vmatpush1.msra.mxu1 %v1120_v20  ;;  %v6726_v32 = vadd.f32 %v9071_v53, %v6624_v60  ;;  %v2014_v7 = vmul.f32 %v9074_v48, %v9073_v21  ;;  %v1782_v36 = vmul.f32 0.5, %v6703_v6  ;;  %v9080_v10 = vld [vmem:[#allocation89_spill] sm:$0xff]  ;;  %v9083_v46 = vld [vmem:[#allocation44_spill] sm:$0xff] }
 0x15c   : > { %9068 = vst [vmem:[#allocation82_spill] sm:$0xff] %v6717_v15  ;;  %2089 = vmatpush1.msra.mxu0 %v2018_v44  ;;  %2164 = vmatprep.subr.mxu1 %v1119_v8  ;;  %v6735_v0 = vadd.f32 %v9076_v40, %v9075_v18  ;;  %v2013_v20 = vmul.f32 %v9079_v49, %v9078_v23  ;;  %v885_v35 = vmul.f32 0.5, %v6709_v58  ;;  %v9084_v8 = vld [vmem:[#allocation99_spill] sm:$0xff]  ;;  %v1783_v44 = vmul.f32 0.5, %v6717_v15  ;;  %v9085_v55 = vld [vmem:[#allocation26_spill] sm:$0xff]  ;;  %v9087_v13 = vld [vmem:[#allocation45_spill] sm:$0xff] }
 0x15d   : > { %9072 = vst [vmem:[#allocation7_spill] sm:$0xff] %v6726_v32  ;;  %2090 = vmatprep.subr.mxu0 %v2017_v52  ;;  %2165 = vmatpush1.msra.mxu1 %v1118_v28  ;;  %v6742_v22 = vadd.f32 %v9080_v10, %v6624_v60  ;;  %v2012_v17 = vmul.f32 %v9084_v8, %v9083_v46  ;;  %v9088_v60 = vld [vmem:[#allocation42_spill] sm:$0xff]  ;;  %v9089_v28 = vld [vmem:[#allocation97_spill] sm:$0xff]  ;;  %4583 = vtanh.f32 %v884_v4  ;;  %v886_v52 = vmul.f32 0.5, %v6726_v32  ;;  %v9092_v11 = vld [vmem:[#allocation43_spill] sm:$0xff] }
 0x15e   : > { %9077 = vst [vmem:[#allocation58_spill] sm:$0xff] %v6735_v0  ;;  %2091 = vmatpush1.msra.mxu0 %v2016_v47  ;;  %2166 = vmatprep.subr.mxu1 %v1117_v34  ;;  %v6750_v33 = vadd.f32 %v9085_v55, %v9075_v18  ;;  %v2011_v50 = vmul.f32 %v9089_v28, %v9088_v60  ;;  %v9090_v3 = vld [vmem:[#allocation6_spill] sm:$0xff]  ;;  %4585 = vtanh.f32 %v1782_v36  ;;  %v1784_v47 = vmul.f32 0.5, %v6735_v0  ;;  %v9094_v29 = vld [vmem:[#allocation21_spill] sm:$0xff]  ;;  %v9099_v21 = vld [vmem:[#allocation4_spill] sm:$0xff] }
 0x15f   : > { %9081 = vst [vmem:[#allocation77_spill] sm:$0xff] %v6742_v22  ;;  %2092 = vmatprep.subr.mxu0 %v2015_v26  ;;  %2167 = vmatpush1.msra.mxu1 %v9082_v63  ;;  %v6760_v41 = vadd.f32 %v9090_v3, %v6647_v14  ;;  %v9093_v34 = vld [vmem:[#allocation62_spill] sm:$0xff]  ;;  %v9095_v1 = vld [vmem:[#allocation25_spill] sm:$0xff]  ;;  %v9098_v26 = vld [vmem:[#allocation92_spill] sm:$0xff]  ;;  %4587 = vtanh.f32 %v885_v35  ;;  %v887_v53 = vmul.f32 0.5, %v6742_v22  ;;  %v6776_v48 = vadd.f32 %v9099_v21, %v6647_v14  ;;  %v6786_v35 = vpop.f32.mrf.mxu1 }
 0x160   : > { %9086 = vst [vmem:[#allocation61_spill] sm:$0xff] %v6750_v33  ;;  %2093 = vmatpush1.msra.mxu0 %v2014_v7  ;;  %2168 = vmatprep.subr.mxu1 %v9087_v13  ;;  %v1043_v43 = vadd.f32 0.5, %v9093_v34  ;;  %v6769_v27 = vadd.f32 %v9095_v1, %v9094_v29  ;;  %v9097_v56 = vld [vmem:[#allocation41_spill] sm:$0xff]  ;;  %v1042_v4 = vadd.f32 0.5, %v9098_v26  ;;  %v9101_v7 = vld [vmem:[#allocation34_spill] sm:$0xff]  ;;  %v9103_v18 = vld [vmem:[#allocation96_spill] sm:$0xff]  ;;  %4589 = vtanh.f32 %v1783_v44  ;;  %v6797_v13 = vpop.f32.mrf.mxu0 }
 0x161   : > { %9091 = vst [vmem:[#allocation67_spill] sm:$0xff] %v6760_v41  ;;  %2094 = vmatprep.subr.mxu0 %v2013_v20  ;;  %2169 = vmatpush1.msra.mxu1 %v9092_v11  ;;  %9100 = vst [vmem:[#allocation64_spill] sm:$0xff] %v6776_v48  ;;  %v9102_v36 = vld [vmem:[#allocation38_spill] sm:$0xff]  ;;  %v1785_v23 = vmul.f32 0.5, %v6750_v33  ;;  %v9104_v49 = vld [vmem:[#allocation36_spill] sm:$0xff]  ;;  %4591 = vtanh.f32 %v886_v52  ;;  %v889_v21 = vmul.f32 0.5, %v6776_v48 }
 0x162   : > { %9096 = vst [vmem:[#allocation73_spill] sm:$0xff] %v6769_v27  ;;  %2095 = vmatpush1.msra.mxu0 %v2012_v17  ;;  %2170 = vmatprep.subr.mxu1 %v9097_v56  ;;  %v1109_v40 = vmul.f32 %v9103_v18, %v9102_v36  ;;  %v6784_v20 = vadd.f32 %v9104_v49, %v9094_v29  ;;  %v9106_v10 = vld [vmem:[#allocation35_spill] sm:$0xff]  ;;  %v9107_v63 = vld [vmem:[#allocation86_spill] sm:$0xff]  ;;  %v9108_v14 = vld [vmem:[#allocation37_spill] sm:$0xff]  ;;  %v888_v17 = vmul.f32 0.5, %v6760_v41  ;;  %4593 = vtanh.f32 %v1784_v47 }
 0x163   : > { %2096 = vmatprep.subr.mxu0 %v2011_v50  ;;  %2171 = vmatpush1.msra.mxu1 %v9101_v7  ;;  %v9109_v46 = vld [vmem:[#allocation90_spill] sm:$0xff]  ;;  %v9112_v60 = vld [vmem:[#allocation87_spill] sm:$0xff]  ;;  %v9113_v28 = vld [vmem:[#allocation33_spill] sm:$0xff]  ;;  %v1786_v11 = vmul.f32 0.5, %v6769_v27  ;;  %4595 = vtanh.f32 %v887_v53 }
 0x164   : > { %9105 = vst [vmem:[#allocation68_spill] sm:$0xff] %v6784_v20  ;;  %2097 = vmatpush1.msra.mxu0 %v9106_v10  ;;  %2172 = vmatprep.subr.mxu1 %v9107_v63  ;;  %v1108_v8 = vmul.f32 %v9109_v46, %v9108_v14  ;;  %v9110_v44 = vld [vmem:[#allocation94_spill] sm:$0xff]  ;;  %v9114_v50 = vld [vmem:[#allocation40_spill] sm:$0xff]  ;;  %v9119_v56 = vld [vmem:[#allocation39_spill] sm:$0xff]  ;;  %4597 = vtanh.f32 %v1785_v23  ;;  %v1787_v10 = vmul.f32 0.5, %v6784_v20 }
 0x165   : > { %v6795_v55 = vadd.f32 %v9110_v44, %v6597_v59  ;;  %2098 = vmatprep.subr.mxu0 %v9112_v60  ;;  %2173 = vmatpush1.msra.mxu1 %v9113_v28  ;;  %v1107_v3 = vmul.f32 %v1043_v43, %v9114_v50  ;;  %v9115_v34 = vld [vmem:[#allocation20_spill] sm:$0xff]  ;;  %v9116_v29 = vld [vmem:[#allocation98_spill] sm:$0xff]  ;;  %v1106_v26 = vmul.f32 %v1042_v4, %v9119_v56  ;;  %v9120_v7 = vld [vmem:[#allocation101_spill] sm:$0xff]  ;;  %v6822_v4 = vpop.f32.mrf.mxu1  ;;  %4599 = vtanh.f32 %v888_v17  ;;  %v6833_v44 = vpop.eup %4575 }
 0x166   : > { %v6805_v52 = vadd.f32 %v9116_v29, %v9115_v34  ;;  %v9118_v1 = vld [vmem:[#allocation32_spill] sm:$0xff]  ;;  %2174 = vmatprep.subr.mxu1 %v1109_v40  ;;  %v6812_v36 = vadd.f32 %v9120_v7, %v6597_v59  ;;  %v9122_v43 = vld [vmem:[#allocation31_spill] sm:$0xff]  ;;  %v9123_v47 = vld [vmem:[#allocation29_spill] sm:$0xff]  ;;  %4601 = vtanh.f32 %v1786_v11  ;;  %v6840_v17 = vpop.eup %4577 }
 0x167   : > { %9111 = vst [vmem:[#allocation69_spill] sm:$0xff] %v6795_v55  ;;  %2099 = vmatpush1.msra.mxu0 %v9118_v1  ;;  %2175 = vmatpush1.msra.mxu1 %v1108_v8  ;;  %v9124_v18 = vld [vmem:[#allocation66_spill] sm:$0xff]  ;;  %v9125_v40 = vld [vmem:[#allocation109_spill] sm:$0xff]  ;;  %v9127_v53 = vld [vmem:[#allocation76_spill] sm:$0xff]  ;;  %v890_v59 = vmul.f32 0.5, %v6795_v55  ;;  %v6830_v8 = vpop.f32.mrf.mxu0  ;;  %4603 = vtanh.f32 %v889_v21  ;;  %v6847_v56 = vpop.eup %4579 }
 0x168   : > { %9117 = vst [vmem:[#allocation65_spill] sm:$0xff] %v6805_v52  ;;  %9121 = vst [vmem:[#allocation24_spill] sm:$0xff] %v6812_v36  ;;  %2100 = vmatprep.subr.mxu0 %v9122_v43  ;;  %v2004_v49 = vmul.f32 %v9124_v18, %v9123_v47  ;;  %v6820_v63 = vadd.f32 %v9125_v40, %v9115_v34  ;;  %2176 = vmatprep.subr.mxu1 %v1107_v3  ;;  %v9128_v14 = vld [vmem:[#allocation110_spill] sm:$0xff]  ;;  %v9130_v23 = vld [vmem:[#allocation72_spill] sm:$0xff]  ;;  %v1788_v60 = vmul.f32 0.5, %v6805_v52  ;;  %v6854_v43 = vpop.f32.mrf.mxu1  ;;  %v6856_v47 = vpop.eup %4581 }
 0x169   : > { %2101 = vmatpush1.msra.mxu0 %v9127_v53  ;;  %v6828_v46 = vadd.f32 %v9128_v14, %v6611_v54  ;;  %2177 = vmatpush1.msra.mxu1 %v1106_v26  ;;  %v9131_v28 = vld [vmem:[#allocation19_spill] sm:$0xff]  ;;  %v9132_v50 = vld [vmem:[#allocation112_spill] sm:$0xff]  ;;  %v891_v34 = vmul.f32 0.5, %v6812_v36  ;;  %v9134_v29 = vld [vmem:[#allocation113_spill] sm:$0xff]  ;;  %4605 = vtanh.f32 %v1787_v10  ;;  %v6863_v40 = vpop.f32.mrf.mxu0 }
 0x16a   : > { %9126 = vst [vmem:[#allocation71_spill] sm:$0xff] %v6820_v63  ;;  %2102 = vmatprep.subr.mxu0 %v9130_v23  ;;  %v6838_v3 = vadd.f32 %v9132_v50, %v9131_v28  ;;  %v6845_v1 = vadd.f32 %v9134_v29, %v6611_v54  ;;  %v1789_v11 = vmul.f32 0.5, %v6820_v63  ;;  %v9136_v26 = vld [vmem:[#allocation115_spill] sm:$0xff]  ;;  %4607 = vtanh.f32 %v890_v59  ;;  %v9138_v18 = vld [vmem:[#allocation114_spill] sm:$0xff]  ;;  %v6865_v10 = vpop.eup %4583  ;;  %v9145_v62 = vld [vmem:[#allocation117_spill] sm:$0xff] }
 0x16b   : > { %9129 = vst [vmem:[#allocation107_spill] sm:$0xff] %v6828_v46  ;;  %2103 = vmatpush1.msra.mxu0 %v2004_v49  ;;  %v6852_v7 = vadd.f32 %v9136_v26, %v9131_v28  ;;  %v892_v21 = vmul.f32 0.5, %v6828_v46  ;;  %v9139_v49 = vld [vmem:[#allocation116_spill] sm:$0xff]  ;;  %4609 = vtanh.f32 %v1788_v60  ;;  %v9141_v14 = vld [vmem:[#allocation18_spill] sm:$0xff]  ;;  %v6872_v28 = vpop.eup %4585  ;;  %v6877_v50 = vadd.f32 %v6605_v42, %v9138_v18  ;;  %v9157_v22 = vld [vmem:[#allocation111_spill] sm:$0xff] }
 0x16c   : > { %9133 = vst [vmem:[#allocation63_spill] sm:$0xff] %v6838_v3  ;;  %9135 = vst [vmem:[#allocation74_spill] sm:$0xff] %v6845_v1  ;;  %v6861_v54 = vadd.f32 %v9139_v49, %v9138_v18  ;;  %v1790_v53 = vmul.f32 0.5, %v6838_v3  ;;  %v6870_v23 = vadd.f32 %v6601_v16, %v9141_v14  ;;  %4611 = vtanh.f32 %v891_v34  ;;  %v6879_v29 = vpop.eup %4587  ;;  %v6886_v16 = vpop.f32.mrf.mxu1  ;;  %v9151_v51 = vld [vmem:[#allocation108_spill] sm:$0xff]  ;;  %v9163_v55 = vld [vmem:[#allocation95_spill] sm:$0xff] }
 0x16d   : > { %9137 = vst [vmem:[#allocation106_spill] sm:$0xff] %v6852_v7  ;;  %v893_v59 = vmul.f32 0.5, %v6845_v1  ;;  %9143 = vst [vmem:[#allocation79_spill] sm:$0xff] %v6877_v50  ;;  %4613 = vtanh.f32 %v1789_v11  ;;  %v1791_v60 = vmul.f32 0.5, %v6852_v7  ;;  %v6884_v26 = vadd.f32 %v6616_v57, %v9141_v14  ;;  %v6888_v49 = vpop.eup %4589  ;;  %v6895_v18 = vpop.f32.mrf.mxu0  ;;  %v9147_v57 = vld [vmem:[#allocation17_spill] sm:$0xff]  ;;  %v9159_v41 = vld [vmem:[#allocation16_spill] sm:$0xff] }
 0x16e   : > { %9140 = vst [vmem:[#allocation56_spill] sm:$0xff] %v6861_v54  ;;  %9142 = vst [vmem:[#allocation60_spill] sm:$0xff] %v6870_v23  ;;  %4615 = vtanh.f32 %v892_v21  ;;  %v894_v34 = vmul.f32 0.5, %v6861_v54  ;;  %v6893_v42 = vadd.f32 %v6622_v30, %v9145_v62  ;;  %v6897_v11 = vpop.eup %4591  ;;  %v1792_v24 = vmul.f32 0.5, %v6870_v23  ;;  %v9165_v36 = vld [vmem:[#allocation13_spill] sm:$0xff]  ;;  %v9169_v1 = vld [vmem:[#allocation103_spill] sm:$0xff] }
 0x16f   : > { %9144 = vst [vmem:[#allocation55_spill] sm:$0xff] %v6884_v26  ;;  %4617 = vtanh.f32 %v1790_v53  ;;  %v6902_v14 = vadd.f32 %v6637_v9, %v9147_v57  ;;  %v6904_v2 = vpop.eup %4593  ;;  %v895_v21 = vmul.f32 0.5, %v6877_v50  ;;  %v6909_v30 = vadd.f32 %v6643_v12, %v9145_v62  ;;  %v6918_v9 = vpop.f32.mrf.mxu1  ;;  %v9171_v54 = vld [vmem:[#allocation14_spill] sm:$0xff] }
 0x170   : > { %9146 = vst [vmem:[#allocation57_spill] sm:$0xff] %v6893_v42  ;;  %4619 = vtanh.f32 %v893_v59  ;;  %v6911_v6 = vpop.eup %4595  ;;  %v1793_v53 = vmul.f32 0.5, %v6884_v26  ;;  %v6916_v19 = vadd.f32 %v6659_v37, %v9147_v57  ;;  %v896_v59 = vmul.f32 0.5, %v6893_v42  ;;  %v6927_v62 = vpop.f32.mrf.mxu0  ;;  %v9153_v37 = vld [vmem:[#allocation15_spill] sm:$0xff] }
 0x171   : > { %9148 = vst [vmem:[#allocation80_spill] sm:$0xff] %v6902_v14  ;;  %9149 = vst [vmem:[#allocation53_spill] sm:$0xff] %v6909_v30  ;;  %4621 = vtanh.f32 %v1791_v60  ;;  %v6920_v15 = vpop.eup %4597  ;;  %v6925_v12 = vadd.f32 %v6667_v39, %v9151_v51  ;;  %v1794_v0 = vmul.f32 0.5, %v6902_v14  ;;  %v6934_v57 = vadd.f32 %v6688_v38, %v9153_v37  ;;  %v6950_v38 = vpop.f32.mrf.mxu1  ;;  %v9175_v42 = vld [vmem:[#allocation59_spill] sm:$0xff] }
 0x172   : > { %9150 = vst [vmem:[#allocation8_spill] sm:$0xff] %v6916_v19  ;;  %4623 = vtanh.f32 %v894_v34  ;;  %v6929_v60 = vpop.eup %4599  ;;  %v897_v34 = vmul.f32 0.5, %v6909_v30  ;;  %v6941_v39 = vadd.f32 %v6696_v61, %v9151_v51  ;;  %v6948_v32 = vadd.f32 %v6719_v45, %v9153_v37  ;;  %v829_v61 = vpop.f32.mrf.mxu0 }
 0x173   : > { %9152 = vst [vmem:[#allocation23_spill] sm:$0xff] %v6925_v12  ;;  %4625 = vtanh.f32 %v1792_v24  ;;  %9154 = vst [vmem:[#allocation28_spill] sm:$0xff] %v6934_v57  ;;  %v6936_v58 = vpop.eup %4601  ;;  %v1795_v24 = vmul.f32 0.5, %v6916_v19  ;;  %v6957_v51 = vadd.f32 %v6728_v25, %v9157_v22  ;;  %v6964_v45 = vadd.f32 %v6752_v31, %v9159_v41  ;;  %v1727_v31 = vpop.f32.mrf.mxu1 }
 0x174   : > { %4627 = vtanh.f32 %v895_v21  ;;  %9155 = vst [vmem:[#allocation51_spill] sm:$0xff] %v6941_v39  ;;  %v6943_v33 = vpop.eup %4603  ;;  %9156 = vst [vmem:[#allocation54_spill] sm:$0xff] %v6948_v32  ;;  %v898_v21 = vmul.f32 0.5, %v6925_v12  ;;  %v6971_v52 = vadd.f32 %v6762_v5, %v9157_v22  ;;  %v6978_v48 = vadd.f32 %v6786_v35, %v9159_v41  ;;  %v833_v22 = vpop.f32.mrf.mxu0 }
 0x175   : > { %4629 = vtanh.f32 %v1793_v53  ;;  %9158 = vst [vmem:[#allocation83_spill] sm:$0xff] %v6957_v51  ;;  %v1796_v53 = vmul.f32 0.5, %v6934_v57  ;;  %9160 = vst [vmem:[#allocation49_spill] sm:$0xff] %v6964_v45  ;;  %v6985_v3 = vadd.f32 %v6797_v13, %v9163_v55  ;;  %v6992_v41 = vadd.f32 %v6822_v4, %v9165_v36  ;;  %v1731_v4 = vpop.f32.mrf.mxu1 }
 0x176   : > { %v6952_v27 = vpop.eup %4605  ;;  %4631 = vtanh.f32 %v896_v59  ;;  %v899_v59 = vmul.f32 0.5, %v6941_v39  ;;  %9161 = vst [vmem:[#allocation104_spill] sm:$0xff] %v6971_v52  ;;  %9162 = vst [vmem:[#allocation52_spill] sm:$0xff] %v6978_v48  ;;  %v6999_v7 = vadd.f32 %v6830_v8, %v9163_v55  ;;  %v7006_v46 = vadd.f32 %v6854_v43, %v9165_v36  ;;  %v835_v55 = vpop.f32.mrf.mxu0 }
 0x177   : > { %v6959_v20 = vpop.eup %4607  ;;  %4633 = vtanh.f32 %v1794_v0  ;;  %v1797_v0 = vmul.f32 0.5, %v6948_v32  ;;  %9164 = vst [vmem:[#allocation27_spill] sm:$0xff] %v6985_v3  ;;  %9166 = vst [vmem:[#allocation50_spill] sm:$0xff] %v6992_v41  ;;  %v7013_v26 = vadd.f32 %v6863_v40, %v9169_v1  ;;  %v7020_v36 = vadd.f32 %v6886_v16, %v9171_v54  ;;  %v1733_v16 = vpop.f32.mrf.mxu1 }
 0x178   : > { %v6966_v37 = vpop.eup %4609  ;;  %4635 = vtanh.f32 %v897_v34  ;;  %v900_v34 = vmul.f32 0.5, %v6957_v51  ;;  %9167 = vst [vmem:[#allocation105_spill] sm:$0xff] %v6999_v7  ;;  %9168 = vst [vmem:[#allocation85_spill] sm:$0xff] %v7006_v46  ;;  %v7027_v14 = vadd.f32 %v6895_v18, %v9169_v1  ;;  %v7034_v50 = vadd.f32 %v6918_v9, %v9171_v54  ;;  %v839_v1 = vpop.f32.mrf.mxu0 }
 0x179   : > { %v6973_v25 = vpop.eup %4611  ;;  %4637 = vtanh.f32 %v1795_v24  ;;  %v1798_v24 = vmul.f32 0.5, %v6964_v45  ;;  %9170 = vst [vmem:[#allocation48_spill] sm:$0xff] %v7013_v26  ;;  %9172 = vst [vmem:[#allocation102_spill] sm:$0xff] %v7020_v36  ;;  %v7041_v57 = vadd.f32 %v6927_v62, %v9175_v42  ;;  %v7047_v30 = vadd.f32 %v829_v61, %v9175_v42  ;;  %v9180_v45 = vld [vmem:[#allocation30_spill] sm:$0xff]  ;;  %v1737_v39 = vpop.f32.mrf.mxu1  ;;  %v9182_v61 = vld [vmem:[#allocation12_spill] sm:$0xff] }
 0x17a   : > { %v6980_v63 = vpop.eup %4613  ;;  %4639 = vtanh.f32 %v898_v21  ;;  %v901_v21 = vmul.f32 0.5, %v6971_v52  ;;  %9173 = vst [vmem:[#allocation22_spill] sm:$0xff] %v7027_v14  ;;  %9174 = vst [vmem:[#allocation88_spill] sm:$0xff] %v7034_v50  ;;  %v905_v9 = vmul.f32 0.5, %v7027_v14  ;;  %v1803_v62 = vmul.f32 0.5, %v7034_v50  ;;  %v841_v51 = vpop.f32.mrf.mxu0  ;;  %v9189_v50 = vld [vmem:[#allocation9_spill] sm:$0xff] }
 0x17b   : > { %v6987_v5 = vpop.eup %4615  ;;  %4641 = vtanh.f32 %v1796_v53  ;;  %v1799_v53 = vmul.f32 0.5, %v6978_v48  ;;  %9176 = vst [vmem:[#allocation46_spill] sm:$0xff] %v7041_v57  ;;  %9177 = vst [vmem:[#allocation100_spill] sm:$0xff] %v7047_v30  ;;  %v906_v42 = vmul.f32 0.5, %v7041_v57 }
 0x17c   : > { %v6994_v35 = vpop.eup %4617  ;;  %4643 = vtanh.f32 %v899_v59  ;;  %v902_v59 = vmul.f32 0.5, %v6985_v3  ;;  %v9186_v3 = vld [vmem:[#allocation91_spill] sm:$0xff] }
 0x17d   : > { %v7001_v13 = vpop.eup %4619  ;;  %4645 = vtanh.f32 %v1797_v0  ;;  %v1800_v0 = vmul.f32 0.5, %v6992_v41  ;;  %v7071_v41 = vadd.f32 %v835_v55, %v9180_v45  ;;  %v845_v55 = vpop.f32.mrf.mxu0 }
 0x17e   : > { %v7008_v23 = vpop.eup %4621  ;;  %4647 = vtanh.f32 %v900_v34  ;;  %v903_v34 = vmul.f32 0.5, %v6999_v7 }
 0x17f   : > { %v7015_v8 = vpop.eup %4623  ;;  %4649 = vtanh.f32 %v1798_v24  ;;  %v1801_v24 = vmul.f32 0.5, %v7006_v46  ;;  %9184 = vst [vmem:[#allocation99_spill] sm:$0xff] %v7071_v41 }
 0x180   : > { %v7022_v43 = vpop.eup %4625  ;;  %4651 = vtanh.f32 %v901_v21  ;;  %v904_v21 = vmul.f32 0.5, %v7013_v26 }
 0x181   : > { %v7029_v40 = vpop.eup %4627  ;;  %4653 = vtanh.f32 %v1799_v53  ;;  %v1802_v53 = vmul.f32 0.5, %v7020_v36  ;;  %v1739_v36 = vpop.f32.mrf.mxu1 }
 0x182   : > { %v7036_v19 = vpop.eup %4629  ;;  %4655 = vtanh.f32 %v902_v59  ;;  %v9178_v59 = vld [vmem:[#allocation11_spill] sm:$0xff]  ;;  %v7098_v26 = vadd.f32 %v1739_v36, %v9189_v50 }
 0x183   : > { %v7043_v18 = vpop.eup %4631  ;;  %4657 = vtanh.f32 %v1800_v0  ;;  %v7053_v32 = vadd.f32 %v1727_v31, %v9178_v59  ;;  %v7059_v0 = vadd.f32 %v833_v22, %v9180_v45 }
 0x184   : > { %v7049_v54 = vpop.eup %4633  ;;  %4659 = vtanh.f32 %v903_v34  ;;  %v7065_v34 = vadd.f32 %v1731_v4, %v9182_v61  ;;  %9190 = vst [vmem:[#allocation97_spill] sm:$0xff] %v7098_v26 }
 0x185   : > { %9179 = vst [vmem:[#allocation89_spill] sm:$0xff] %v7053_v32  ;;  %v7055_v12 = vpop.eup %4635  ;;  %4661 = vtanh.f32 %v1801_v24  ;;  %9181 = vst [vmem:[#allocation47_spill] sm:$0xff] %v7059_v0  ;;  %v907_v24 = vmul.f32 0.5, %v7047_v30  ;;  %v1805_v52 = vmul.f32 0.5, %v7053_v32  ;;  %v908_v4 = vmul.f32 0.5, %v7059_v0  ;;  %v9192_v32 = vld [vmem:[#allocation93_spill] sm:$0xff] }
 0x186   : > { %v7061_v48 = vpop.eup %4637  ;;  %4663 = vtanh.f32 %v904_v21  ;;  %9183 = vst [vmem:[#allocation44_spill] sm:$0xff] %v7065_v34  ;;  %v7077_v21 = vadd.f32 %v1733_v16, %v9182_v61  ;;  %v1806_v45 = vmul.f32 0.5, %v7065_v34  ;;  %v909_v16 = vmul.f32 0.5, %v7071_v41  ;;  %v9194_v0 = vld [vmem:[#allocation10_spill] sm:$0xff] }
 0x187   : > { %v7067_v31 = vpop.eup %4639  ;;  %4665 = vtanh.f32 %v1802_v53  ;;  %v7083_v53 = vadd.f32 %v839_v1, %v9186_v3  ;;  %v7092_v61 = vadd.f32 %v841_v51, %v9186_v3  ;;  %v7107_v57 = vadd.f32 %v845_v55, %v9192_v32  ;;  %v1743_v3 = vpop.f32.mrf.mxu1 }
 0x188   : > { %v7073_v22 = vpop.eup %4641  ;;  %4667 = vtanh.f32 %v905_v9  ;;  %9185 = vst [vmem:[#allocation26_spill] sm:$0xff] %v7077_v21  ;;  %v1807_v1 = vmul.f32 0.5, %v7077_v21  ;;  %v7122_v55 = vadd.f32 %v6950_v38, %v9178_v59  ;;  %v7128_v41 = vadd.f32 %v1743_v3, %v9194_v0 }
 0x189   : > { %v7079_v46 = vpop.eup %4643  ;;  %4669 = vtanh.f32 %v1803_v62  ;;  %9187 = vst [vmem:[#allocation45_spill] sm:$0xff] %v7083_v53  ;;  %9188 = vst [vmem:[#allocation42_spill] sm:$0xff] %v7092_v61  ;;  %v910_v14 = vmul.f32 0.5, %v7083_v53  ;;  %v911_v36 = vmul.f32 0.5, %v7092_v61  ;;  %v912_v34 = vmul.f32 0.5, %v7107_v57 }
 0x18a   : > { %v7085_v7 = vpop.eup %4645  ;;  %4671 = vtanh.f32 %v906_v42  ;;  %9193 = vst [vmem:[#allocation43_spill] sm:$0xff] %v7122_v55  ;;  %v7160_v61 = vmul.f32 0.5, %v6833_v44 }
 0x18b   : > { %v7088_v9 = vpop.eup %4647  ;;  %4673 = vtanh.f32 %v907_v24  ;;  %v7104_v24 = vadd.f32 %v1737_v39, %v9189_v50  ;;  %v1809_v50 = vmul.f32 0.5, %v7098_v26  ;;  %v847_v39 = vpop.f32.mrf.mxu0 }
 0x18c   : > { %v7094_v62 = vpop.eup %4649  ;;  %4675 = vtanh.f32 %v1805_v52  ;;  %v7138_v38 = vadd.f32 %v847_v39, %v9192_v32  ;;  %9197 = vst [vmem:[#allocation25_spill] sm:$0xff] %v7160_v61  ;;  %v7185_v61 = vmul.f32 0.5, %v6879_v29  ;;  %v7202_v29 = vmul.f32 0.5, %v6920_v15 }
 0x18d   : > { %v7100_v42 = vpop.eup %4651  ;;  %4677 = vtanh.f32 %v908_v4  ;;  %9191 = vst [vmem:[#allocation6_spill] sm:$0xff] %v7104_v24 }
 0x18e   : > { %v7109_v51 = vpop.eup %4653  ;;  %4679 = vtanh.f32 %v1806_v45  ;;  %v1808_v45 = vmul.f32 0.5, %v7104_v24  ;;  %v913_v32 = vmul.f32 0.5, %v7138_v38  ;;  %9203 = vst [vmem:[#allocation96_spill] sm:$0xff] %v7185_v61  ;;  %9208 = vst [vmem:[#allocation90_spill] sm:$0xff] %v7202_v29 }
 0x18f   : > { %v7111_v52 = vpop.eup %4655  ;;  %4681 = vtanh.f32 %v909_v16  ;;  %v1745_v16 = vpop.f32.mrf.mxu1 }
 0x190   : > { %v7115_v4 = vpop.eup %4657  ;;  %4683 = vtanh.f32 %v1807_v1  ;;  %v7133_v1 = vld [vmem:[%s8699_s3 + $0x8] sm:$0xff]  ;;  %v7149_v3 = vadd.f32 %v1745_v16, %v9194_v0 }
 0x191   : > { %v7118_v30 = vpop.eup %4659  ;;  %4685 = vtanh.f32 %v910_v14  ;;  %9195 = vst [vmem:[#allocation62_spill] sm:$0xff] %v7133_v1  ;;  %v7143_v14 = vld [vmem:[%s8699_s3] sm:$0xff]  ;;  %v2070_v39 = vcombine.high %v7133_v1, %v7133_v1  ;;  %v7174_v1 = vmul.f32 0.5, %v6856_v47  ;;  %v7193_v47 = vmul.f32 0.5, %v6897_v11 }
 0x192   : > { %v7125_v21 = vpop.eup %4661  ;;  %4687 = vtanh.f32 %v912_v34  ;;  %9196 = vst [vmem:[#allocation21_spill] sm:$0xff] %v7143_v14  ;;  %v1810_v34 = vmul.f32 0.5, %v7128_v41  ;;  %v2144_v0 = vcombine.high %v7143_v14, %v7143_v14  ;;  %v7182_v14 = vmul.f32 0.5, %v6872_v28 }
 0x193   : > { %v7135_v26 = vpop.eup %4663  ;;  %4689 = vtanh.f32 %v911_v36  ;;  %v1804_v36 = vmul.f32 0.5, %v7122_v55  ;;  %v7171_v55 = vmul.f32 0.5, %v6847_v56  ;;  %9200 = vst [vmem:[#allocation4_spill] sm:$0xff] %v7174_v1  ;;  %2136 = vmatprep.mubr.f32.mxu0 %v2070_v39  ;;  %v7190_v56 = vmul.f32 0.5, %v6888_v49  ;;  %9205 = vst [vmem:[#allocation35_spill] sm:$0xff] %v7193_v47 }
 0x194   : > { %v7145_v59 = vpop.eup %4665  ;;  %4691 = vtanh.f32 %v1809_v50  ;;  %v1811_v50 = vmul.f32 0.5, %v7149_v3  ;;  %9202 = vst [vmem:[#allocation38_spill] sm:$0xff] %v7182_v14  ;;  %2210 = vmatprep.mubr.f32.mxu1 %v2144_v0  ;;  %v7199_v28 = vmul.f32 0.5, %v6911_v6  ;;  %v7205_v39 = vmul.f32 0.5, %v6929_v60 }
 0x195   : > { %v7151_v24 = vpop.eup %4667  ;;  %4693 = vtanh.f32 %v1808_v45  ;;  %v7168_v45 = vmul.f32 0.5, %v6840_v17  ;;  %9199 = vst [vmem:[#allocation92_spill] sm:$0xff] %v7171_v55  ;;  %9204 = vst [vmem:[#allocation36_spill] sm:$0xff] %v7190_v56  ;;  %v7208_v49 = vmul.f32 0.5, %v6936_v58  ;;  %v7211_v11 = vmul.f32 0.5, %v6943_v33 }
 0x196   : > { %v7157_v53 = vpop.eup %4669  ;;  %4695 = vtanh.f32 %v1810_v34  ;;  %v7179_v34 = vmul.f32 0.5, %v6865_v10  ;;  %9207 = vst [vmem:[#allocation37_spill] sm:$0xff] %v7199_v28  ;;  %9209 = vst [vmem:[#allocation94_spill] sm:$0xff] %v7205_v39  ;;  %v7220_v6 = vmul.f32 0.5, %v6966_v37  ;;  %v7223_v60 = vmul.f32 0.5, %v6973_v25 }
 0x197   : > { %v7165_v16 = vpop.eup %4671  ;;  %9198 = vst [vmem:[#allocation41_spill] sm:$0xff] %v7168_v45  ;;  %4697 = vtanh.f32 %v913_v32  ;;  %v7196_v32 = vmul.f32 0.5, %v6904_v2  ;;  %9210 = vst [vmem:[#allocation87_spill] sm:$0xff] %v7208_v49  ;;  %v7214_v2 = vmul.f32 0.5, %v6952_v27  ;;  %v7226_v58 = vmul.f32 0.5, %v6980_v63 }
 0x198   : > { %v7176_v44 = vpop.eup %4673  ;;  %9201 = vst [vmem:[#allocation34_spill] sm:$0xff] %v7179_v34  ;;  %4699 = vtanh.f32 %v1811_v50  ;;  %9211 = vst [vmem:[#allocation33_spill] sm:$0xff] %v7211_v11  ;;  %v7229_v0 = vmul.f32 0.5, %v6987_v5  ;;  %v7232_v33 = vmul.f32 0.5, %v6994_v35  ;;  %v7238_v37 = vmul.f32 0.5, %v7008_v23 }
 0x199   : > { %v7187_v17 = vpop.eup %4675  ;;  %9206 = vst [vmem:[#allocation86_spill] sm:$0xff] %v7196_v32  ;;  %4701 = vtanh.f32 %v1804_v36  ;;  %9212 = vst [vmem:[#allocation40_spill] sm:$0xff] %v7214_v2  ;;  %v7217_v36 = vmul.f32 0.5, %v6959_v20  ;;  %v7235_v20 = vmul.f32 0.5, %v7001_v13  ;;  %v7241_v45 = vmul.f32 0.5, %v7015_v8 }
 0x19a   : > { %v4678_v10 = vpop.eup %4677  ;;  %9214 = vst [vmem:[#allocation98_spill] sm:$0xff] %v7220_v6  ;;  %9215 = vst [vmem:[#allocation32_spill] sm:$0xff] %v7223_v60  ;;  %v7244_v25 = vmul.f32 0.5, %v7022_v43  ;;  %v7247_v5 = vmul.f32 0.5, %v7029_v40  ;;  %v7250_v35 = vmul.f32 0.5, %v7036_v19  ;;  %v7253_v1 = vmul.f32 0.5, %v7043_v18 }
 0x19b   : > { %v4680_v50 = vpop.eup %4679  ;;  %9213 = vst [vmem:[#allocation20_spill] sm:$0xff] %v7217_v36  ;;  %9216 = vst [vmem:[#allocation39_spill] sm:$0xff] %v7226_v58  ;;  %v7256_v13 = vmul.f32 0.5, %v7049_v54  ;;  %v7259_v8 = vmul.f32 0.5, %v7055_v12  ;;  %v7262_v43 = vmul.f32 0.5, %v7061_v48  ;;  %v7265_v14 = vmul.f32 0.5, %v7067_v31 }
 0x19c   : > { %v4682_v15 = vpop.eup %4681  ;;  %9217 = vst [vmem:[#allocation101_spill] sm:$0xff] %v7232_v33  ;;  %9218 = vst [vmem:[#allocation31_spill] sm:$0xff] %v7238_v37  ;;  %v7268_v40 = vmul.f32 0.5, %v7073_v22  ;;  %v7271_v18 = vmul.f32 0.5, %v7079_v46  ;;  %v7274_v54 = vmul.f32 0.5, %v7085_v7  ;;  %v7277_v55 = vmul.f32 0.5, %v7088_v9 }
 0x19d   : > { %v4684_v27 = vpop.eup %4683  ;;  %v7280_v12 = vmul.f32 0.5, %v7094_v62  ;;  %v7283_v31 = vmul.f32 0.5, %v7100_v42  ;;  %v7286_v22 = vmul.f32 0.5, %v7109_v51  ;;  %v7289_v56 = vmul.f32 0.5, %v7111_v52 }
 0x19e   : > { %v4686_v63 = vpop.eup %4685  ;;  %v7292_v46 = vmul.f32 0.5, %v7115_v4  ;;  %v1031_v9 = vmul.f32 0.5, %v7118_v30  ;;  %v7296_v34 = vmul.f32 0.5, %v7125_v21  ;;  %v1032_v62 = vmul.f32 0.5, %v7135_v26 }
 0x19f   : > { %v4688_v23 = vpop.eup %4687  ;;  %v1930_v61 = vmul.f32 0.5, %v7145_v59  ;;  %v1033_v51 = vmul.f32 0.5, %v7151_v24  ;;  %v1931_v52 = vmul.f32 0.5, %v7157_v53  ;;  %v1034_v4 = vmul.f32 0.5, %v7165_v16 }
 0x1a0   : > { %v4690_v19 = vpop.eup %4689  ;;  %v1040_v32 = vmul.f32 0.5, %v4688_v23  ;;  %v1038_v49 = vmul.f32 0.5, %v4686_v63  ;;  %v1035_v21 = vmul.f32 0.5, %v7176_v44  ;;  %v1037_v39 = vmul.f32 0.5, %v4682_v15 }
 0x1a1   : > { %v4692_v48 = vpop.eup %4691  ;;  %v1039_v29 = vmul.f32 0.5, %v4690_v19  ;;  %v1036_v11 = vmul.f32 0.5, %v4678_v10  ;;  %v1935_v59 = vmul.f32 0.5, %v4684_v27  ;;  %v1934_v36 = vmul.f32 0.5, %v4680_v50 }
 0x1a2   : > { %v4694_v7 = vpop.eup %4693  ;;  %v1937_v28 = vmul.f32 0.5, %v4692_v48  ;;  %v1104_v58 = vadd.f32 0.5, %v1040_v32  ;;  %v1933_v16 = vmul.f32 0.5, %v7187_v17  ;;  %v1102_v63 = vadd.f32 0.5, %v1038_v49 }
 0x1a3   : > { %v4696_v42 = vpop.eup %4695  ;;  %v1936_v26 = vmul.f32 0.5, %v4694_v7  ;;  %v1103_v53 = vadd.f32 0.5, %v1039_v29  ;;  %v1101_v37 = vadd.f32 0.5, %v1037_v39  ;;  %v1999_v7 = vadd.f32 0.5, %v1935_v59 }
 0x1a4   : > { %v4698_v47 = vpop.eup %4697  ;;  %v1938_v30 = vmul.f32 0.5, %v4696_v42  ;;  %v2001_v48 = vadd.f32 0.5, %v1937_v28  ;;  %v1168_v10 = vmul.f32 %v1104_v58, %v7107_v57  ;;  %v1099_v50 = vadd.f32 0.5, %v1035_v21  ;;  %v9222_v57 = vld [vmem:[#allocation99_spill] sm:$0xff] }
 0x1a5   : > { %v4700_v2 = vpop.eup %4699  ;;  %v1041_v23 = vmul.f32 0.5, %v4698_v47  ;;  %v2000_v44 = vadd.f32 0.5, %v1936_v26  ;;  %v1100_v47 = vadd.f32 0.5, %v1036_v11  ;;  %v1998_v29 = vadd.f32 0.5, %v1934_v36 }
 0x1a6   : > { %v4702_v6 = vpop.eup %4701  ;;  %v1939_v24 = vmul.f32 0.5, %v4700_v2  ;;  %v2002_v19 = vadd.f32 0.5, %v1938_v30  ;;  %v9219_v2 = vld [vmem:[#allocation42_spill] sm:$0xff]  ;;  %v1098_v28 = vadd.f32 0.5, %v1034_v4  ;;  %v1997_v49 = vadd.f32 0.5, %v1933_v16  ;;  %v9221_v30 = vld [vmem:[#allocation97_spill] sm:$0xff] }
 0x1a7   : > { %v1105_v33 = vadd.f32 0.5, %v1041_v23  ;;  %v1932_v60 = vmul.f32 0.5, %v4702_v6  ;;  %v1167_v27 = vmul.f32 %v1103_v53, %v9219_v2  ;;  %v9220_v6 = vld [vmem:[#allocation45_spill] sm:$0xff]  ;;  %v2065_v26 = vmul.f32 %v2001_v48, %v9221_v30  ;;  %v9225_v4 = vld [vmem:[#allocation26_spill] sm:$0xff] }
 0x1a8   : > { %v2003_v42 = vadd.f32 0.5, %v1939_v24  ;;  %v2066_v17 = vmul.f32 %v2002_v19, %v7128_v41  ;;  %v1166_v39 = vmul.f32 %v1102_v63, %v9220_v6  ;;  %v1165_v58 = vmul.f32 %v1101_v37, %v9222_v57  ;;  %v9224_v41 = vld [vmem:[#allocation47_spill] sm:$0xff]  ;;  %v9226_v19 = vld [vmem:[#allocation100_spill] sm:$0xff]  ;;  %v9229_v48 = vld [vmem:[#allocation89_spill] sm:$0xff] }
 0x1a9   : > { %v1169_v15 = vmul.f32 %v1105_v33, %v7138_v38  ;;  %v1097_v38 = vadd.f32 0.5, %v1033_v51  ;;  %v1996_v11 = vadd.f32 0.5, %v1932_v60  ;;  %v1096_v36 = vadd.f32 0.5, %v1032_v62  ;;  %v9227_v51 = vld [vmem:[#allocation44_spill] sm:$0xff]  ;;  %v9228_v62 = vld [vmem:[#allocation46_spill] sm:$0xff]  ;;  %v9234_v2 = vld [vmem:[#allocation105_spill] sm:$0xff] }
 0x1aa   : > { %v2067_v32 = vmul.f32 %v2003_v42, %v7149_v3  ;;  %v9223_v3 = vld [vmem:[#allocation6_spill] sm:$0xff]  ;;  %v1995_v21 = vadd.f32 0.5, %v1931_v52  ;;  %v1164_v23 = vmul.f32 %v1100_v47, %v9224_v41  ;;  %v2063_v59 = vmul.f32 %v1999_v7, %v9225_v4  ;;  %v9231_v47 = vld [vmem:[#allocation43_spill] sm:$0xff] }
 0x1ab   : > { %2178 = vmatprep.subr.mxu1 %v1169_v15  ;;  %v2064_v33 = vmul.f32 %v2000_v44, %v9223_v3  ;;  %v1095_v24 = vadd.f32 0.5, %v1031_v9  ;;  %v1994_v53 = vadd.f32 0.5, %v1930_v61  ;;  %v1163_v16 = vmul.f32 %v1099_v50, %v9226_v19  ;;  %v9230_v9 = vld [vmem:[#allocation22_spill] sm:$0xff]  ;;  %v9233_v50 = vld [vmem:[#allocation88_spill] sm:$0xff] }
 0x1ac   : > { %2104 = vmatprep.subr.mxu0 %v2067_v32  ;;  %2179 = vmatpush2.msra.mxu1 %v1168_v10  ;;  %v2062_v60 = vmul.f32 %v1998_v29, %v9227_v51  ;;  %v1094_v37 = vadd.f32 0.5, %v7289_v56  ;;  %v1993_v63 = vadd.f32 0.5, %v7296_v34  ;;  %v1162_v52 = vmul.f32 %v1098_v28, %v9228_v62  ;;  %v9232_v10 = vld [vmem:[#allocation48_spill] sm:$0xff]  ;;  %v9249_v62 = vld [vmem:[#allocation57_spill] sm:$0xff] }
 0x1ad   : > { %2105 = vmatpush2.msra.mxu0 %v2066_v17  ;;  %2180 = vmatprep.subr.mxu1 %v1167_v27  ;;  %v2061_v42 = vmul.f32 %v1997_v49, %v9229_v48  ;;  %v1093_v44 = vadd.f32 0.5, %v7283_v31  ;;  %v1992_v61 = vadd.f32 0.5, %v7292_v46  ;;  %v1161_v15 = vmul.f32 %v1097_v38, %v9230_v9  ;;  %v9235_v17 = vld [vmem:[#allocation102_spill] sm:$0xff]  ;;  %v9236_v49 = vld [vmem:[#allocation27_spill] sm:$0xff]  ;;  %v9250_v48 = vld [vmem:[#allocation8_spill] sm:$0xff] }
 0x1ae   : > { %2106 = vmatprep.subr.mxu0 %v2065_v26  ;;  %2181 = vmatpush2.msra.mxu1 %v1166_v39  ;;  %v2060_v7 = vmul.f32 %v1996_v11, %v9231_v47  ;;  %v1092_v56 = vadd.f32 0.5, %v7277_v55  ;;  %v1991_v34 = vadd.f32 0.5, %v7286_v22  ;;  %v1160_v32 = vmul.f32 %v1096_v36, %v9232_v10  ;;  %v9237_v39 = vld [vmem:[#allocation85_spill] sm:$0xff]  ;;  %v9238_v26 = vld [vmem:[#allocation104_spill] sm:$0xff]  ;;  %v9239_v11 = vld [vmem:[#allocation50_spill] sm:$0xff] }
 0x1af   : > { %2107 = vmatpush2.msra.mxu0 %v2064_v33  ;;  %2182 = vmatprep.subr.mxu1 %v1165_v58  ;;  %v2059_v29 = vmul.f32 %v1995_v21, %v9233_v50  ;;  %v1091_v31 = vadd.f32 0.5, %v7271_v18  ;;  %v1990_v46 = vadd.f32 0.5, %v7280_v12  ;;  %v1159_v27 = vmul.f32 %v1095_v24, %v9234_v2  ;;  %v9240_v58 = vld [vmem:[#allocation83_spill] sm:$0xff]  ;;  %v9241_v33 = vld [vmem:[#allocation52_spill] sm:$0xff] }
 0x1b0   : > { %2108 = vmatprep.subr.mxu0 %v2063_v59  ;;  %2183 = vmatpush2.msra.mxu1 %v1164_v23  ;;  %v2058_v28 = vmul.f32 %v1994_v53, %v9235_v17  ;;  %v1090_v55 = vadd.f32 0.5, %v7265_v14  ;;  %v1989_v22 = vadd.f32 0.5, %v7274_v54  ;;  %v1158_v6 = vmul.f32 %v1094_v37, %v9236_v49  ;;  %v9242_v21 = vld [vmem:[#allocation51_spill] sm:$0xff]  ;;  %v9243_v23 = vld [vmem:[#allocation49_spill] sm:$0xff]  ;;  %v9245_v53 = vld [vmem:[#allocation54_spill] sm:$0xff] }
 0x1b1   : > { %2109 = vmatpush2.msra.mxu0 %v2062_v60  ;;  %2184 = vmatprep.subr.mxu1 %v1163_v16  ;;  %v2057_v30 = vmul.f32 %v1993_v63, %v9237_v39  ;;  %v1089_v18 = vadd.f32 0.5, %v7259_v8  ;;  %v1988_v12 = vadd.f32 0.5, %v7268_v40  ;;  %v1157_v38 = vmul.f32 %v1093_v44, %v9238_v26  ;;  %v9244_v59 = vld [vmem:[#allocation23_spill] sm:$0xff]  ;;  %v9246_v16 = vld [vmem:[#allocation53_spill] sm:$0xff]  ;;  %v9247_v60 = vld [vmem:[#allocation28_spill] sm:$0xff] }
 0x1b2   : > { %2110 = vmatprep.subr.mxu0 %v2061_v42  ;;  %2185 = vmatpush2.msra.mxu1 %v1162_v52  ;;  %v2056_v57 = vmul.f32 %v1992_v61, %v9239_v11  ;;  %v1088_v14 = vadd.f32 0.5, %v7253_v1  ;;  %v1987_v54 = vadd.f32 0.5, %v7262_v43  ;;  %v1156_v3 = vmul.f32 %v1092_v56, %v9240_v58  ;;  %v9248_v63 = vld [vmem:[#allocation31_spill] sm:$0xff]  ;;  %v9251_v44 = vld [vmem:[#allocation32_spill] sm:$0xff]  ;;  %v9252_v61 = vld [vmem:[#allocation101_spill] sm:$0xff] }
 0x1b3   : > { %2111 = vmatpush2.msra.mxu0 %v2060_v7  ;;  %2186 = vmatprep.subr.mxu1 %v1161_v15  ;;  %v2055_v36 = vmul.f32 %v1991_v34, %v9241_v33  ;;  %v1087_v8 = vadd.f32 0.5, %v7247_v5  ;;  %v1986_v40 = vadd.f32 0.5, %v7256_v13  ;;  %v1155_v41 = vmul.f32 %v1091_v31, %v9242_v21  ;;  %v9253_v9 = vld [vmem:[#allocation79_spill] sm:$0xff]  ;;  %v9254_v47 = vld [vmem:[#allocation80_spill] sm:$0xff] }
 0x1b4   : > { %2112 = vmatprep.subr.mxu0 %v2059_v29  ;;  %2187 = vmatpush2.msra.mxu1 %v1160_v32  ;;  %v2054_v4 = vmul.f32 %v1990_v46, %v9243_v23  ;;  %v1086_v1 = vadd.f32 0.5, %v7241_v45  ;;  %v1985_v43 = vadd.f32 0.5, %v7250_v35  ;;  %v1154_v24 = vmul.f32 %v1090_v55, %v9244_v59  ;;  %v9255_v56 = vld [vmem:[#allocation20_spill] sm:$0xff]  ;;  %v9256_v34 = vld [vmem:[#allocation39_spill] sm:$0xff]  ;;  %v9259_v46 = vld [vmem:[#allocation33_spill] sm:$0xff] }
 0x1b5   : > { %2113 = vmatpush2.msra.mxu0 %v2058_v28  ;;  %2188 = vmatprep.subr.mxu1 %v1159_v27  ;;  %v2053_v19 = vmul.f32 %v1989_v22, %v9245_v53  ;;  %v1085_v5 = vadd.f32 0.5, %v7235_v20  ;;  %v1984_v13 = vadd.f32 0.5, %v7244_v25  ;;  %v1153_v51 = vmul.f32 %v1089_v18, %v9246_v16  ;;  %v9257_v32 = vld [vmem:[#allocation56_spill] sm:$0xff]  ;;  %v9258_v29 = vld [vmem:[#allocation55_spill] sm:$0xff]  ;;  %v9260_v27 = vld [vmem:[#allocation98_spill] sm:$0xff] }
 0x1b6   : > { %2114 = vmatprep.subr.mxu0 %v2057_v30  ;;  %2189 = vmatpush2.msra.mxu1 %v1158_v6  ;;  %v2052_v37 = vmul.f32 %v1988_v12, %v9247_v60  ;;  %v1084_v45 = vadd.f32 0.5, %v7229_v0  ;;  %v1983_v35 = vadd.f32 0.5, %v9248_v63  ;;  %v1152_v52 = vmul.f32 %v1088_v14, %v9249_v62  ;;  %v9261_v28 = vld [vmem:[#allocation74_spill] sm:$0xff]  ;;  %v9262_v22 = vld [vmem:[#allocation60_spill] sm:$0xff]  ;;  %v9265_v12 = vld [vmem:[#allocation107_spill] sm:$0xff] }
 0x1b7   : > { %2115 = vmatpush2.msra.mxu0 %v2056_v57  ;;  %2190 = vmatprep.subr.mxu1 %v1157_v38  ;;  %v2051_v42 = vmul.f32 %v1987_v54, %v9250_v48  ;;  %v1083_v20 = vadd.f32 0.5, %v9251_v44  ;;  %v1982_v25 = vadd.f32 0.5, %v9252_v61  ;;  %v1151_v15 = vmul.f32 %v1087_v8, %v9253_v9  ;;  %v9263_v6 = vld [vmem:[#allocation94_spill] sm:$0xff]  ;;  %v9264_v30 = vld [vmem:[#allocation40_spill] sm:$0xff]  ;;  %v9267_v57 = vld [vmem:[#allocation37_spill] sm:$0xff] }
 0x1b8   : > { %2116 = vmatprep.subr.mxu0 %v2055_v36  ;;  %2191 = vmatpush2.msra.mxu1 %v1156_v3  ;;  %v2050_v7 = vmul.f32 %v1986_v40, %v9254_v47  ;;  %v1082_v0 = vadd.f32 0.5, %v9255_v56  ;;  %v1981_v10 = vadd.f32 0.5, %v9256_v34  ;;  %v1150_v50 = vmul.f32 %v1086_v1, %v9257_v32  ;;  %v9266_v38 = vld [vmem:[#allocation106_spill] sm:$0xff]  ;;  %v9268_v54 = vld [vmem:[#allocation87_spill] sm:$0xff]  ;;  %v9269_v3 = vld [vmem:[#allocation24_spill] sm:$0xff] }
 0x1b9   : > { %2117 = vmatpush2.msra.mxu0 %v2054_v4  ;;  %2192 = vmatprep.subr.mxu1 %v1155_v41  ;;  %v2049_v31 = vmul.f32 %v1985_v43, %v9258_v29  ;;  %v1081_v2 = vadd.f32 0.5, %v9259_v46  ;;  %v1980_v17 = vadd.f32 0.5, %v9260_v27  ;;  %v1149_v55 = vmul.f32 %v1085_v5, %v9261_v28  ;;  %v9270_v36 = vld [vmem:[#allocation63_spill] sm:$0xff]  ;;  %v9272_v41 = vld [vmem:[#allocation90_spill] sm:$0xff]  ;;  %v9273_v4 = vld [vmem:[#allocation69_spill] sm:$0xff] }
 0x1ba   : > { %2118 = vmatprep.subr.mxu0 %v2053_v19  ;;  %2193 = vmatpush2.msra.mxu1 %v1154_v24  ;;  %v2048_v49 = vmul.f32 %v1984_v13, %v9262_v22  ;;  %v1080_v39 = vadd.f32 0.5, %v9263_v6  ;;  %v1979_v18 = vadd.f32 0.5, %v9264_v30  ;;  %v1148_v26 = vmul.f32 %v1084_v45, %v9265_v12  ;;  %v9271_v40 = vld [vmem:[#allocation35_spill] sm:$0xff]  ;;  %v9275_v24 = vld [vmem:[#allocation96_spill] sm:$0xff]  ;;  %v9276_v19 = vld [vmem:[#allocation86_spill] sm:$0xff] }
 0x1bb   : > { %2119 = vmatpush2.msra.mxu0 %v2052_v37  ;;  %2194 = vmatprep.subr.mxu1 %v1153_v51  ;;  %v2047_v11 = vmul.f32 %v1983_v35, %v9266_v38  ;;  %v1079_v14 = vadd.f32 0.5, %v9267_v57  ;;  %v1978_v58 = vadd.f32 0.5, %v9268_v54  ;;  %v1147_v33 = vmul.f32 %v1083_v20, %v9269_v3  ;;  %v9274_v43 = vld [vmem:[#allocation71_spill] sm:$0xff]  ;;  %v9277_v13 = vld [vmem:[#allocation64_spill] sm:$0xff]  ;;  %v9278_v51 = vld [vmem:[#allocation65_spill] sm:$0xff] }
 0x1bc   : > { %2120 = vmatprep.subr.mxu0 %v2051_v42  ;;  %2195 = vmatpush2.msra.mxu1 %v1152_v52  ;;  %v2046_v8 = vmul.f32 %v1982_v25, %v9270_v36  ;;  %v1078_v21 = vadd.f32 0.5, %v9271_v40  ;;  %v1977_v23 = vadd.f32 0.5, %v9272_v41  ;;  %v1146_v1 = vmul.f32 %v1082_v0, %v9273_v4  ;;  %v9279_v37 = vld [vmem:[#allocation34_spill] sm:$0xff]  ;;  %v9280_v63 = vld [vmem:[#allocation36_spill] sm:$0xff]  ;;  %v9281_v62 = vld [vmem:[#allocation67_spill] sm:$0xff] }
 0x1bd   : > { %2121 = vmatpush2.msra.mxu0 %v2050_v7  ;;  %2196 = vmatprep.subr.mxu1 %v1151_v15  ;;  %v2045_v59 = vmul.f32 %v1981_v10, %v9274_v43  ;;  %v1077_v53 = vadd.f32 0.5, %v9275_v24  ;;  %v1976_v5 = vadd.f32 0.5, %v9276_v19  ;;  %v1145_v16 = vmul.f32 %v1081_v2, %v9277_v13  ;;  %v9282_v48 = vld [vmem:[#allocation68_spill] sm:$0xff]  ;;  %v9284_v61 = vld [vmem:[#allocation38_spill] sm:$0xff]  ;;  %v9285_v9 = vld [vmem:[#allocation77_spill] sm:$0xff] }
 0x1be   : > { %2122 = vmatprep.subr.mxu0 %v2049_v31  ;;  %2197 = vmatpush2.msra.mxu1 %v1150_v50  ;;  %v2044_v60 = vmul.f32 %v1980_v17, %v9278_v51  ;;  %v1076_v45 = vadd.f32 0.5, %v9279_v37  ;;  %v1975_v35 = vadd.f32 0.5, %v9280_v63  ;;  %v1144_v52 = vmul.f32 %v1080_v39, %v9281_v62  ;;  %v9283_v44 = vld [vmem:[#allocation92_spill] sm:$0xff]  ;;  %v9286_v47 = vld [vmem:[#allocation73_spill] sm:$0xff]  ;;  %v9289_v32 = vld [vmem:[#allocation7_spill] sm:$0xff] }
 0x1bf   : > { %2123 = vmatpush2.msra.mxu0 %v2048_v49  ;;  %2198 = vmatprep.subr.mxu1 %v1149_v55  ;;  %v2043_v42 = vmul.f32 %v1979_v18, %v9282_v48  ;;  %v1075_v20 = vadd.f32 0.5, %v9283_v44  ;;  %v1974_v25 = vadd.f32 0.5, %v9284_v61  ;;  %v1143_v15 = vmul.f32 %v1079_v14, %v9285_v9  ;;  %v9287_v56 = vld [vmem:[#allocation25_spill] sm:$0xff]  ;;  %v9288_v34 = vld [vmem:[#allocation4_spill] sm:$0xff]  ;;  %v9292_v27 = vld [vmem:[#allocation70_spill] sm:$0xff] }
 0x1c0   : > { %2124 = vmatprep.subr.mxu0 %v2047_v11  ;;  %2199 = vmatpush2.msra.mxu1 %v1148_v26  ;;  %v2042_v7 = vmul.f32 %v1978_v58, %v9286_v47  ;;  %v1074_v0 = vadd.f32 0.5, %v9287_v56  ;;  %v1973_v10 = vadd.f32 0.5, %v9288_v34  ;;  %v1142_v50 = vmul.f32 %v1078_v21, %v9289_v32  ;;  %v9290_v29 = vld [vmem:[#allocation61_spill] sm:$0xff]  ;;  %v9293_v28 = vld [vmem:[#allocation58_spill] sm:$0xff]  ;;  %v9294_v22 = vld [vmem:[#allocation75_spill] sm:$0xff] }
 0x1c1   : > { %2125 = vmatpush2.msra.mxu0 %v2046_v8  ;;  %2200 = vmatprep.subr.mxu1 %v1147_v33  ;;  %v2041_v31 = vmul.f32 %v1977_v23, %v9290_v29  ;;  %v9291_v46 = vld [vmem:[#allocation41_spill] sm:$0xff]  ;;  %v1141_v17 = vmul.f32 %v1077_v53, %v9292_v27  ;;  %v2040_v55 = vmul.f32 %v1976_v5, %v9293_v28  ;;  %v9295_v6 = vld [vmem:[#allocation82_spill] sm:$0xff]  ;;  %v9299_v57 = vld [vmem:[#allocation84_spill] sm:$0xff]  ;;  %v9304_v40 = vmov 0.0  }
 0x1c2   : > { %2126 = vmatprep.subr.mxu0 %v2045_v59  ;;  %2201 = vmatpush2.msra.mxu1 %v1146_v1  ;;  %v1972_v2 = vadd.f32 0.5, %v9291_v46  ;;  %v1140_v49 = vmul.f32 %v1076_v45, %v9294_v22  ;;  %v2039_v39 = vmul.f32 %v1975_v35, %v9295_v6  ;;  %v9296_v30 = vld [vmem:[#allocation78_spill] sm:$0xff]  ;;  %v9297_v12 = vld [vmem:[#allocation5_spill] sm:$0xff]  ;;  %v2037_v14 = vmul.f32 %v1973_v10, %v9299_v57  ;;  %v9300_v54 = vld [vmem:[#allocation3_spill] sm:$0xff] }
 0x1c3   : > { %2127 = vmatpush2.msra.mxu0 %v2044_v60  ;;  %2202 = vmatprep.subr.mxu1 %v1145_v16  ;;  %v1139_v18 = vmul.f32 %v1075_v20, %v9296_v30  ;;  %v2038_v26 = vmul.f32 %v1974_v25, %v9297_v12  ;;  %v9298_v38 = vld [vmem:[#allocation81_spill] sm:$0xff]  ;;  %v9302_v33 = vld [vmem:[#allocation62_spill] sm:$0xff]  ;;  %v2218_v41 = vld [vmem:[%s8697_s1 + $0x208] sm:$0xff]  ;;  %v2354_v30 = vpop.permute.xlu1 %2353 }
 0x1c4   : > { %2128 = vmatprep.subr.mxu0 %v2043_v42  ;;  %2203 = vmatpush2.msra.mxu1 %v1144_v52  ;;  %v1138_v11 = vmul.f32 %v1074_v0, %v9298_v38  ;;  %v2036_v58 = vmul.f32 %v1972_v2, %v9300_v54  ;;  %v9301_v3 = vld [vmem:[#allocation21_spill] sm:$0xff]  ;;  %v9303_v36 = vld [vmem:[#allocation2_spill] sm:$0xff]  ;;  %v2219_v23 = vld [vmem:[%s8697_s1 + $0x210] sm:$0xff] }
 0x1c5   : > { %2129 = vmatpush2.msra.mxu0 %v2042_v7  ;;  %2204 = vmatprep.subr.mxu1 %v1143_v15  ;;  %v4959_v8 = vld [vmem:[%s5059_s8] sm:$0xff]  ;;  %v2220_v4 = vld [vmem:[%s8697_s1 + $0x218] sm:$0xff]  ;;  %v2222_v43 = vld [vmem:[%s8697_s1 + $0x228] sm:$0xff] }
 0x1c6   : > { %2130 = vmatprep.subr.mxu0 %v2041_v31  ;;  %2205 = vmatpush2.msra.mxu1 %v1142_v50  ;;  %v2217_v21 = vld [vmem:[%s8697_s1 + $0x200] sm:$0xff]  ;;  %v2223_v59 = vld [vmem:[%s8697_s1 + $0x230] sm:$0xff]  ;;  %v2224_v24 = vld [vmem:[%s8697_s1 + $0x238] sm:$0xff] }
 0x1c7   : > { %2131 = vmatpush2.msra.mxu0 %v2040_v55  ;;  %2206 = vmatprep.subr.mxu1 %v1141_v17  ;;  %v2221_v1 = vld [vmem:[%s8697_s1 + $0x220] sm:$0xff]  ;;  %v2226_v19 = vld [vmem:[%s8697_s1 + $0x248] sm:$0xff]  ;;  %v2227_v5 = vld [vmem:[%s8697_s1 + $0x250] sm:$0xff] }
 0x1c8   : > { %2132 = vmatprep.subr.mxu0 %v2039_v39  ;;  %2207 = vmatpush2.msra.mxu1 %v1140_v49  ;;  %v2225_v53 = vld [vmem:[%s8697_s1 + $0x240] sm:$0xff]  ;;  %v2228_v13 = vld [vmem:[%s8697_s1 + $0x258] sm:$0xff]  ;;  %v2230_v51 = vld [vmem:[%s8697_s1 + $0x268] sm:$0xff] }
 0x1c9   : > { %2133 = vmatpush2.msra.mxu0 %v2038_v26  ;;  %2208 = vmatprep.subr.mxu1 %v1139_v18  ;;  %v2229_v16 = vld [vmem:[%s8697_s1 + $0x260] sm:$0xff]  ;;  %v2231_v60 = vld [vmem:[%s8697_s1 + $0x270] sm:$0xff]  ;;  %v2232_v37 = vld [vmem:[%s8697_s1 + $0x278] sm:$0xff]  ;;  %v2359_v26 = vpop.permute.xlu0 %2358 }
 0x1ca   : > { %2134 = vmatprep.subr.mxu0 %v2037_v14  ;;  %2209 = vmatpush2.msra.mxu1 %v1138_v11  ;;  %v2233_v45 = vld [vmem:[%s8697_s1 + $0x280] sm:$0xff]  ;;  %v2234_v63 = vld [vmem:[%s8697_s1 + $0x288] sm:$0xff]  ;;  %v2235_v35 = vld [vmem:[%s8697_s1 + $0x290] sm:$0xff]  ;;  %v2344_v11 = vpop.permute.xlu1 %2343 }
 0x1cb   : > { %2135 = vmatpush2.msra.mxu0 %v2036_v58  ;;  %2211 = vmatmul.mubr.f32.vlgmr.msra.gmra.mxu1 %v9301_v3  ;;  %v2236_v62 = vld [vmem:[%s8697_s1 + $0x298] sm:$0xff]  ;;  %v2237_v52 = vld [vmem:[%s8697_s1 + $0x2a0] sm:$0xff]  ;;  %v2238_v48 = vld [vmem:[%s8697_s1 + $0x2a8] sm:$0xff] }
 0x1cc   : > { %2137 = vmatmul.mubr.f32.vlgmr.msra.gmra.mxu0 %v9302_v33  ;;  %4342 = vmatprep.subr.msk.mxu0 %vm588_vm0, %v9303_v36  ;;  %v2239_v42 = vld [vmem:[%s8697_s1 + $0x2b0] sm:$0xff]  ;;  %v2240_v44 = vld [vmem:[%s8697_s1 + $0x2b8] sm:$0xff]  ;;  %v2241_v20 = vld [vmem:[%s8697_s1 + $0x2c0] sm:$0xff] }
 0x1cd   : > { %4343 = vmatpush1.msk.msra.mxu0 %vm588_vm0, %v4959_v8  ;;  %2601 = vmatprep.mubr.f32.mxu0 %v9304_v40  ;;  %v2242_v61 = vld [vmem:[%s8697_s1 + $0x2c8] sm:$0xff]  ;;  %v2243_v25 = vld [vmem:[%s8697_s1 + $0x2d0] sm:$0xff]  ;;  %v2244_v9 = vld [vmem:[%s8697_s1 + $0x2d8] sm:$0xff]  ;;  %v2349_v54 = vpop.permute.xlu0 %2348 }
 0x1ce   : > { %v2245_v15 = vld [vmem:[%s8697_s1 + $0x2e0] sm:$0xff]  ;;  %v2246_v47 = vld [vmem:[%s8697_s1 + $0x2e8] sm:$0xff]  ;;  %v2247_v7 = vld [vmem:[%s8697_s1 + $0x2f0] sm:$0xff]  ;;  %v2334_v3 = vpop.permute.xlu1 %2333 }
 0x1cf   : > { %v2248_v56 = vld [vmem:[%s8697_s1 + $0x2f8] sm:$0xff] }
 0x1d0   : > { %4344 = vmatmul.mubr.msk.f32.vlgmr.msra.gmra.mxu0 %vm491_vm1, %v2217_v21 }
 0x1d1   : > { %2607 = vmatprep.mubr.f32.mxu0 %v9304_v40  ;;  %v2339_v21 = vpop.permute.xlu0 %2338 }
 0x1d4   : > { %4345 = vmatmul.mubr.msk.f32.gmra.mxu0 %vm491_vm1, %v2218_v41 }
 0x1d5   : > { %2613 = vmatprep.mubr.f32.mxu0 %v9304_v40 }
 0x1d8   : > { %4346 = vmatmul.mubr.msk.f32.gmra.mxu0 %vm491_vm1, %v2219_v23  ;;  %v2324_v23 = vpop.permute.xlu1 %2323 }
 0x1d9   : > { %2619 = vmatprep.mubr.f32.mxu0 %v9304_v40 }
 0x1dc   : > { %4347 = vmatmul.mubr.msk.f32.gmra.mxu0 %vm491_vm1, %v2220_v4 }
 0x1dd   : > { %2625 = vmatprep.mubr.f32.mxu0 %v9304_v40 }
 0x1e0   : > { %4348 = vmatmul.mubr.msk.f32.gmra.mxu0 %vm491_vm1, %v2221_v1 }
 0x1e1   : > { %2631 = vmatprep.mubr.f32.mxu0 %v9304_v40 }
 0x1e4   : > { %4349 = vmatmul.mubr.msk.f32.gmra.mxu0 %vm491_vm1, %v2222_v43  ;;  %v2329_v43 = vpop.permute.xlu0 %2328 }
 0x1e5   : > { %2637 = vmatprep.mubr.f32.mxu0 %v9304_v40 }
 0x1e8   : > { %4350 = vmatmul.mubr.msk.f32.gmra.mxu0 %vm491_vm1, %v2223_v59 }
 0x1e9   : > { %2643 = vmatprep.mubr.f32.mxu0 %v9304_v40 }
 0x1ec   : > { %4351 = vmatmul.mubr.msk.f32.gmra.mxu0 %vm491_vm1, %v2224_v24  ;;  %v7616_v24 = vpop.permute.xlu1 %2313 }
 0x1ed   : > { %2649 = vmatprep.mubr.f32.mxu0 %v9304_v40 }
 0x1f0   : > { %4352 = vmatmul.mubr.msk.f32.gmra.mxu0 %vm491_vm1, %v2225_v53 }
 0x1f1   : > { %2655 = vmatprep.mubr.f32.mxu0 %v9304_v40 }
 0x1f4   : > { %4353 = vmatmul.mubr.msk.f32.gmra.mxu0 %vm491_vm1, %v2226_v19 }
 0x1f5   : > { %2661 = vmatprep.mubr.f32.mxu0 %v9304_v40 }
 0x1f8   : > { %4354 = vmatmul.mubr.msk.f32.gmra.mxu0 %vm491_vm1, %v2227_v5  ;;  %v3114_v5 = vld [vmem:[%s8699_s3 + $0x10] sm:$0xff] }
 0x1f9   : > { %2667 = vmatprep.mubr.f32.mxu0 %v9304_v40 }
 0x1fc   : > { %4355 = vmatmul.mubr.msk.f32.gmra.mxu0 %vm491_vm1, %v2228_v13  ;;  %v2319_v13 = vpop.permute.xlu0 %2318 }
 0x1fd   : > { %2673 = vmatprep.mubr.f32.mxu0 %v9304_v40 }
 0x200   : > { %4356 = vmatmul.mubr.msk.f32.gmra.mxu0 %vm491_vm1, %v2229_v16 }
 0x201   : > { %2679 = vmatprep.mubr.f32.mxu0 %v9304_v40 }
 0x204   : > { %4357 = vmatmul.mubr.msk.f32.gmra.mxu0 %vm491_vm1, %v2230_v51 }
 0x205   : > { %2685 = vmatprep.mubr.f32.mxu0 %v9304_v40 }
 0x208   : > { %4358 = vmatmul.mubr.msk.f32.gmra.mxu0 %vm491_vm1, %v2231_v60  ;;  %v3116_v60 = vcombine.high %v3114_v5, %v3114_v5 }
 0x209   : > { %2691 = vmatprep.mubr.f32.mxu0 %v9304_v40 }
 0x20a   : > { %3182 = vmatprep.mubr.f32.mxu1 %v3116_v60 }
 0x20c   : > { %4359 = vmatmul.mubr.msk.f32.gmra.mxu0 %vm491_vm1, %v2232_v37  ;;  %v7623_v37 = vpop.permute.xlu1 %2303 }
 0x20d   : > { %2697 = vmatprep.mubr.f32.mxu0 %v9304_v40 }
 0x210   : > { %4360 = vmatmul.mubr.msk.f32.gmra.mxu0 %vm491_vm1, %v2233_v45 }
 0x211   : > { %2703 = vmatprep.mubr.f32.mxu0 %v9304_v40 }
 0x214   : > { %4361 = vmatmul.mubr.msk.f32.gmra.mxu0 %vm491_vm1, %v2234_v63 }
 0x215   : > { %2709 = vmatprep.mubr.f32.mxu0 %v9304_v40 }
 0x218   : > { %4362 = vmatmul.mubr.msk.f32.gmra.mxu0 %vm491_vm1, %v2235_v35 }
 0x219   : > { %2715 = vmatprep.mubr.f32.mxu0 %v9304_v40 }
 0x21c   : > { %4363 = vmatmul.mubr.msk.f32.gmra.mxu0 %vm491_vm1, %v2236_v62 }
 0x21d   : > { %2721 = vmatprep.mubr.f32.mxu0 %v9304_v40 }
 0x220   : > { %4364 = vmatmul.mubr.msk.f32.gmra.mxu0 %vm491_vm1, %v2237_v52 }
 0x221   : > { %2727 = vmatprep.mubr.f32.mxu0 %v9304_v40 }
 0x224   : > { %4365 = vmatmul.mubr.msk.f32.gmra.mxu0 %vm491_vm1, %v2238_v48  ;;  %v7630_v48 = vpop.permute.xlu0 %2308 }
 0x225   : > { %2733 = vmatprep.mubr.f32.mxu0 %v9304_v40 }
 0x228   : > { %4366 = vmatmul.mubr.msk.f32.gmra.mxu0 %vm491_vm1, %v2239_v42 }
 0x229   : > { %2739 = vmatprep.mubr.f32.mxu0 %v9304_v40 }
 0x22c   : > { %4367 = vmatmul.mubr.msk.f32.gmra.mxu0 %vm491_vm1, %v2240_v44 }
 0x22d   : > { %2745 = vmatprep.mubr.f32.mxu0 %v9304_v40 }
 0x230   : > { %4368 = vmatmul.mubr.msk.f32.gmra.mxu0 %vm491_vm1, %v2241_v20 }
 0x231   : > { %2751 = vmatprep.mubr.f32.mxu0 %v9304_v40 }
 0x234   : > { %4369 = vmatmul.mubr.msk.f32.gmra.mxu0 %vm491_vm1, %v2242_v61 }
 0x235   : > { %2757 = vmatprep.mubr.f32.mxu0 %v9304_v40 }
 0x238   : > { %4370 = vmatmul.mubr.msk.f32.gmra.mxu0 %vm491_vm1, %v2243_v25 }
 0x239   : > { %2763 = vmatprep.mubr.f32.mxu0 %v9304_v40 }
 0x23c   : > { %4371 = vmatmul.mubr.msk.f32.gmra.mxu0 %vm491_vm1, %v2244_v9 }
 0x23d   : > { %2769 = vmatprep.mubr.f32.mxu0 %v9304_v40 }
 0x240   : > { %4372 = vmatmul.mubr.msk.f32.gmra.mxu0 %vm491_vm1, %v2245_v15  ;;  %v7641_v15 = vpop.permute.xlu1 %2293 }
 0x241   : > { %2775 = vmatprep.mubr.f32.mxu0 %v9304_v40 }
 0x244   : > { %4373 = vmatmul.mubr.msk.f32.gmra.mxu0 %vm491_vm1, %v2246_v47 }
 0x245   : > { %2781 = vmatprep.mubr.f32.mxu0 %v9304_v40 }
 0x248   : > { %4374 = vmatmul.mubr.msk.f32.gmra.mxu0 %vm491_vm1, %v2247_v7 }
 0x249   : > { %2787 = vmatprep.mubr.f32.mxu0 %v9304_v40 }
 0x24c   : > { %4375 = vmatmul.mubr.msk.f32.gmra.mxu0 %vm491_vm1, %v2248_v56 }
 0x28b   : > { %v2212_v0 = vpop.f32.mrf.mxu1 }
 0x28c   : > { %v2138_v34 = vpop.f32.mrf.mxu0 }
 0x28d   : > { %v7578_v10 = vadd.f32 %v2212_v0, %v2138_v34 }
 0x28e   : > { %v7580_v32 = vpop.f32.mrf.mxu0 }
 0x28f   : > { %9305 = vst [vmem:[#allocation29_spill] sm:$0xff] %v7578_v10  ;;  %9306 = vst [vmem:[#allocation66_spill] sm:$0xff] %v7580_v32 }
 0x290   : > { %v7582_v50 = vpop.f32.mrf.mxu0 }
 0x292   : > { %v7584_v29 = vpop.f32.mrf.mxu0 }
 0x294   : > { %v7586_v31 = vpop.f32.mrf.mxu0 }
 0x296   : > { %v7588_v46 = vpop.f32.mrf.mxu0 }
 0x298   : > { %v7590_v2 = vpop.f32.mrf.mxu0 }
 0x299   : > { %v7768_v32 = vadd.f32 %v7590_v2, %v7641_v15 }
 0x29a   : > { %v7592_v27 = vpop.f32.mrf.mxu0 }
 0x29c   : > { %v7594_v17 = vpop.f32.mrf.mxu0 }
 0x29e   : > { %v7596_v28 = vpop.f32.mrf.mxu0 }
 0x2a0   : > { %v7598_v55 = vpop.f32.mrf.mxu0 }
 0x2a2   : > { %v7600_v22 = vpop.f32.mrf.mxu0 }
 0x2a4   : > { %v7602_v49 = vpop.f32.mrf.mxu0 }
 0x2a6   : > { %v7604_v6 = vpop.f32.mrf.mxu0 }
 0x2a8   : > { %v7606_v39 = vpop.f32.mrf.mxu0 }
 0x2aa   : > { %v7608_v18 = vpop.f32.mrf.mxu0 }
 0x2ac   : > { %v7610_v12 = vpop.f32.mrf.mxu0 }
 0x2ae   : > { %v7612_v38 = vpop.f32.mrf.mxu0 }
 0x2b0   : > { %v7614_v57 = vpop.f32.mrf.mxu0 }
 0x2b2   : > { %v2653_v14 = vpop.f32.mrf.mxu0 }
 0x2b4   : > { %v2657_v58 = vpop.f32.mrf.mxu0 }
 0x2b6   : > { %v2659_v33 = vpop.f32.mrf.mxu0 }
 0x2b8   : > { %v2663_v8 = vpop.f32.mrf.mxu0 }
 0x2ba   : > { %v2665_v41 = vpop.f32.mrf.mxu0 }
 0x2bc   : > { %v2669_v4 = vpop.f32.mrf.mxu0 }
 0x2bd   : > { %v7647_v34 = vadd.f32 %v2669_v4, %v2339_v21 }
 0x2be   : > { %v2671_v1 = vpop.f32.mrf.mxu0 }
 0x2bf   : > { %v7643_v47 = vadd.f32 %v2671_v1, %v2339_v21  ;;  %v7662_v21 = vadd.f32 %v2659_v33, %v2329_v43  ;;  %v2816_v60 = vmul.f32 0.5, %v7647_v34 }
 0x2c0   : > { %v2675_v59 = vpop.f32.mrf.mxu0 }
 0x2c1   : > { %v7637_v25 = vadd.f32 %v2675_v59, %v2344_v11  ;;  %v2817_v4 = vmul.f32 0.5, %v7643_v47 }
 0x2c2   : > { %v2677_v53 = vpop.f32.mrf.mxu0 }
 0x2c3   : > { %v7621_v16 = vadd.f32 %v2677_v53, %v2344_v11  ;;  %v7657_v53 = vpop.permute.xlu0 %2298  ;;  %v2818_v5 = vmul.f32 0.5, %v7637_v25 }
 0x2c4   : > { %v2681_v19 = vpop.f32.mrf.mxu0 }
 0x2c5   : > { %v2819_v63 = vmul.f32 0.5, %v7621_v16  ;;  %v7632_v42 = vadd.f32 %v2681_v19, %v2349_v54  ;;  %v7659_v19 = vadd.f32 %v2663_v8, %v2334_v3 }
 0x2c6   : > { %v2683_v51 = vpop.f32.mrf.mxu0 }
 0x2c7   : > { %v7626_v35 = vadd.f32 %v2683_v51, %v2349_v54  ;;  %4703 = vtanh.f32 %v2819_v63  ;;  %v7651_v54 = vadd.f32 %v2665_v41, %v2334_v3  ;;  %v7671_v3 = vadd.f32 %v2653_v14, %v2324_v23 }
 0x2c8   : > { %v2687_v45 = vpop.f32.mrf.mxu0  ;;  %v2813_v14 = vmul.f32 0.5, %v7662_v21 }
 0x2c9   : > { %v7628_v62 = vadd.f32 %v2687_v45, %v2354_v30  ;;  %v2821_v7 = vmul.f32 0.5, %v7626_v35  ;;  %v2284_v45 = vpop.permute.xlu1 %2283  ;;  %v2815_v8 = vmul.f32 0.5, %v7651_v54 }
 0x2ca   : > { %v2689_v52 = vpop.f32.mrf.mxu0  ;;  %v7677_v63 = vadd.f32 %v7582_v50, %v2284_v45  ;;  %v7693_v50 = vadd.f32 %v7610_v12, %v2319_v13  ;;  %v7711_v12 = vadd.f32 %v7606_v39, %v7616_v24  ;;  %v7729_v39 = vadd.f32 %v7602_v49, %v7630_v48 }
 0x2cb   : > { %v2822_v44 = vmul.f32 0.5, %v7628_v62  ;;  %v7635_v20 = vadd.f32 %v2689_v52, %v2354_v30  ;;  %v2820_v30 = vmul.f32 0.5, %v7632_v42  ;;  %v7680_v52 = vadd.f32 %v7614_v57, %v2324_v23 }
 0x2cc   : > { %v2693_v61 = vpop.f32.mrf.mxu0  ;;  %9310 = vst [vmem:[#allocation72_spill] sm:$0xff] %v7677_v63  ;;  %v7744_v49 = vadd.f32 %v7592_v27, %v7641_v15 }
 0x2cd   : > { %v7639_v9 = vadd.f32 %v2693_v61, %v2359_v26  ;;  %v2823_v56 = vmul.f32 0.5, %v7635_v20  ;;  %4705 = vtanh.f32 %v2822_v44  ;;  %v2289_v61 = vpop.permute.xlu0 %2288 }
 0x2ce   : > { %v2695_v0 = vpop.f32.mrf.mxu0  ;;  %v7697_v23 = vadd.f32 %v7586_v31, %v2289_v61  ;;  %v7715_v31 = vadd.f32 %v7588_v46, %v2289_v61  ;;  %v2808_v46 = vmul.f32 0.5, %v7693_v50  ;;  %v7756_v61 = vadd.f32 %v7596_v28, %v7657_v53 }
 0x2cf   : > { %v2824_v11 = vmul.f32 0.5, %v7639_v9  ;;  %4707 = vtanh.f32 %v2823_v56  ;;  %v7653_v59 = vadd.f32 %v2695_v0, %v2359_v26  ;;  %v7668_v26 = vadd.f32 %v2657_v58, %v2329_v43 }
 0x2d0   : > { %v7655_v1 = vpop.f32.mrf.mxu0  ;;  %v2814_v58 = vmul.f32 0.5, %v7659_v19  ;;  %v7684_v43 = vadd.f32 %v7612_v38, %v2319_v13  ;;  %v7701_v38 = vadd.f32 %v7608_v18, %v7616_v24  ;;  %v2811_v56 = vmul.f32 0.5, %v7671_v3 }
 0x2d1   : > { %9307 = vst [vmem:[#allocation109_spill] sm:$0xff] %v7655_v1  ;;  %4709 = vtanh.f32 %v2824_v11  ;;  %v2825_v41 = vmul.f32 0.5, %v7653_v59  ;;  %v2812_v57 = vmul.f32 0.5, %v7668_v26  ;;  %v2810_v13 = vmul.f32 0.5, %v7680_v52 }
 0x2d2   : > { %4711 = vtanh.f32 %v2821_v7  ;;  %v7666_v51 = vpop.f32.mrf.mxu0  ;;  %v7690_v7 = vadd.f32 %v7584_v29, %v2284_v45  ;;  %v7707_v29 = vmul.f32 0.5, %v7677_v63  ;;  %v7719_v18 = vadd.f32 %v7604_v6, %v7630_v48 }
 0x2d3   : > { %9308 = vst [vmem:[#allocation76_spill] sm:$0xff] %v7666_v51  ;;  %4713 = vtanh.f32 %v2820_v30  ;;  %v2809_v30 = vmul.f32 0.5, %v7684_v43  ;;  %v7733_v6 = vmul.f32 0.5, %v7697_v23  ;;  %v7748_v48 = vadd.f32 %v7598_v55, %v7623_v37 }
 0x2d4   : > { %4715 = vtanh.f32 %v2825_v41  ;;  %v7674_v33 = vpop.f32.mrf.mxu0  ;;  %v7737_v41 = vadd.f32 %v7600_v22, %v7623_v37  ;;  %v7752_v22 = vmul.f32 0.5, %v7715_v31  ;;  %v7763_v55 = vadd.f32 %v7594_v17, %v7657_v53 }
 0x2d5   : > { %9309 = vst [vmem:[#allocation110_spill] sm:$0xff] %v7674_v33  ;;  %4717 = vtanh.f32 %v2818_v5  ;;  %v4704_v5 = vpop.eup %4703  ;;  %v2804_v37 = vmul.f32 0.5, %v7729_v39  ;;  %v2802_v17 = vmul.f32 0.5, %v7748_v48 }
 0x2d6   : > { %4719 = vtanh.f32 %v2817_v4  ;;  %v7687_v44 = vpop.f32.mrf.mxu0  ;;  %v7725_v4 = vmul.f32 0.5, %v7690_v7  ;;  %v2803_v28 = vmul.f32 0.5, %v7737_v41 }
 0x2d7   : > { %9311 = vst [vmem:[#allocation19_spill] sm:$0xff] %v7687_v44  ;;  %4721 = vtanh.f32 %v2816_v60  ;;  %v2807_v60 = vmul.f32 0.5, %v7701_v38  ;;  %v2947_v44 = vmul.f32 0.5, %v4704_v5 }
 0x2d8   : > { %4723 = vtanh.f32 %v2815_v8  ;;  %v7704_v0 = vpop.f32.mrf.mxu0 }
 0x2d9   : > { %9312 = vst [vmem:[#allocation112_spill] sm:$0xff] %v7704_v0  ;;  %4725 = vtanh.f32 %v2814_v58  ;;  %v2806_v58 = vmul.f32 0.5, %v7711_v12 }
 0x2da   : > { %4727 = vtanh.f32 %v2813_v14  ;;  %v7722_v11 = vpop.f32.mrf.mxu0  ;;  %v4706_v24 = vpop.eup %4705 }
 0x2db   : > { %9313 = vst [vmem:[#allocation113_spill] sm:$0xff] %v7722_v11  ;;  %4729 = vtanh.f32 %v2812_v57  ;;  %v2805_v57 = vmul.f32 0.5, %v7719_v18  ;;  %v2950_v53 = vmul.f32 0.5, %v4706_v24 }
 0x2dc   : > { %4731 = vtanh.f32 %v2811_v56  ;;  %v7740_v45 = vpop.f32.mrf.mxu0  ;;  %v4708_v8 = vpop.eup %4707 }
 0x2dd   : > { %9314 = vst [vmem:[#allocation115_spill] sm:$0xff] %v7740_v45  ;;  %4733 = vtanh.f32 %v2810_v13  ;;  %v2799_v45 = vmul.f32 0.5, %v7744_v49 }
 0x2de   : > { %v4710_v14 = vpop.eup %4709  ;;  %4735 = vtanh.f32 %v2809_v30  ;;  %v7759_v27 = vpop.f32.mrf.mxu0  ;;  %v2951_v30 = vmul.f32 0.5, %v4708_v8 }
 0x2df   : > { %9315 = vst [vmem:[#allocation114_spill] sm:$0xff] %v7759_v27  ;;  %v4712_v56 = vpop.eup %4711  ;;  %4737 = vtanh.f32 %v2808_v46  ;;  %v2952_v13 = vmul.f32 0.5, %v4710_v14  ;;  %v2801_v14 = vmul.f32 0.5, %v7756_v61 }
 0x2e0   : > { %v4714_v10 = vpop.eup %4713  ;;  %4739 = vtanh.f32 %v2807_v60  ;;  %v7771_v40 = vpop.f32.mrf.mxu0  ;;  %v2949_v27 = vmul.f32 0.5, %v4712_v56  ;;  %v2800_v60 = vmul.f32 0.5, %v7763_v55  ;;  %v3015_v33 = vadd.f32 0.5, %v2951_v30 }
 0x2e1   : > { %9316 = vst [vmem:[#allocation116_spill] sm:$0xff] %v7771_v40  ;;  %v4716_v36 = vpop.eup %4715  ;;  %4741 = vtanh.f32 %v2806_v58  ;;  %v2948_v8 = vmul.f32 0.5, %v4714_v10  ;;  %v3016_v40 = vadd.f32 0.5, %v2952_v13  ;;  %v3014_v56 = vadd.f32 0.5, %v2950_v53 }
 0x2e2   : > { %v4718_v46 = vpop.eup %4717  ;;  %4743 = vtanh.f32 %v2805_v57  ;;  %v2953_v2 = vmul.f32 0.5, %v4716_v36  ;;  %v7776_v15 = vpop.f32.mrf.mxu0  ;;  %v2798_v57 = vmul.f32 0.5, %v7768_v32  ;;  %v3013_v63 = vadd.f32 0.5, %v2949_v27 }
 0x2e3   : > { %9317 = vst [vmem:[#allocation18_spill] sm:$0xff] %v7776_v15  ;;  %v4720_v0 = vpop.eup %4719  ;;  %4745 = vtanh.f32 %v2804_v37  ;;  %v2946_v36 = vmul.f32 0.5, %v4718_v46  ;;  %v3080_v30 = vmul.f32 %v3016_v40, %v7639_v9  ;;  %v3079_v53 = vmul.f32 %v3015_v33, %v7635_v20  ;;  %v7789_v27 = vpop.permute.xlu1 %2433 }
 0x2e4   : > { %v4722_v11 = vpop.eup %4721  ;;  %4747 = vtanh.f32 %v2803_v28  ;;  %v3017_v58 = vadd.f32 0.5, %v2953_v2  ;;  %v7779_v24 = vpop.f32.mrf.mxu0  ;;  %v2945_v1 = vmul.f32 0.5, %v4720_v0  ;;  %v3012_v28 = vadd.f32 0.5, %v2948_v8 }
 0x2e5   : > { %9318 = vst [vmem:[#allocation117_spill] sm:$0xff] %v7779_v24  ;;  %v4724_v51 = vpop.eup %4723  ;;  %4749 = vtanh.f32 %v2802_v17  ;;  %v2944_v5 = vmul.f32 0.5, %v4722_v11  ;;  %v3011_v17 = vadd.f32 0.5, %v2947_v44  ;;  %v3078_v11 = vmul.f32 %v3014_v56, %v7628_v62  ;;  %v7798_v8 = vpop.permute.xlu0 %2438 }
 0x2e6   : > { %v4726_v15 = vpop.eup %4725  ;;  %4751 = vtanh.f32 %v2801_v14  ;;  %v3081_v10 = vmul.f32 %v3017_v58, %v7653_v59  ;;  %v7783_v37 = vpop.f32.mrf.mxu0  ;;  %v2943_v24 = vmul.f32 0.5, %v4724_v51  ;;  %v3010_v14 = vadd.f32 0.5, %v2946_v36 }
 0x2e7   : > { %v4728_v13 = vpop.eup %4727  ;;  %4753 = vtanh.f32 %v2800_v60  ;;  %v2942_v59 = vmul.f32 0.5, %v4726_v15  ;;  %v3009_v9 = vadd.f32 0.5, %v2945_v1  ;;  %v3077_v51 = vmul.f32 %v3013_v63, %v7626_v35 }
 0x2e8   : > { %v4730_v2 = vpop.eup %4729  ;;  %4755 = vtanh.f32 %v2799_v45  ;;  %3118 = vmatprep.subr.mxu1 %v3081_v10  ;;  %v7787_v46 = vpop.f32.mrf.mxu0  ;;  %v2941_v40 = vmul.f32 0.5, %v4728_v13  ;;  %v3008_v45 = vadd.f32 0.5, %v2944_v5  ;;  %v3076_v15 = vmul.f32 %v3012_v28, %v7632_v42 }
 0x2e9   : > { %v4732_v0 = vpop.eup %4731  ;;  %4757 = vtanh.f32 %v2798_v57  ;;  %3119 = vmatpush1.msra.mxu1 %v3080_v30  ;;  %v2940_v44 = vmul.f32 0.5, %v4730_v2  ;;  %v3007_v1 = vadd.f32 0.5, %v2943_v24  ;;  %v3075_v35 = vmul.f32 %v3011_v17, %v7621_v16  ;;  %v7809_v13 = vpop.permute.xlu1 %2423 }
 0x2ea   : > { %v4734_v60 = vpop.eup %4733  ;;  %4759 = vtanh.f32 %v7752_v22  ;;  %3120 = vmatprep.subr.mxu1 %v3079_v53  ;;  %v7794_v20 = vpop.f32.mrf.mxu0  ;;  %v2939_v22 = vmul.f32 0.5, %v4732_v0  ;;  %v3006_v57 = vadd.f32 0.5, %v2942_v59  ;;  %v3074_v42 = vmul.f32 %v3010_v14, %v7637_v25 }
 0x2eb   : > { %v4736_v33 = vpop.eup %4735  ;;  %4761 = vtanh.f32 %v7733_v6  ;;  %3121 = vmatpush1.msra.mxu1 %v3078_v11  ;;  %v2938_v6 = vmul.f32 0.5, %v4734_v60  ;;  %v3005_v10 = vadd.f32 0.5, %v2941_v40  ;;  %v3004_v28 = vadd.f32 0.5, %v2940_v44  ;;  %v7816_v60 = vpop.permute.xlu0 %2428 }
 0x2ec   : > { %v4738_v62 = vpop.eup %4737  ;;  %4763 = vtanh.f32 %v7725_v4  ;;  %3122 = vmatprep.subr.mxu1 %v3077_v51  ;;  %v7802_v63 = vpop.f32.mrf.mxu0  ;;  %v2937_v56 = vmul.f32 0.5, %v4736_v33  ;;  %v3073_v4 = vmul.f32 %v3009_v9, %v7643_v47  ;;  %v3003_v25 = vadd.f32 0.5, %v2939_v22 }
 0x2ed   : > { %v4740_v58 = vpop.eup %4739  ;;  %4765 = vtanh.f32 %v7707_v29  ;;  %3123 = vmatpush1.msra.mxu1 %v3076_v15  ;;  %v2936_v5 = vmul.f32 0.5, %v4738_v62  ;;  %v3072_v29 = vmul.f32 %v3008_v45, %v7647_v34  ;;  %v3071_v17 = vmul.f32 %v3007_v1, %v7651_v54 }
 0x2ee   : > { %v4742_v36 = vpop.eup %4741  ;;  %3124 = vmatprep.subr.mxu1 %v3075_v35  ;;  %v7807_v24 = vpop.f32.mrf.mxu0  ;;  %v2935_v2 = vmul.f32 0.5, %v4740_v58  ;;  %v3002_v59 = vadd.f32 0.5, %v2938_v6  ;;  %v3070_v14 = vmul.f32 %v3006_v57, %v7659_v19  ;;  %v3001_v34 = vadd.f32 0.5, %v2937_v56 }
 0x2ef   : > { %v4744_v16 = vpop.eup %4743  ;;  %3125 = vmatpush1.msra.mxu1 %v3074_v42  ;;  %v2934_v0 = vmul.f32 0.5, %v4742_v36  ;;  %v3069_v9 = vmul.f32 %v3005_v10, %v7662_v21  ;;  %v3000_v44 = vadd.f32 0.5, %v2936_v5  ;;  %v3068_v45 = vmul.f32 %v3004_v28, %v7668_v26  ;;  %v7825_v58 = vpop.permute.xlu1 %2413 }
 0x2f0   : > { %v4746_v30 = vpop.eup %4745  ;;  %3126 = vmatprep.subr.mxu1 %v3073_v4  ;;  %v7813_v53 = vpop.f32.mrf.mxu0  ;;  %v2933_v40 = vmul.f32 0.5, %v4744_v16  ;;  %v2999_v19 = vadd.f32 0.5, %v2935_v2  ;;  %v3067_v22 = vmul.f32 %v3003_v25, %v7671_v3  ;;  %v3066_v57 = vmul.f32 %v3002_v59, %v7680_v52 }
 0x2f1   : > { %v4748_v47 = vpop.eup %4747  ;;  %3127 = vmatpush1.msra.mxu1 %v3072_v29  ;;  %v2932_v33 = vmul.f32 0.5, %v4746_v30  ;;  %v2998_v6 = vadd.f32 0.5, %v2934_v0  ;;  %v3065_v56 = vmul.f32 %v3001_v34, %v7684_v43  ;;  %v3064_v5 = vmul.f32 %v3000_v44, %v7693_v50  ;;  %v7832_v29 = vpop.permute.xlu0 %2418 }
 0x2f2   : > { %v4750_v11 = vpop.eup %4749  ;;  %3128 = vmatprep.subr.mxu1 %v3071_v17  ;;  %v7819_v51 = vpop.f32.mrf.mxu0  ;;  %v2931_v62 = vmul.f32 0.5, %v4748_v47  ;;  %v2997_v26 = vadd.f32 0.5, %v2933_v40  ;;  %v3063_v2 = vmul.f32 %v2999_v19, %v7701_v38 }
 0x2f3   : > { %v4752_v54 = vpop.eup %4751  ;;  %3129 = vmatpush1.msra.mxu1 %v3070_v14  ;;  %v2930_v21 = vmul.f32 0.5, %v4750_v11  ;;  %v2996_v16 = vadd.f32 0.5, %v2932_v33  ;;  %v3062_v0 = vmul.f32 %v2998_v6, %v7711_v12  ;;  %v7841_v34 = vpop.permute.xlu1 %2403 }
 0x2f4   : > { %v4754_v15 = vpop.eup %4753  ;;  %3130 = vmatprep.subr.mxu1 %v3069_v9  ;;  %v7823_v1 = vpop.f32.mrf.mxu0  ;;  %v2929_v36 = vmul.f32 0.5, %v4752_v54  ;;  %v2995_v52 = vadd.f32 0.5, %v2931_v62  ;;  %v3061_v11 = vmul.f32 %v2997_v26, %v7719_v18 }
 0x2f5   : > { %v4756_v35 = vpop.eup %4755  ;;  %3131 = vmatpush1.msra.mxu1 %v3068_v45  ;;  %v2928_v4 = vmul.f32 0.5, %v4754_v15  ;;  %v2994_v47 = vadd.f32 0.5, %v2930_v21  ;;  %v3060_v54 = vmul.f32 %v2996_v16, %v7729_v39  ;;  %v7846_v19 = vpop.permute.xlu0 %2408  ;;  %v9319_v16 = vld [vmem:[#allocation72_spill] sm:$0xff] }
 0x2f6   : > { %v4758_v42 = vpop.eup %4757  ;;  %3132 = vmatprep.subr.mxu1 %v3067_v22  ;;  %v7829_v10 = vpop.f32.mrf.mxu0  ;;  %v2927_v30 = vmul.f32 0.5, %v4756_v35  ;;  %v2993_v50 = vadd.f32 0.5, %v2929_v36  ;;  %v3059_v12 = vmul.f32 %v2995_v52, %v7737_v41 }
 0x2f7   : > { %v4760_v3 = vpop.eup %4759  ;;  %3133 = vmatpush1.msra.mxu1 %v3066_v57  ;;  %v2926_v17 = vmul.f32 0.5, %v4758_v42  ;;  %v2992_v9 = vadd.f32 0.5, %v2928_v4  ;;  %v3058_v18 = vmul.f32 %v2994_v47, %v7748_v48  ;;  %v7851_v36 = vpop.permute.xlu1 %2393 }
 0x2f8   : > { %v4762_v28 = vpop.eup %4761  ;;  %3134 = vmatprep.subr.mxu1 %v3065_v56  ;;  %v7835_v25 = vpop.f32.mrf.mxu0  ;;  %v2925_v14 = vmul.f32 0.5, %v4760_v3  ;;  %v2991_v44 = vadd.f32 0.5, %v2927_v30  ;;  %v3057_v35 = vmul.f32 %v2993_v50, %v7756_v61 }
 0x2f9   : > { %v4764_v43 = vpop.eup %4763  ;;  %3135 = vmatpush1.msra.mxu1 %v3064_v5  ;;  %v2924_v38 = vmul.f32 0.5, %v4762_v28  ;;  %v2990_v62 = vadd.f32 0.5, %v2926_v17  ;;  %v3056_v6 = vmul.f32 %v2992_v9, %v7763_v55  ;;  %v2399_v55 = vpop.permute.xlu0 %2398 }
 0x2fa   : > { %v4766_v59 = vpop.eup %4765  ;;  %3136 = vmatprep.subr.mxu1 %v3063_v2  ;;  %v7839_v40 = vpop.f32.mrf.mxu0  ;;  %v2923_v33 = vmul.f32 0.5, %v4764_v43  ;;  %v2989_v22 = vadd.f32 0.5, %v2925_v14  ;;  %v3055_v41 = vmul.f32 %v2991_v44, %v7744_v49 }
 0x2fb   : > { %3137 = vmatpush1.msra.mxu1 %v3062_v0  ;;  %v2922_v15 = vmul.f32 0.5, %v4766_v59  ;;  %v2988_v39 = vadd.f32 0.5, %v2924_v38  ;;  %v3054_v26 = vmul.f32 %v2990_v62, %v7768_v32  ;;  %v7861_v30 = vpop.permute.xlu1 %2383  ;;  %v7904_v62 = vadd.f32 %v7835_v25, %v7825_v58 }
 0x2fc   : > { %3138 = vmatprep.subr.mxu1 %v3061_v11  ;;  %v2765_v45 = vpop.f32.mrf.mxu0  ;;  %v2987_v57 = vadd.f32 0.5, %v2923_v33  ;;  %v3053_v56 = vmul.f32 %v2989_v22, %v7715_v31  ;;  %v7896_v33 = vadd.f32 %v7839_v40, %v7825_v58  ;;  %v7920_v25 = vadd.f32 %v7819_v51, %v7841_v34 }
 0x2fd   : > { %3139 = vmatpush1.msra.mxu1 %v3060_v54  ;;  %v2986_v48 = vadd.f32 0.5, %v2922_v15  ;;  %v3052_v3 = vmul.f32 %v2988_v39, %v7697_v23  ;;  %v2389_v2 = vpop.permute.xlu0 %2388  ;;  %v7928_v39 = vadd.f32 %v7813_v53, %v7841_v34  ;;  %v9323_v53 = vld [vmem:[#allocation110_spill] sm:$0xff] }
 0x2fe   : > { %3140 = vmatprep.subr.mxu1 %v3059_v12  ;;  %v2767_v21 = vpop.f32.mrf.mxu0  ;;  %v3051_v4 = vmul.f32 %v2987_v57, %v7690_v7  ;;  %v7935_v57 = vadd.f32 %v7807_v24, %v2399_v55  ;;  %v2843_v24 = vmul.f32 0.5, %v7920_v25 }
 0x2ff   : > { %3141 = vmatpush1.msra.mxu1 %v3058_v18  ;;  %v3050_v5 = vmul.f32 %v2986_v48, %v9319_v16  ;;  %v7881_v11 = vpop.permute.xlu1 %2373  ;;  %v7884_v38 = vadd.f32 %v2767_v21, %v7832_v29 }
 0x300   : > { %3142 = vmatprep.subr.mxu1 %v3057_v35  ;;  %v2771_v42 = vpop.f32.mrf.mxu0  ;;  %v9320_v35 = vld [vmem:[#allocation109_spill] sm:$0xff] }
 0x301   : > { %3143 = vmatpush1.msra.mxu1 %v3056_v6  ;;  %v7878_v59 = vadd.f32 %v2771_v42, %v7809_v13  ;;  %v2379_v15 = vpop.permute.xlu0 %2378  ;;  %v2849_v40 = vmul.f32 0.5, %v7884_v38  ;;  %v7939_v42 = vadd.f32 %v7802_v63, %v2399_v55  ;;  %v7955_v63 = vadd.f32 %v7787_v46, %v7851_v36 }
 0x302   : > { %3144 = vmatprep.subr.mxu1 %v3055_v41  ;;  %v2773_v61 = vpop.f32.mrf.mxu0  ;;  %v7962_v55 = vadd.f32 %v7783_v37, %v2389_v2  ;;  %v9326_v37 = vld [vmem:[#allocation18_spill] sm:$0xff] }
 0x303   : > { %3145 = vmatpush1.msra.mxu1 %v3054_v26  ;;  %v7859_v28 = vadd.f32 %v2773_v61, %v7809_v13  ;;  %v2364_v58 = vpop.permute.xlu1 %2363  ;;  %v7947_v26 = vadd.f32 %v7794_v20, %v7851_v36  ;;  %v2842_v61 = vmul.f32 0.5, %v7928_v39  ;;  %v2841_v20 = vmul.f32 0.5, %v7935_v57 }
 0x304   : > { %3146 = vmatprep.subr.mxu1 %v3053_v56  ;;  %v2777_v49 = vpop.f32.mrf.mxu0  ;;  %v7924_v21 = vadd.f32 %v9320_v35, %v2364_v58  ;;  %v2840_v46 = vmul.f32 0.5, %v7939_v42  ;;  %v9331_v35 = vld [vmem:[#allocation115_spill] sm:$0xff] }
 0x305   : > { %3147 = vmatpush1.msra.mxu1 %v3052_v3  ;;  %v2851_v52 = vmul.f32 0.5, %v7859_v28  ;;  %v7871_v43 = vadd.f32 %v2777_v49, %v7816_v60  ;;  %v2369_v41 = vpop.permute.xlu0 %2368  ;;  %v9324_v49 = vld [vmem:[#allocation19_spill] sm:$0xff] }
 0x306   : > { %3148 = vmatprep.subr.mxu1 %v3051_v4  ;;  %v2779_v32 = vpop.f32.mrf.mxu0  ;;  %9321 = vst [vmem:[#allocation17_spill] sm:$0xff] %v7924_v21  ;;  %v7943_v34 = vadd.f32 %v9323_v53, %v2369_v41  ;;  %v7951_v56 = vmul.f32 0.5, %v7924_v21  ;;  %v7966_v16 = vadd.f32 %v9324_v49, %v2369_v41 }
 0x307   : > { %v7864_v31 = vadd.f32 %v2779_v32, %v7816_v60  ;;  %3149 = vmatpush1.msra.mxu1 %v3050_v5  ;;  %4767 = vtanh.f32 %v2851_v52  ;;  %v2852_v13 = vmul.f32 0.5, %v7871_v43  ;;  %v9325_v5 = vld [vmem:[#allocation117_spill] sm:$0xff]  ;;  %v7977_v52 = vadd.f32 %v9326_v37, %v7861_v30 }
 0x308   : > { %v2783_v23 = vpop.f32.mrf.mxu0  ;;  %v7969_v32 = vadd.f32 %v9325_v5, %v2389_v2  ;;  %v9328_v2 = vld [vmem:[#allocation116_spill] sm:$0xff] }
 0x309   : > { %v7868_v7 = vadd.f32 %v2783_v23, %v7789_v27  ;;  %v2853_v17 = vmul.f32 0.5, %v7864_v31  ;;  %v7973_v23 = vmul.f32 0.5, %v7943_v34 }
 0x30a   : > { %v2785_v47 = vpop.f32.mrf.mxu0 }
 0x30b   : > { %v7875_v0 = vadd.f32 %v2785_v47, %v7789_v27  ;;  %v2854_v14 = vmul.f32 0.5, %v7868_v7  ;;  %v7891_v27 = vadd.f32 %v2765_v45, %v7832_v29  ;;  %4769 = vtanh.f32 %v2853_v17 }
 0x30c   : > { %v2789_v50 = vpop.f32.mrf.mxu0  ;;  %v2850_v29 = vmul.f32 0.5, %v7878_v59  ;;  %v7909_v45 = vadd.f32 %v7829_v10, %v7846_v19  ;;  %v2847_v10 = vmul.f32 0.5, %v7896_v33  ;;  %v2839_v17 = vmul.f32 0.5, %v7947_v26 }
 0x30d   : > { %v2855_v60 = vmul.f32 0.5, %v7875_v0  ;;  %v7888_v9 = vadd.f32 %v2789_v50, %v7798_v8  ;;  %v2848_v22 = vmul.f32 0.5, %v7891_v27 }
 0x30e   : > { %v2791_v54 = vpop.f32.mrf.mxu0  ;;  %v2845_v51 = vmul.f32 0.5, %v7909_v45 }
 0x30f   : > { %4771 = vtanh.f32 %v2855_v60  ;;  %v2856_v44 = vmul.f32 0.5, %v7888_v9  ;;  %v7900_v12 = vadd.f32 %v2791_v54, %v7798_v8  ;;  %v7915_v8 = vadd.f32 %v7823_v1, %v7846_v19  ;;  %v9322_v19 = vld [vmem:[#allocation76_spill] sm:$0xff] }
 0x310   : > { %4773 = vtanh.f32 %v2854_v14  ;;  %v2846_v1 = vmul.f32 0.5, %v7904_v62  ;;  %v7932_v6 = vadd.f32 %v9322_v19, %v2364_v58  ;;  %v9327_v14 = vld [vmem:[#allocation113_spill] sm:$0xff]  ;;  %v7986_v60 = vadd.f32 %v9328_v2, %v7861_v30 }
 0x311   : > { %4775 = vtanh.f32 %v2856_v44  ;;  %v2857_v18 = vmul.f32 0.5, %v7900_v12  ;;  %v2844_v48 = vmul.f32 0.5, %v7915_v8  ;;  %v7982_v50 = vadd.f32 %v9327_v14, %v7881_v11  ;;  %v9329_v44 = vld [vmem:[#allocation112_spill] sm:$0xff] }
 0x312   : > { %4777 = vtanh.f32 %v2852_v13  ;;  %v7959_v3 = vmul.f32 0.5, %v7932_v6  ;;  %v2838_v13 = vmul.f32 0.5, %v7955_v63  ;;  %v7999_v30 = vadd.f32 %v9331_v35, %v2379_v15 }
 0x313   : > { %4779 = vtanh.f32 %v2857_v18  ;;  %v2831_v53 = vmul.f32 0.5, %v7982_v50 }
 0x314   : > { %4781 = vtanh.f32 %v2850_v29  ;;  %v4768_v4 = vpop.eup %4767  ;;  %v7991_v29 = vadd.f32 %v9329_v44, %v7881_v11  ;;  %v2832_v37 = vmul.f32 0.5, %v7999_v30 }
 0x315   : > { %4783 = vtanh.f32 %v2849_v40  ;;  %v9330_v40 = vld [vmem:[#allocation114_spill] sm:$0xff]  ;;  %v2979_v2 = vmul.f32 0.5, %v4768_v4 }
 0x316   : > { %4785 = vtanh.f32 %v2848_v22  ;;  %v7994_v18 = vadd.f32 %v9330_v40, %v2379_v15  ;;  %v2837_v22 = vmul.f32 0.5, %v7962_v55 }
 0x317   : > { %4787 = vtanh.f32 %v2847_v10  ;;  %v2829_v10 = vmul.f32 0.5, %v7966_v16 }
 0x318   : > { %4789 = vtanh.f32 %v2846_v1  ;;  %v4770_v36 = vpop.eup %4769  ;;  %v2836_v1 = vmul.f32 0.5, %v7969_v32  ;;  %v2833_v15 = vmul.f32 0.5, %v7994_v18 }
 0x319   : > { %4791 = vtanh.f32 %v2845_v51  ;;  %v2835_v51 = vmul.f32 0.5, %v7977_v52  ;;  %v2981_v49 = vmul.f32 0.5, %v4770_v36 }
 0x31a   : > { %4793 = vtanh.f32 %v2844_v48 }
 0x31b   : > { %4795 = vtanh.f32 %v2843_v24  ;;  %v2834_v24 = vmul.f32 0.5, %v7986_v60 }
 0x31c   : > { %v4772_v47 = vpop.eup %4771  ;;  %4797 = vtanh.f32 %v2842_v61 }
 0x31d   : > { %v4774_v54 = vpop.eup %4773  ;;  %4799 = vtanh.f32 %v2841_v20  ;;  %v2983_v11 = vmul.f32 0.5, %v4772_v47 }
 0x31e   : > { %v4776_v58 = vpop.eup %4775  ;;  %4801 = vtanh.f32 %v2840_v46  ;;  %v2982_v61 = vmul.f32 0.5, %v4774_v54 }
 0x31f   : > { %v4778_v19 = vpop.eup %4777  ;;  %4803 = vtanh.f32 %v2839_v17  ;;  %v2984_v41 = vmul.f32 0.5, %v4776_v58  ;;  %v3047_v44 = vadd.f32 0.5, %v2983_v11 }
 0x320   : > { %v4780_v48 = vpop.eup %4779  ;;  %4805 = vtanh.f32 %v2838_v13  ;;  %v2980_v17 = vmul.f32 0.5, %v4778_v19  ;;  %v2830_v13 = vmul.f32 0.5, %v7991_v29  ;;  %v3046_v35 = vadd.f32 0.5, %v2982_v61 }
 0x321   : > { %v4782_v20 = vpop.eup %4781  ;;  %4807 = vtanh.f32 %v2837_v22  ;;  %v2985_v5 = vmul.f32 0.5, %v4780_v48  ;;  %v3048_v47 = vadd.f32 0.5, %v2984_v41  ;;  %v3045_v48 = vadd.f32 0.5, %v2981_v49 }
 0x322   : > { %v4784_v46 = vpop.eup %4783  ;;  %4809 = vtanh.f32 %v2836_v1  ;;  %v2978_v54 = vmul.f32 0.5, %v4782_v20  ;;  %v3044_v41 = vadd.f32 0.5, %v2980_v17  ;;  %v3110_v49 = vmul.f32 %v3046_v35, %v7868_v7 }
 0x323   : > { %v4786_v14 = vpop.eup %4785  ;;  %4811 = vtanh.f32 %v2835_v51  ;;  %v3049_v40 = vadd.f32 0.5, %v2985_v5  ;;  %v2977_v36 = vmul.f32 0.5, %v4784_v46  ;;  %v3112_v4 = vmul.f32 %v3048_v47, %v7888_v9 }
 0x324   : > { %v4788_v58 = vpop.eup %4787  ;;  %4813 = vtanh.f32 %v2834_v24  ;;  %v2976_v19 = vmul.f32 0.5, %v4786_v14  ;;  %v3043_v5 = vadd.f32 0.5, %v2979_v2  ;;  %v3111_v24 = vmul.f32 %v3047_v44, %v7875_v0 }
 0x325   : > { %v4790_v22 = vpop.eup %4789  ;;  %4815 = vtanh.f32 %v2833_v15  ;;  %v3113_v21 = vmul.f32 %v3049_v40, %v7900_v12  ;;  %v2975_v11 = vmul.f32 0.5, %v4788_v58  ;;  %v3042_v15 = vadd.f32 0.5, %v2978_v54 }
 0x326   : > { %v4792_v1 = vpop.eup %4791  ;;  %4817 = vtanh.f32 %v2832_v37  ;;  %v2974_v20 = vmul.f32 0.5, %v4790_v22  ;;  %v3041_v37 = vadd.f32 0.5, %v2977_v36  ;;  %v3109_v9 = vmul.f32 %v3045_v48, %v7864_v31 }
 0x327   : > { %v4794_v51 = vpop.eup %4793  ;;  %4819 = vtanh.f32 %v2831_v53  ;;  %3150 = vmatprep.subr.mxu1 %v3113_v21  ;;  %v2973_v46 = vmul.f32 0.5, %v4792_v1  ;;  %v3040_v0 = vadd.f32 0.5, %v2976_v19  ;;  %v3108_v21 = vmul.f32 %v3044_v41, %v7871_v43 }
 0x328   : > { %v4796_v61 = vpop.eup %4795  ;;  %4821 = vtanh.f32 %v2830_v13  ;;  %3151 = vmatpush2.msra.mxu1 %v3112_v4  ;;  %v2972_v17 = vmul.f32 0.5, %v4794_v51  ;;  %v3039_v14 = vadd.f32 0.5, %v2975_v11  ;;  %v3038_v44 = vadd.f32 0.5, %v2974_v20 }
 0x329   : > { %v4798_v12 = vpop.eup %4797  ;;  %4823 = vtanh.f32 %v2829_v10  ;;  %3152 = vmatprep.subr.mxu1 %v3111_v24  ;;  %v2971_v7 = vmul.f32 0.5, %v4796_v61  ;;  %v3107_v10 = vmul.f32 %v3043_v5, %v7859_v28  ;;  %v3037_v43 = vadd.f32 0.5, %v2973_v46 }
 0x32a   : > { %v4800_v53 = vpop.eup %4799  ;;  %4825 = vtanh.f32 %v7973_v23  ;;  %3153 = vmatpush2.msra.mxu1 %v3110_v49  ;;  %v2970_v31 = vmul.f32 0.5, %v4798_v12  ;;  %v3106_v23 = vmul.f32 %v3042_v15, %v7878_v59  ;;  %v3105_v13 = vmul.f32 %v3041_v37, %v7884_v38 }
 0x32b   : > { %v4802_v47 = vpop.eup %4801  ;;  %4827 = vtanh.f32 %v7959_v3  ;;  %3154 = vmatprep.subr.mxu1 %v3109_v9  ;;  %v2969_v58 = vmul.f32 0.5, %v4800_v53  ;;  %v3036_v35 = vadd.f32 0.5, %v2972_v17  ;;  %v3104_v28 = vmul.f32 %v3040_v0, %v7891_v27 }
 0x32c   : > { %v4804_v2 = vpop.eup %4803  ;;  %4829 = vtanh.f32 %v7951_v56  ;;  %3155 = vmatpush2.msra.mxu1 %v3108_v21  ;;  %v2968_v54 = vmul.f32 0.5, %v4802_v47  ;;  %v3035_v56 = vadd.f32 0.5, %v2971_v7  ;;  %v3103_v48 = vmul.f32 %v3039_v14, %v7896_v33 }
 0x32d   : > { %v4806_v40 = vpop.eup %4805  ;;  %3156 = vmatprep.subr.mxu1 %v3107_v10  ;;  %v2967_v36 = vmul.f32 0.5, %v4804_v2  ;;  %v3034_v19 = vadd.f32 0.5, %v2970_v31  ;;  %v3102_v41 = vmul.f32 %v3038_v44, %v7904_v62  ;;  %v3033_v51 = vadd.f32 0.5, %v2969_v58 }
 0x32e   : > { %v4808_v3 = vpop.eup %4807  ;;  %3157 = vmatpush2.msra.mxu1 %v3106_v23  ;;  %v2966_v1 = vmul.f32 0.5, %v4806_v40  ;;  %v3101_v11 = vmul.f32 %v3037_v43, %v7909_v45  ;;  %v3032_v24 = vadd.f32 0.5, %v2968_v54  ;;  %v3100_v61 = vmul.f32 %v3036_v35, %v7915_v8 }
 0x32f   : > { %v4810_v22 = vpop.eup %4809  ;;  %3158 = vmatprep.subr.mxu1 %v3105_v13  ;;  %v2965_v4 = vmul.f32 0.5, %v4808_v3  ;;  %v3031_v15 = vadd.f32 0.5, %v2967_v36  ;;  %v3099_v49 = vmul.f32 %v3035_v56, %v7920_v25  ;;  %v3098_v37 = vmul.f32 %v3034_v19, %v7928_v39 }
 0x330   : > { %v4812_v59 = vpop.eup %4811  ;;  %3159 = vmatpush2.msra.mxu1 %v3104_v28  ;;  %v2964_v5 = vmul.f32 0.5, %v4810_v22  ;;  %v3030_v46 = vadd.f32 0.5, %v2966_v1  ;;  %v3097_v17 = vmul.f32 %v3033_v51, %v7935_v57  ;;  %v3096_v47 = vmul.f32 %v3032_v24, %v7939_v42  ;;  %v3195_v51 = vld [vmem:[%s8697_s1 + $0x320] sm:$0xff] }
 0x331   : > { %v4814_v38 = vpop.eup %4813  ;;  %3160 = vmatprep.subr.mxu1 %v3103_v48  ;;  %v2963_v20 = vmul.f32 0.5, %v4812_v59  ;;  %v3029_v53 = vadd.f32 0.5, %v2965_v4  ;;  %v3095_v10 = vmul.f32 %v3031_v15, %v7947_v26  ;;  %v3194_v4 = vld [vmem:[%s8697_s1 + $0x318] sm:$0xff]  ;;  %v3199_v24 = vld [vmem:[%s8697_s1 + $0x340] sm:$0xff] }
 0x332   : > { %v4816_v27 = vpop.eup %4815  ;;  %3161 = vmatpush2.msra.mxu1 %v3102_v41  ;;  %v2962_v12 = vmul.f32 0.5, %v4814_v38  ;;  %v3028_v21 = vadd.f32 0.5, %v2964_v5  ;;  %v3094_v44 = vmul.f32 %v3030_v46, %v7955_v63  ;;  %v3192_v41 = vld [vmem:[%s8697_s1 + $0x308] sm:$0xff]  ;;  %v3193_v38 = vld [vmem:[%s8697_s1 + $0x310] sm:$0xff]  ;;  %v3198_v5 = vld [vmem:[%s8697_s1 + $0x338] sm:$0xff] }
 0x333   : > { %v4818_v33 = vpop.eup %4817  ;;  %3162 = vmatprep.subr.mxu1 %v3101_v11  ;;  %v2961_v9 = vmul.f32 0.5, %v4816_v27  ;;  %v3027_v14 = vadd.f32 0.5, %v2963_v20  ;;  %v3093_v58 = vmul.f32 %v3029_v53, %v7962_v55  ;;  %v3196_v11 = vld [vmem:[%s8697_s1 + $0x328] sm:$0xff]  ;;  %v3197_v27 = vld [vmem:[%s8697_s1 + $0x330] sm:$0xff]  ;;  %v3202_v20 = vld [vmem:[%s8697_s1 + $0x358] sm:$0xff] }
 0x334   : > { %v4820_v62 = vpop.eup %4819  ;;  %3163 = vmatpush2.msra.mxu1 %v3100_v61  ;;  %v2960_v0 = vmul.f32 0.5, %v4818_v33  ;;  %v3026_v31 = vadd.f32 0.5, %v2962_v12  ;;  %v3092_v13 = vmul.f32 %v3028_v21, %v7969_v32  ;;  %v3200_v61 = vld [vmem:[%s8697_s1 + $0x348] sm:$0xff]  ;;  %v3201_v33 = vld [vmem:[%s8697_s1 + $0x350] sm:$0xff]  ;;  %v3203_v15 = vld [vmem:[%s8697_s1 + $0x360] sm:$0xff] }
 0x335   : > { %v4822_v45 = vpop.eup %4821  ;;  %3164 = vmatprep.subr.mxu1 %v3099_v49  ;;  %v2959_v7 = vmul.f32 0.5, %v4820_v62  ;;  %v3025_v40 = vadd.f32 0.5, %v2961_v9  ;;  %v3091_v54 = vmul.f32 %v3027_v14, %v7977_v52  ;;  %v3204_v49 = vld [vmem:[%s8697_s1 + $0x368] sm:$0xff]  ;;  %v3205_v62 = vld [vmem:[%s8697_s1 + $0x370] sm:$0xff]  ;;  %v3206_v12 = vld [vmem:[%s8697_s1 + $0x378] sm:$0xff] }
 0x336   : > { %v4824_v8 = vpop.eup %4823  ;;  %3165 = vmatpush2.msra.mxu1 %v3098_v37  ;;  %v2958_v2 = vmul.f32 0.5, %v4822_v45  ;;  %v3024_v43 = vadd.f32 0.5, %v2960_v0  ;;  %v3090_v63 = vmul.f32 %v3026_v31, %v7986_v60  ;;  %v3207_v46 = vld [vmem:[%s8697_s1 + $0x380] sm:$0xff]  ;;  %v3208_v37 = vld [vmem:[%s8697_s1 + $0x388] sm:$0xff]  ;;  %v3209_v45 = vld [vmem:[%s8697_s1 + $0x390] sm:$0xff]  ;;  %v2214_v31 = vpop.f32.mrf.mxu1 }
 0x337   : > { %v4826_v25 = vpop.eup %4825  ;;  %3166 = vmatprep.subr.mxu1 %v3097_v17  ;;  %v2957_v23 = vmul.f32 0.5, %v4824_v8  ;;  %v3023_v26 = vadd.f32 0.5, %v2959_v7  ;;  %v3089_v36 = vmul.f32 %v3025_v40, %v7994_v18  ;;  %v3210_v9 = vld [vmem:[%s8697_s1 + $0x398] sm:$0xff]  ;;  %v3211_v53 = vld [vmem:[%s8697_s1 + $0x3a0] sm:$0xff]  ;;  %v3212_v17 = vld [vmem:[%s8697_s1 + $0x3a8] sm:$0xff] }
 0x338   : > { %v4828_v39 = vpop.eup %4827  ;;  %3167 = vmatpush2.msra.mxu1 %v3096_v47  ;;  %v2956_v42 = vmul.f32 0.5, %v4826_v25  ;;  %v3022_v28 = vadd.f32 0.5, %v2958_v2  ;;  %v3088_v56 = vmul.f32 %v3024_v43, %v7999_v30  ;;  %v9332_v30 = vld [vmem:[#allocation17_spill] sm:$0xff]  ;;  %v3213_v8 = vld [vmem:[%s8697_s1 + $0x3b0] sm:$0xff]  ;;  %v3215_v21 = vld [vmem:[%s8697_s1 + $0x3c0] sm:$0xff] }
 0x339   : > { %v4830_v57 = vpop.eup %4829  ;;  %3168 = vmatprep.subr.mxu1 %v3095_v10  ;;  %v2955_v3 = vmul.f32 0.5, %v4828_v39  ;;  %v3021_v22 = vadd.f32 0.5, %v2957_v23  ;;  %v3087_v48 = vmul.f32 %v3023_v26, %v7982_v50  ;;  %v4960_v50 = vld [vmem:[%s8699_s3 + $0x10] sm:$0xff]  ;;  %v3214_v0 = vld [vmem:[%s8697_s1 + $0x3b8] sm:$0xff]  ;;  %v3216_v47 = vld [vmem:[%s8697_s1 + $0x3c8] sm:$0xff] }
 0x33a   : > { %3169 = vmatpush2.msra.mxu1 %v3094_v44  ;;  %v2954_v35 = vmul.f32 0.5, %v4830_v57  ;;  %v3020_v55 = vadd.f32 0.5, %v2956_v42  ;;  %v3086_v52 = vmul.f32 %v3022_v28, %v7991_v29  ;;  %v9333_v29 = vld [vmem:[#allocation2_spill] sm:$0xff]  ;;  %v3217_v25 = vld [vmem:[%s8697_s1 + $0x3d0] sm:$0xff]  ;;  %v3218_v7 = vld [vmem:[%s8697_s1 + $0x3d8] sm:$0xff] }
 0x33b   : > { %3170 = vmatprep.subr.mxu1 %v3093_v58  ;;  %v3019_v32 = vadd.f32 0.5, %v2955_v3  ;;  %v3085_v60 = vmul.f32 %v3021_v22, %v7966_v16  ;;  %v4961_v16 = vld [vmem:[%s5059_s8] sm:$0xff]  ;;  %v3220_v10 = vld [vmem:[%s8697_s1 + $0x3e8] sm:$0xff]  ;;  %v3221_v39 = vld [vmem:[%s8697_s1 + $0x3f0] sm:$0xff] }
 0x33c   : > { %3171 = vmatpush2.msra.mxu1 %v3092_v13  ;;  %v3018_v59 = vadd.f32 0.5, %v2954_v35  ;;  %v3084_v1 = vmul.f32 %v3020_v55, %v7943_v34  ;;  %v9334_v34 = vmov 0.0   ;;  %v3219_v14 = vld [vmem:[%s8697_s1 + $0x3e0] sm:$0xff]  ;;  %v3222_v2 = vld [vmem:[%s8697_s1 + $0x3f8] sm:$0xff] }
 0x33d   : > { %3172 = vmatprep.subr.mxu1 %v3091_v54  ;;  %v3083_v18 = vmul.f32 %v3019_v32, %v7932_v6  ;;  %v3191_v6 = vld [vmem:[%s8697_s1 + $0x300] sm:$0xff]  ;;  %v9336_v40 = vld [vmem:[#allocation29_spill] sm:$0xff] }
 0x33e   : > { %3173 = vmatpush2.msra.mxu1 %v3090_v63  ;;  %v3082_v19 = vmul.f32 %v3018_v59, %v9332_v30  ;;  %v9335_v57 = vld [vmem:[#allocation66_spill] sm:$0xff]  ;;  %v3328_v59 = vpop.permute.xlu1 %3327 }
 0x33f   : > { %3174 = vmatprep.subr.mxu1 %v3089_v36  ;;  %v2215_v23 = vadd.f32 %v2214_v31, %v9335_v57 }
 0x340   : > { %3175 = vmatpush2.msra.mxu1 %v3088_v56 }
 0x341   : > { %3176 = vmatprep.subr.mxu1 %v3087_v48 }
 0x342   : > { %3177 = vmatpush2.msra.mxu1 %v3086_v52  ;;  %v3318_v30 = vpop.permute.xlu1 %3317 }
 0x343   : > { %3178 = vmatprep.subr.mxu1 %v3085_v60 }
 0x344   : > { %3179 = vmatpush2.msra.mxu1 %v3084_v1  ;;  %v3333_v1 = vpop.permute.xlu0 %3332 }
 0x345   : > { %3180 = vmatprep.subr.mxu1 %v3083_v18 }
 0x346   : > { %3181 = vmatpush2.msra.mxu1 %v3082_v19 }
 0x347   : > { %3183 = vmatmul.mubr.f32.vlgmr.msra.gmra.mxu1 %v4960_v50  ;;  %4376 = vmatprep.subr.msk.mxu1 %vm588_vm0, %v9333_v29 }
 0x348   : > { %4377 = vmatpush1.msk.msra.mxu1 %vm588_vm0, %v4961_v16  ;;  %3575 = vmatprep.mubr.f32.mxu1 %v9334_v34  ;;  %v3323_v29 = vpop.permute.xlu0 %3322 }
 0x34b   : > { %4378 = vmatmul.mubr.msk.f32.vlgmr.msra.gmra.mxu1 %vm491_vm1, %v3191_v6 }
 0x34c   : > { %3581 = vmatprep.mubr.f32.mxu1 %v9334_v34 }
 0x34f   : > { %4379 = vmatmul.mubr.msk.f32.gmra.mxu1 %vm491_vm1, %v3192_v41 }
 0x350   : > { %3587 = vmatprep.mubr.f32.mxu1 %v9334_v34 }
 0x353   : > { %4380 = vmatmul.mubr.msk.f32.gmra.mxu1 %vm491_vm1, %v3193_v38  ;;  %v3313_v38 = vpop.permute.xlu0 %3312 }
 0x354   : > { %3593 = vmatprep.mubr.f32.mxu1 %v9334_v34 }
 0x357   : > { %4381 = vmatmul.mubr.msk.f32.gmra.mxu1 %vm491_vm1, %v3194_v4 }
 0x358   : > { %3599 = vmatprep.mubr.f32.mxu1 %v9334_v34 }
 0x35b   : > { %4382 = vmatmul.mubr.msk.f32.gmra.mxu1 %vm491_vm1, %v3195_v51 }
 0x35c   : > { %3605 = vmatprep.mubr.f32.mxu1 %v9334_v34 }
 0x35f   : > { %4383 = vmatmul.mubr.msk.f32.gmra.mxu1 %vm491_vm1, %v3196_v11 }
 0x360   : > { %3611 = vmatprep.mubr.f32.mxu1 %v9334_v34 }
 0x363   : > { %4384 = vmatmul.mubr.msk.f32.gmra.mxu1 %vm491_vm1, %v3197_v27 }
 0x364   : > { %3617 = vmatprep.mubr.f32.mxu1 %v9334_v34 }
 0x367   : > { %4385 = vmatmul.mubr.msk.f32.gmra.mxu1 %vm491_vm1, %v3198_v5  ;;  %v3303_v5 = vpop.permute.xlu0 %3302 }
 0x368   : > { %3623 = vmatprep.mubr.f32.mxu1 %v9334_v34 }
 0x36b   : > { %4386 = vmatmul.mubr.msk.f32.gmra.mxu1 %vm491_vm1, %v3199_v24 }
 0x36c   : > { %3629 = vmatprep.mubr.f32.mxu1 %v9334_v34 }
 0x36f   : > { %4387 = vmatmul.mubr.msk.f32.gmra.mxu1 %vm491_vm1, %v3200_v61 }
 0x370   : > { %3635 = vmatprep.mubr.f32.mxu1 %v9334_v34 }
 0x373   : > { %4388 = vmatmul.mubr.msk.f32.gmra.mxu1 %vm491_vm1, %v3201_v33 }
 0x374   : > { %3641 = vmatprep.mubr.f32.mxu1 %v9334_v34 }
 0x377   : > { %4389 = vmatmul.mubr.msk.f32.gmra.mxu1 %vm491_vm1, %v3202_v20 }
 0x378   : > { %3647 = vmatprep.mubr.f32.mxu1 %v9334_v34 }
 0x37b   : > { %4390 = vmatmul.mubr.msk.f32.gmra.mxu1 %vm491_vm1, %v3203_v15  ;;  %v4088_v15 = vld [vmem:[%s8699_s3 + $0x18] sm:$0xff] }
 0x37c   : > { %3653 = vmatprep.mubr.f32.mxu1 %v9334_v34 }
 0x37f   : > { %4391 = vmatmul.mubr.msk.f32.gmra.mxu1 %vm491_vm1, %v3204_v49  ;;  %v3293_v49 = vpop.permute.xlu0 %3292 }
 0x380   : > { %3659 = vmatprep.mubr.f32.mxu1 %v9334_v34 }
 0x383   : > { %4392 = vmatmul.mubr.msk.f32.gmra.mxu1 %vm491_vm1, %v3205_v62 }
 0x384   : > { %3665 = vmatprep.mubr.f32.mxu1 %v9334_v34 }
 0x387   : > { %4393 = vmatmul.mubr.msk.f32.gmra.mxu1 %vm491_vm1, %v3206_v12 }
 0x388   : > { %3671 = vmatprep.mubr.f32.mxu1 %v9334_v34 }
 0x38b   : > { %4394 = vmatmul.mubr.msk.f32.gmra.mxu1 %vm491_vm1, %v3207_v46  ;;  %v4090_v46 = vcombine.high %v4088_v15, %v4088_v15 }
 0x38c   : > { %3677 = vmatprep.mubr.f32.mxu1 %v9334_v34 }
 0x38d   : > { %4156 = vmatprep.mubr.f32.mxu0 %v4090_v46 }
 0x38f   : > { %4395 = vmatmul.mubr.msk.f32.gmra.mxu1 %vm491_vm1, %v3208_v37 }
 0x390   : > { %3683 = vmatprep.mubr.f32.mxu1 %v9334_v34 }
 0x393   : > { %4396 = vmatmul.mubr.msk.f32.gmra.mxu1 %vm491_vm1, %v3209_v45 }
 0x394   : > { %3689 = vmatprep.mubr.f32.mxu1 %v9334_v34 }
 0x397   : > { %4397 = vmatmul.mubr.msk.f32.gmra.mxu1 %vm491_vm1, %v3210_v9 }
 0x398   : > { %3695 = vmatprep.mubr.f32.mxu1 %v9334_v34 }
 0x39b   : > { %4398 = vmatmul.mubr.msk.f32.gmra.mxu1 %vm491_vm1, %v3211_v53 }
 0x39c   : > { %3701 = vmatprep.mubr.f32.mxu1 %v9334_v34 }
 0x39f   : > { %4399 = vmatmul.mubr.msk.f32.gmra.mxu1 %vm491_vm1, %v3212_v17 }
 0x3a0   : > { %3707 = vmatprep.mubr.f32.mxu1 %v9334_v34 }
 0x3a3   : > { %4400 = vmatmul.mubr.msk.f32.gmra.mxu1 %vm491_vm1, %v3213_v8 }
 0x3a4   : > { %3713 = vmatprep.mubr.f32.mxu1 %v9334_v34 }
 0x3a7   : > { %4401 = vmatmul.mubr.msk.f32.gmra.mxu1 %vm491_vm1, %v3214_v0  ;;  %v8264_v0 = vpop.permute.xlu0 %3282 }
 0x3a8   : > { %3719 = vmatprep.mubr.f32.mxu1 %v9334_v34 }
 0x3ab   : > { %4402 = vmatmul.mubr.msk.f32.gmra.mxu1 %vm491_vm1, %v3215_v21 }
 0x3ac   : > { %3725 = vmatprep.mubr.f32.mxu1 %v9334_v34 }
 0x3af   : > { %4403 = vmatmul.mubr.msk.f32.gmra.mxu1 %vm491_vm1, %v3216_v47 }
 0x3b0   : > { %3731 = vmatprep.mubr.f32.mxu1 %v9334_v34 }
 0x3b3   : > { %4404 = vmatmul.mubr.msk.f32.gmra.mxu1 %vm491_vm1, %v3217_v25 }
 0x3b4   : > { %3737 = vmatprep.mubr.f32.mxu1 %v9334_v34 }
 0x3b7   : > { %4405 = vmatmul.mubr.msk.f32.gmra.mxu1 %vm491_vm1, %v3218_v7 }
 0x3b8   : > { %3743 = vmatprep.mubr.f32.mxu1 %v9334_v34 }
 0x3bb   : > { %4406 = vmatmul.mubr.msk.f32.gmra.mxu1 %vm491_vm1, %v3219_v14 }
 0x3bc   : > { %3749 = vmatprep.mubr.f32.mxu1 %v9334_v34 }
 0x3bf   : > { %4407 = vmatmul.mubr.msk.f32.gmra.mxu1 %vm491_vm1, %v3220_v10 }
 0x3c0   : > { %3755 = vmatprep.mubr.f32.mxu1 %v9334_v34 }
 0x3c3   : > { %4408 = vmatmul.mubr.msk.f32.gmra.mxu1 %vm491_vm1, %v3221_v39 }
 0x3c4   : > { %3761 = vmatprep.mubr.f32.mxu1 %v9334_v34  ;;  %v3308_v34 = vpop.permute.xlu1 %3307 }
 0x3c7   : > { %4409 = vmatmul.mubr.msk.f32.gmra.mxu1 %vm491_vm1, %v3222_v2 }
 0x3c8   : > { %v3298_v51 = vpop.permute.xlu1 %3297 }
 0x3cc   : > { %v8250_v61 = vpop.permute.xlu1 %3287 }
 0x3d0   : > { %v8257_v37 = vpop.permute.xlu1 %3277 }
 0x3d4   : > { %v8275_v39 = vpop.permute.xlu1 %3267 }
 0x407   : > { %v3184_v44 = vpop.f32.mrf.mxu1 }
 0x408   : > { %v8212_v58 = vadd.f32 %v3184_v44, %v9336_v40 }
 0x409   : > { %v3186_v42 = vpop.f32.mrf.mxu1 }
 0x40a   : > { %9337 = vst [vmem:[#allocation108_spill] sm:$0xff] %v8212_v58  ;;  %v8214_v43 = vadd.f32 %v3186_v42, %v2215_v23 }
 0x40b   : > { %v8216_v13 = vpop.f32.mrf.mxu1 }
 0x40c   : > { %9338 = vst [vmem:[#allocation15_spill] sm:$0xff] %v8214_v43 }
 0x40d   : > { %v8218_v3 = vpop.f32.mrf.mxu1 }
 0x40f   : > { %v8220_v26 = vpop.f32.mrf.mxu1 }
 0x411   : > { %v8222_v54 = vpop.f32.mrf.mxu1 }
 0x413   : > { %v8224_v35 = vpop.f32.mrf.mxu1 }
 0x415   : > { %v8226_v28 = vpop.f32.mrf.mxu1 }
 0x417   : > { %v8228_v63 = vpop.f32.mrf.mxu1 }
 0x419   : > { %v8230_v22 = vpop.f32.mrf.mxu1 }
 0x41b   : > { %v8232_v36 = vpop.f32.mrf.mxu1 }
 0x41d   : > { %v8234_v55 = vpop.f32.mrf.mxu1 }
 0x41f   : > { %v8236_v56 = vpop.f32.mrf.mxu1 }
 0x421   : > { %v8238_v32 = vpop.f32.mrf.mxu1 }
 0x423   : > { %v8240_v48 = vpop.f32.mrf.mxu1 }
 0x425   : > { %v8242_v52 = vpop.f32.mrf.mxu1 }
 0x427   : > { %v8244_v60 = vpop.f32.mrf.mxu1 }
 0x429   : > { %v8246_v18 = vpop.f32.mrf.mxu1 }
 0x42b   : > { %v8248_v19 = vpop.f32.mrf.mxu1 }
 0x42d   : > { %v3627_v50 = vpop.f32.mrf.mxu1 }
 0x42f   : > { %v3631_v16 = vpop.f32.mrf.mxu1 }
 0x431   : > { %v3633_v6 = vpop.f32.mrf.mxu1 }
 0x433   : > { %v3637_v41 = vpop.f32.mrf.mxu1 }
 0x435   : > { %v3639_v4 = vpop.f32.mrf.mxu1 }
 0x437   : > { %v3643_v11 = vpop.f32.mrf.mxu1 }
 0x438   : > { %v8281_v23 = vadd.f32 %v3643_v11, %v3313_v38 }
 0x439   : > { %v3645_v27 = vpop.f32.mrf.mxu1 }
 0x43a   : > { %v8277_v2 = vadd.f32 %v3645_v27, %v3313_v38  ;;  %v8291_v27 = vpop.permute.xlu0 %3272  ;;  %v8296_v38 = vadd.f32 %v3633_v6, %v3303_v5  ;;  %v3790_v15 = vmul.f32 0.5, %v8281_v23 }
 0x43b   : > { %v3649_v24 = vpop.f32.mrf.mxu1 }
 0x43c   : > { %v8271_v14 = vadd.f32 %v3649_v24, %v3318_v30  ;;  %v8293_v24 = vadd.f32 %v3637_v41, %v3308_v34  ;;  %v3791_v11 = vmul.f32 0.5, %v8277_v2 }
 0x43d   : > { %v3651_v33 = vpop.f32.mrf.mxu1 }
 0x43e   : > { %v8255_v62 = vadd.f32 %v3651_v33, %v3318_v30  ;;  %v3792_v33 = vmul.f32 0.5, %v8271_v14 }
 0x43f   : > { %v3655_v20 = vpop.f32.mrf.mxu1 }
 0x440   : > { %v3793_v9 = vmul.f32 0.5, %v8255_v62  ;;  %v8266_v21 = vadd.f32 %v3655_v20, %v3323_v29 }
 0x441   : > { %v3657_v12 = vpop.f32.mrf.mxu1 }
 0x442   : > { %v8260_v53 = vadd.f32 %v3657_v12, %v3323_v29  ;;  %4831 = vtanh.f32 %v3793_v9  ;;  %v3794_v40 = vmul.f32 0.5, %v8266_v21  ;;  %v3258_v12 = vpop.permute.xlu1 %3257 }
 0x443   : > { %v3661_v45 = vpop.f32.mrf.mxu1  ;;  %v8311_v46 = vadd.f32 %v8216_v13, %v3258_v12  ;;  %v8327_v13 = vadd.f32 %v8244_v60, %v3293_v49  ;;  %v8345_v60 = vadd.f32 %v8240_v48, %v8250_v61  ;;  %v8363_v48 = vadd.f32 %v8236_v56, %v8264_v0 }
 0x444   : > { %v8262_v17 = vadd.f32 %v3661_v45, %v3328_v59  ;;  %v3795_v31 = vmul.f32 0.5, %v8260_v53  ;;  %v8314_v45 = vadd.f32 %v8248_v19, %v3298_v51  ;;  %v8378_v56 = vadd.f32 %v8226_v28, %v8275_v39 }
 0x445   : > { %v3663_v8 = vpop.f32.mrf.mxu1  ;;  %9342 = vst [vmem:[#allocation13_spill] sm:$0xff] %v8311_v46 }
 0x446   : > { %v3796_v47 = vmul.f32 0.5, %v8262_v17  ;;  %v8269_v25 = vadd.f32 %v3663_v8, %v3328_v59  ;;  %v8285_v59 = vadd.f32 %v3639_v4, %v3308_v34  ;;  %v8305_v34 = vadd.f32 %v3627_v50, %v3298_v51  ;;  %v3263_v8 = vpop.permute.xlu0 %3262 }
 0x447   : > { %v3667_v7 = vpop.f32.mrf.mxu1  ;;  %v3787_v50 = vmul.f32 0.5, %v8296_v38  ;;  %v8331_v51 = vadd.f32 %v8220_v26, %v3263_v8  ;;  %v8349_v26 = vadd.f32 %v8222_v54, %v3263_v8  ;;  %v3782_v54 = vmul.f32 0.5, %v8327_v13 }
 0x448   : > { %v8273_v10 = vadd.f32 %v3667_v7, %v3333_v1  ;;  %v3797_v44 = vmul.f32 0.5, %v8269_v25  ;;  %4833 = vtanh.f32 %v3796_v47  ;;  %v3789_v41 = vmul.f32 0.5, %v8285_v59 }
 0x449   : > { %v3669_v57 = vpop.f32.mrf.mxu1  ;;  %v8324_v47 = vadd.f32 %v8218_v3, %v3258_v12  ;;  %v3785_v7 = vmul.f32 0.5, %v8305_v34  ;;  %v8341_v3 = vmul.f32 0.5, %v8311_v46  ;;  %v3780_v12 = vmul.f32 0.5, %v8345_v60 }
 0x44a   : > { %v3798_v42 = vmul.f32 0.5, %v8273_v10  ;;  %4835 = vtanh.f32 %v3797_v44  ;;  %v8287_v30 = vadd.f32 %v3669_v57, %v3333_v1  ;;  %v8302_v1 = vadd.f32 %v3631_v16, %v3303_v5 }
 0x44b   : > { %v8289_v29 = vpop.f32.mrf.mxu1  ;;  %v3788_v16 = vmul.f32 0.5, %v8293_v24  ;;  %v8318_v5 = vadd.f32 %v8246_v18, %v3293_v49  ;;  %v8335_v18 = vadd.f32 %v8242_v52, %v8250_v61  ;;  %v3784_v49 = vmul.f32 0.5, %v8314_v45 }
 0x44c   : > { %9339 = vst [vmem:[#allocation111_spill] sm:$0xff] %v8289_v29  ;;  %4837 = vtanh.f32 %v3798_v42  ;;  %v3799_v4 = vmul.f32 0.5, %v8287_v30  ;;  %v3786_v19 = vmul.f32 0.5, %v8302_v1  ;;  %v8353_v52 = vadd.f32 %v8238_v32, %v8264_v0 }
 0x44d   : > { %4839 = vtanh.f32 %v3795_v31  ;;  %v8300_v20 = vpop.f32.mrf.mxu1  ;;  %v3783_v44 = vmul.f32 0.5, %v8318_v5  ;;  %v8359_v42 = vmul.f32 0.5, %v8324_v47  ;;  %v8367_v32 = vmul.f32 0.5, %v8331_v51 }
 0x44e   : > { %9340 = vst [vmem:[#allocation16_spill] sm:$0xff] %v8300_v20  ;;  %4841 = vtanh.f32 %v3794_v40  ;;  %v8382_v0 = vadd.f32 %v8232_v36, %v8257_v37  ;;  %v8397_v36 = vadd.f32 %v8228_v63, %v8291_v27 }
 0x44f   : > { %4843 = vtanh.f32 %v3799_v4  ;;  %v8308_v6 = vpop.f32.mrf.mxu1  ;;  %v4832_v40 = vpop.eup %4831 }
 0x450   : > { %9341 = vst [vmem:[#allocation95_spill] sm:$0xff] %v8308_v6  ;;  %4845 = vtanh.f32 %v3792_v33  ;;  %v8371_v33 = vadd.f32 %v8234_v55, %v8257_v37  ;;  %v8386_v55 = vmul.f32 0.5, %v8349_v26  ;;  %v3778_v37 = vmul.f32 0.5, %v8363_v48 }
 0x451   : > { %4847 = vtanh.f32 %v3791_v11  ;;  %v8321_v9 = vpop.f32.mrf.mxu1  ;;  %v3781_v11 = vmul.f32 0.5, %v8335_v18  ;;  %v3776_v63 = vmul.f32 0.5, %v8382_v0 }
 0x452   : > { %9343 = vst [vmem:[#allocation103_spill] sm:$0xff] %v8321_v9  ;;  %4849 = vtanh.f32 %v3790_v15  ;;  %v3921_v9 = vmul.f32 0.5, %v4832_v40 }
 0x453   : > { %4851 = vtanh.f32 %v3789_v41  ;;  %v8338_v31 = vpop.f32.mrf.mxu1 }
 0x454   : > { %9344 = vst [vmem:[#allocation14_spill] sm:$0xff] %v8338_v31  ;;  %4853 = vtanh.f32 %v3788_v16  ;;  %v8390_v16 = vadd.f32 %v8230_v22, %v8291_v27  ;;  %v3777_v22 = vmul.f32 0.5, %v8371_v33 }
 0x455   : > { %4855 = vtanh.f32 %v3787_v50  ;;  %v8356_v57 = vpop.f32.mrf.mxu1  ;;  %v4834_v61 = vpop.eup %4833  ;;  %v3779_v50 = vmul.f32 0.5, %v8353_v52 }
 0x456   : > { %9345 = vst [vmem:[#allocation59_spill] sm:$0xff] %v8356_v57  ;;  %4857 = vtanh.f32 %v3786_v19  ;;  %v3924_v27 = vmul.f32 0.5, %v4834_v61 }
 0x457   : > { %4859 = vtanh.f32 %v3785_v7  ;;  %v8374_v4 = vpop.f32.mrf.mxu1  ;;  %v4836_v15 = vpop.eup %4835 }
 0x458   : > { %9346 = vst [vmem:[#allocation11_spill] sm:$0xff] %v8374_v4  ;;  %4861 = vtanh.f32 %v3784_v49  ;;  %v8402_v49 = vadd.f32 %v8224_v35, %v8275_v39  ;;  %v3773_v4 = vmul.f32 0.5, %v8378_v56 }
 0x459   : > { %v4838_v41 = vpop.eup %4837  ;;  %4863 = vtanh.f32 %v3783_v44  ;;  %v8393_v28 = vpop.f32.mrf.mxu1  ;;  %v3925_v44 = vmul.f32 0.5, %v4836_v15 }
 0x45a   : > { %9347 = vst [vmem:[#allocation30_spill] sm:$0xff] %v8393_v28  ;;  %v4840_v8 = vpop.eup %4839  ;;  %4865 = vtanh.f32 %v3782_v54  ;;  %v3926_v19 = vmul.f32 0.5, %v4838_v41  ;;  %v3775_v41 = vmul.f32 0.5, %v8390_v16 }
 0x45b   : > { %v4842_v7 = vpop.eup %4841  ;;  %4867 = vtanh.f32 %v3781_v11  ;;  %v8405_v43 = vpop.f32.mrf.mxu1  ;;  %v3923_v28 = vmul.f32 0.5, %v4840_v8  ;;  %v3774_v11 = vmul.f32 0.5, %v8397_v36  ;;  %v3989_v6 = vadd.f32 0.5, %v3925_v44 }
 0x45c   : > { %9348 = vst [vmem:[#allocation12_spill] sm:$0xff] %v8405_v43  ;;  %v4844_v58 = vpop.eup %4843  ;;  %4869 = vtanh.f32 %v3780_v12  ;;  %v3922_v15 = vmul.f32 0.5, %v4842_v7  ;;  %v3990_v43 = vadd.f32 0.5, %v3926_v19  ;;  %v3988_v8 = vadd.f32 0.5, %v3924_v27 }
 0x45d   : > { %v4846_v54 = vpop.eup %4845  ;;  %4871 = vtanh.f32 %v3779_v50  ;;  %v3927_v35 = vmul.f32 0.5, %v4844_v58  ;;  %v8410_v39 = vpop.f32.mrf.mxu1  ;;  %v3772_v50 = vmul.f32 0.5, %v8402_v49  ;;  %v3987_v46 = vadd.f32 0.5, %v3923_v28 }
 0x45e   : > { %9349 = vst [vmem:[#allocation91_spill] sm:$0xff] %v8410_v39  ;;  %v4848_v31 = vpop.eup %4847  ;;  %4873 = vtanh.f32 %v3778_v37  ;;  %v3920_v58 = vmul.f32 0.5, %v4846_v54  ;;  %v4054_v44 = vmul.f32 %v3990_v43, %v8273_v10  ;;  %v4053_v27 = vmul.f32 %v3989_v6, %v8269_v25  ;;  %v8423_v28 = vpop.permute.xlu1 %3407 }
 0x45f   : > { %v4850_v57 = vpop.eup %4849  ;;  %4875 = vtanh.f32 %v3777_v22  ;;  %v3991_v12 = vadd.f32 0.5, %v3927_v35  ;;  %v8413_v61 = vpop.f32.mrf.mxu1  ;;  %v3919_v29 = vmul.f32 0.5, %v4848_v31  ;;  %v3986_v22 = vadd.f32 0.5, %v3922_v15 }
 0x460   : > { %9350 = vst [vmem:[#allocation9_spill] sm:$0xff] %v8413_v61  ;;  %v4852_v20 = vpop.eup %4851  ;;  %4877 = vtanh.f32 %v3776_v63  ;;  %v3918_v40 = vmul.f32 0.5, %v4850_v57  ;;  %v3985_v63 = vadd.f32 0.5, %v3921_v9  ;;  %v4052_v57 = vmul.f32 %v3988_v8, %v8262_v17  ;;  %v8432_v15 = vpop.permute.xlu0 %3412 }
 0x461   : > { %v4854_v39 = vpop.eup %4853  ;;  %4879 = vtanh.f32 %v3775_v41  ;;  %v4055_v37 = vmul.f32 %v3991_v12, %v8287_v30  ;;  %v8417_v19 = vpop.f32.mrf.mxu1  ;;  %v3917_v61 = vmul.f32 0.5, %v4852_v20  ;;  %v3984_v41 = vadd.f32 0.5, %v3920_v58 }
 0x462   : > { %v4856_v7 = vpop.eup %4855  ;;  %4881 = vtanh.f32 %v3774_v11  ;;  %v3916_v30 = vmul.f32 0.5, %v4854_v39  ;;  %v3983_v10 = vadd.f32 0.5, %v3919_v29  ;;  %v4051_v20 = vmul.f32 %v3987_v46, %v8260_v53 }
 0x463   : > { %v4858_v35 = vpop.eup %4857  ;;  %4883 = vtanh.f32 %v3773_v4  ;;  %4092 = vmatprep.subr.mxu0 %v4055_v37  ;;  %v8421_v54 = vpop.f32.mrf.mxu1  ;;  %v3915_v43 = vmul.f32 0.5, %v4856_v7  ;;  %v3982_v4 = vadd.f32 0.5, %v3918_v40  ;;  %v4050_v39 = vmul.f32 %v3986_v22, %v8266_v21 }
 0x464   : > { %v4860_v31 = vpop.eup %4859  ;;  %4885 = vtanh.f32 %v3772_v50  ;;  %4093 = vmatpush1.msra.mxu0 %v4054_v44  ;;  %v3914_v9 = vmul.f32 0.5, %v4858_v35  ;;  %v3981_v29 = vadd.f32 0.5, %v3917_v61  ;;  %v4049_v53 = vmul.f32 %v3985_v63, %v8255_v62  ;;  %v8443_v7 = vpop.permute.xlu1 %3397 }
 0x465   : > { %v4862_v11 = vpop.eup %4861  ;;  %4887 = vtanh.f32 %v8386_v55  ;;  %4094 = vmatprep.subr.mxu0 %v4053_v27  ;;  %v8428_v25 = vpop.f32.mrf.mxu1  ;;  %v3913_v55 = vmul.f32 0.5, %v4860_v31  ;;  %v3980_v50 = vadd.f32 0.5, %v3916_v30  ;;  %v4048_v21 = vmul.f32 %v3984_v41, %v8271_v14 }
 0x466   : > { %v4864_v6 = vpop.eup %4863  ;;  %4889 = vtanh.f32 %v8367_v32  ;;  %4095 = vmatpush1.msra.mxu0 %v4052_v57  ;;  %v3912_v32 = vmul.f32 0.5, %v4862_v11  ;;  %v3979_v37 = vadd.f32 0.5, %v3915_v43  ;;  %v3978_v22 = vadd.f32 0.5, %v3914_v9  ;;  %v8450_v11 = vpop.permute.xlu0 %3402 }
 0x467   : > { %v4866_v17 = vpop.eup %4865  ;;  %4891 = vtanh.f32 %v8359_v42  ;;  %4096 = vmatprep.subr.mxu0 %v4051_v20  ;;  %v8436_v46 = vpop.f32.mrf.mxu1  ;;  %v3911_v8 = vmul.f32 0.5, %v4864_v6  ;;  %v4047_v42 = vmul.f32 %v3983_v10, %v8277_v2  ;;  %v3977_v14 = vadd.f32 0.5, %v3913_v55 }
 0x468   : > { %v4868_v12 = vpop.eup %4867  ;;  %4893 = vtanh.f32 %v8341_v3  ;;  %4097 = vmatpush1.msra.mxu0 %v4050_v39  ;;  %v3910_v40 = vmul.f32 0.5, %v4866_v17  ;;  %v4046_v3 = vmul.f32 %v3982_v4, %v8281_v23  ;;  %v4045_v63 = vmul.f32 %v3981_v29, %v8285_v59 }
 0x469   : > { %v4870_v58 = vpop.eup %4869  ;;  %4098 = vmatprep.subr.mxu0 %v4049_v53  ;;  %v8441_v61 = vpop.f32.mrf.mxu1  ;;  %v3909_v35 = vmul.f32 0.5, %v4868_v12  ;;  %v3976_v30 = vadd.f32 0.5, %v3912_v32  ;;  %v4044_v41 = vmul.f32 %v3980_v50, %v8293_v24  ;;  %v3975_v23 = vadd.f32 0.5, %v3911_v8 }
 0x46a   : > { %v4872_v62 = vpop.eup %4871  ;;  %4099 = vmatpush1.msra.mxu0 %v4048_v21  ;;  %v3908_v31 = vmul.f32 0.5, %v4870_v58  ;;  %v4043_v10 = vmul.f32 %v3979_v37, %v8296_v38  ;;  %v3974_v9 = vadd.f32 0.5, %v3910_v40  ;;  %v4042_v4 = vmul.f32 %v3978_v22, %v8302_v1  ;;  %v8459_v12 = vpop.permute.xlu1 %3387 }
 0x46b   : > { %v4874_v44 = vpop.eup %4873  ;;  %4100 = vmatprep.subr.mxu0 %v4047_v42  ;;  %v8447_v27 = vpop.f32.mrf.mxu1  ;;  %v3907_v43 = vmul.f32 0.5, %v4872_v62  ;;  %v3973_v24 = vadd.f32 0.5, %v3909_v35  ;;  %v4041_v55 = vmul.f32 %v3977_v14, %v8305_v34  ;;  %v4040_v50 = vmul.f32 %v3976_v30, %v8314_v45 }
 0x46c   : > { %v4876_v2 = vpop.eup %4875  ;;  %4101 = vmatpush1.msra.mxu0 %v4046_v3  ;;  %v3906_v6 = vmul.f32 0.5, %v4874_v44  ;;  %v3972_v32 = vadd.f32 0.5, %v3908_v31  ;;  %v4039_v8 = vmul.f32 %v3975_v23, %v8318_v5  ;;  %v4038_v40 = vmul.f32 %v3974_v9, %v8327_v13  ;;  %v8466_v3 = vpop.permute.xlu0 %3392 }
 0x46d   : > { %v4878_v57 = vpop.eup %4877  ;;  %4102 = vmatprep.subr.mxu0 %v4045_v63  ;;  %v8453_v20 = vpop.f32.mrf.mxu1  ;;  %v3905_v17 = vmul.f32 0.5, %v4876_v2  ;;  %v3971_v1 = vadd.f32 0.5, %v3907_v43  ;;  %v4037_v35 = vmul.f32 %v3973_v24, %v8335_v18 }
 0x46e   : > { %v4880_v59 = vpop.eup %4879  ;;  %4103 = vmatpush1.msra.mxu0 %v4044_v41  ;;  %v3904_v38 = vmul.f32 0.5, %v4878_v57  ;;  %v3970_v62 = vadd.f32 0.5, %v3906_v6  ;;  %v4036_v31 = vmul.f32 %v3972_v32, %v8345_v60  ;;  %v8475_v23 = vpop.permute.xlu1 %3377 }
 0x46f   : > { %v4882_v39 = vpop.eup %4881  ;;  %4104 = vmatprep.subr.mxu0 %v4043_v10  ;;  %v8457_v29 = vpop.f32.mrf.mxu1  ;;  %v3903_v58 = vmul.f32 0.5, %v4880_v59  ;;  %v3969_v45 = vadd.f32 0.5, %v3905_v17  ;;  %v4035_v57 = vmul.f32 %v3971_v1, %v8353_v52 }
 0x470   : > { %v4884_v53 = vpop.eup %4883  ;;  %4105 = vmatpush1.msra.mxu0 %v4042_v4  ;;  %v3902_v42 = vmul.f32 0.5, %v4882_v39  ;;  %v3968_v2 = vadd.f32 0.5, %v3904_v38  ;;  %v4034_v59 = vmul.f32 %v3970_v62, %v8363_v48  ;;  %v8480_v24 = vpop.permute.xlu0 %3382  ;;  %v9351_v62 = vld [vmem:[#allocation13_spill] sm:$0xff] }
 0x471   : > { %v4886_v21 = vpop.eup %4885  ;;  %4106 = vmatprep.subr.mxu0 %v4041_v55  ;;  %v8463_v37 = vpop.f32.mrf.mxu1  ;;  %v3901_v44 = vmul.f32 0.5, %v4884_v53  ;;  %v3967_v13 = vadd.f32 0.5, %v3903_v58  ;;  %v4033_v60 = vmul.f32 %v3969_v45, %v8371_v33 }
 0x472   : > { %v4888_v34 = vpop.eup %4887  ;;  %4107 = vmatpush1.msra.mxu0 %v4040_v50  ;;  %v3900_v63 = vmul.f32 0.5, %v4886_v21  ;;  %v3966_v10 = vadd.f32 0.5, %v3902_v42  ;;  %v4032_v52 = vmul.f32 %v3968_v2, %v8382_v0  ;;  %v8485_v58 = vpop.permute.xlu1 %3367 }
 0x473   : > { %v4890_v22 = vpop.eup %4889  ;;  %4108 = vmatprep.subr.mxu0 %v4039_v8  ;;  %v8469_v14 = vpop.f32.mrf.mxu1  ;;  %v3899_v41 = vmul.f32 0.5, %v4888_v34  ;;  %v3965_v9 = vadd.f32 0.5, %v3901_v44  ;;  %v4031_v53 = vmul.f32 %v3967_v13, %v8390_v16 }
 0x474   : > { %v4892_v5 = vpop.eup %4891  ;;  %4109 = vmatpush1.msra.mxu0 %v4038_v40  ;;  %v3898_v18 = vmul.f32 0.5, %v4890_v22  ;;  %v3964_v17 = vadd.f32 0.5, %v3900_v63  ;;  %v4030_v32 = vmul.f32 %v3966_v10, %v8397_v36  ;;  %v3373_v36 = vpop.permute.xlu0 %3372 }
 0x475   : > { %v4894_v30 = vpop.eup %4893  ;;  %4110 = vmatprep.subr.mxu0 %v4037_v35  ;;  %v8473_v43 = vpop.f32.mrf.mxu1  ;;  %v3897_v6 = vmul.f32 0.5, %v4892_v5  ;;  %v3963_v55 = vadd.f32 0.5, %v3899_v41  ;;  %v4029_v33 = vmul.f32 %v3965_v9, %v8378_v56 }
 0x476   : > { %4111 = vmatpush1.msra.mxu0 %v4036_v31  ;;  %v3896_v39 = vmul.f32 0.5, %v4894_v30  ;;  %v3962_v48 = vadd.f32 0.5, %v3898_v18  ;;  %v4028_v1 = vmul.f32 %v3964_v17, %v8402_v49  ;;  %v8495_v44 = vpop.permute.xlu1 %3357  ;;  %v8538_v17 = vadd.f32 %v8469_v14, %v8459_v12 }
 0x477   : > { %4112 = vmatprep.subr.mxu0 %v4035_v57  ;;  %v3739_v4 = vpop.f32.mrf.mxu1  ;;  %v3961_v50 = vadd.f32 0.5, %v3897_v6  ;;  %v4027_v8 = vmul.f32 %v3963_v55, %v8349_v26  ;;  %v8530_v6 = vadd.f32 %v8473_v43, %v8459_v12  ;;  %v8554_v14 = vadd.f32 %v8453_v20, %v8475_v23 }
 0x478   : > { %4113 = vmatpush1.msra.mxu0 %v4034_v59  ;;  %v3960_v0 = vadd.f32 0.5, %v3896_v39  ;;  %v4026_v34 = vmul.f32 %v3962_v48, %v8331_v51  ;;  %v3363_v35 = vpop.permute.xlu0 %3362  ;;  %v8562_v48 = vadd.f32 %v8447_v27, %v8475_v23  ;;  %v9355_v27 = vld [vmem:[#allocation95_spill] sm:$0xff] }
 0x479   : > { %4114 = vmatprep.subr.mxu0 %v4033_v60  ;;  %v3741_v38 = vpop.f32.mrf.mxu1  ;;  %v4025_v42 = vmul.f32 %v3961_v50, %v8324_v47  ;;  %v8569_v50 = vadd.f32 %v8441_v61, %v3373_v36  ;;  %v3817_v61 = vmul.f32 0.5, %v8554_v14 }
 0x47a   : > { %4115 = vmatpush1.msra.mxu0 %v4032_v52  ;;  %v4024_v40 = vmul.f32 %v3960_v0, %v9351_v62  ;;  %v8515_v57 = vpop.permute.xlu1 %3347  ;;  %v8518_v18 = vadd.f32 %v3741_v38, %v8466_v3 }
 0x47b   : > { %4116 = vmatprep.subr.mxu0 %v4031_v53  ;;  %v3745_v21 = vpop.f32.mrf.mxu1  ;;  %v9352_v53 = vld [vmem:[#allocation111_spill] sm:$0xff] }
 0x47c   : > { %4117 = vmatpush1.msra.mxu0 %v4030_v32  ;;  %v8512_v30 = vadd.f32 %v3745_v21, %v8443_v7  ;;  %v3353_v39 = vpop.permute.xlu0 %3352  ;;  %v3823_v43 = vmul.f32 0.5, %v8518_v18  ;;  %v8573_v21 = vadd.f32 %v8436_v46, %v3373_v36  ;;  %v8589_v46 = vadd.f32 %v8421_v54, %v8485_v58 }
 0x47d   : > { %4118 = vmatprep.subr.mxu0 %v4029_v33  ;;  %v3747_v16 = vpop.f32.mrf.mxu1  ;;  %v8596_v36 = vadd.f32 %v8417_v19, %v3363_v35  ;;  %v9358_v19 = vld [vmem:[#allocation91_spill] sm:$0xff] }
 0x47e   : > { %4119 = vmatpush1.msra.mxu0 %v4028_v1  ;;  %v8493_v22 = vadd.f32 %v3747_v16, %v8443_v7  ;;  %v3338_v12 = vpop.permute.xlu1 %3337  ;;  %v8581_v1 = vadd.f32 %v8428_v25, %v8485_v58  ;;  %v3816_v16 = vmul.f32 0.5, %v8562_v48  ;;  %v3815_v25 = vmul.f32 0.5, %v8569_v50 }
 0x47f   : > { %4120 = vmatprep.subr.mxu0 %v4027_v8  ;;  %v3751_v56 = vpop.f32.mrf.mxu1  ;;  %v8558_v38 = vadd.f32 %v9352_v53, %v3338_v12  ;;  %v3814_v54 = vmul.f32 0.5, %v8573_v21  ;;  %v9363_v53 = vld [vmem:[#allocation11_spill] sm:$0xff] }
 0x480   : > { %4121 = vmatpush1.msra.mxu0 %v4026_v34  ;;  %v3825_v45 = vmul.f32 0.5, %v8493_v22  ;;  %v8505_v5 = vadd.f32 %v3751_v56, %v8450_v11  ;;  %v3343_v33 = vpop.permute.xlu0 %3342  ;;  %v9356_v56 = vld [vmem:[#allocation103_spill] sm:$0xff] }
 0x481   : > { %4122 = vmatprep.subr.mxu0 %v4025_v42  ;;  %v3753_v49 = vpop.f32.mrf.mxu1  ;;  %9353 = vst [vmem:[#allocation93_spill] sm:$0xff] %v8558_v38  ;;  %v8577_v23 = vadd.f32 %v9355_v27, %v3343_v33  ;;  %v8585_v8 = vmul.f32 0.5, %v8558_v38  ;;  %v8600_v62 = vadd.f32 %v9356_v56, %v3343_v33 }
 0x482   : > { %v8498_v26 = vadd.f32 %v3753_v49, %v8450_v11  ;;  %4123 = vmatpush1.msra.mxu0 %v4024_v40  ;;  %4895 = vtanh.f32 %v3825_v45  ;;  %v3826_v7 = vmul.f32 0.5, %v8505_v5  ;;  %v9357_v40 = vld [vmem:[#allocation9_spill] sm:$0xff]  ;;  %v8611_v45 = vadd.f32 %v9358_v19, %v8495_v44 }
 0x483   : > { %v3757_v51 = vpop.f32.mrf.mxu1  ;;  %v8603_v49 = vadd.f32 %v9357_v40, %v3363_v35  ;;  %v9360_v35 = vld [vmem:[#allocation12_spill] sm:$0xff] }
 0x484   : > { %v8502_v47 = vadd.f32 %v3757_v51, %v8423_v28  ;;  %v3827_v63 = vmul.f32 0.5, %v8498_v26  ;;  %v8607_v51 = vmul.f32 0.5, %v8577_v23 }
 0x485   : > { %v3759_v2 = vpop.f32.mrf.mxu1 }
 0x486   : > { %v8509_v31 = vadd.f32 %v3759_v2, %v8423_v28  ;;  %v3828_v41 = vmul.f32 0.5, %v8502_v47  ;;  %v8525_v28 = vadd.f32 %v3739_v4, %v8466_v3  ;;  %4897 = vtanh.f32 %v3827_v63 }
 0x487   : > { %v3763_v13 = vpop.f32.mrf.mxu1  ;;  %v3824_v3 = vmul.f32 0.5, %v8512_v30  ;;  %v8543_v4 = vadd.f32 %v8463_v37, %v8480_v24  ;;  %v3821_v37 = vmul.f32 0.5, %v8530_v6  ;;  %v3813_v63 = vmul.f32 0.5, %v8581_v1 }
 0x488   : > { %v3829_v11 = vmul.f32 0.5, %v8509_v31  ;;  %v8522_v10 = vadd.f32 %v3763_v13, %v8432_v15  ;;  %v3822_v55 = vmul.f32 0.5, %v8525_v28 }
 0x489   : > { %v3765_v59 = vpop.f32.mrf.mxu1  ;;  %v3819_v20 = vmul.f32 0.5, %v8543_v4 }
 0x48a   : > { %4899 = vtanh.f32 %v3829_v11  ;;  %v3830_v9 = vmul.f32 0.5, %v8522_v10  ;;  %v8534_v60 = vadd.f32 %v3765_v59, %v8432_v15  ;;  %v8549_v15 = vadd.f32 %v8457_v29, %v8480_v24  ;;  %v9354_v24 = vld [vmem:[#allocation16_spill] sm:$0xff] }
 0x48b   : > { %4901 = vtanh.f32 %v3828_v41  ;;  %v3820_v29 = vmul.f32 0.5, %v8538_v17  ;;  %v8566_v32 = vadd.f32 %v9354_v24, %v3338_v12  ;;  %v9359_v41 = vld [vmem:[#allocation59_spill] sm:$0xff]  ;;  %v8620_v11 = vadd.f32 %v9360_v35, %v8495_v44 }
 0x48c   : > { %4903 = vtanh.f32 %v3830_v9  ;;  %v3831_v52 = vmul.f32 0.5, %v8534_v60  ;;  %v3818_v0 = vmul.f32 0.5, %v8549_v15  ;;  %v8616_v13 = vadd.f32 %v9359_v41, %v8515_v57  ;;  %v9361_v9 = vld [vmem:[#allocation14_spill] sm:$0xff] }
 0x48d   : > { %4905 = vtanh.f32 %v3826_v7  ;;  %v8593_v34 = vmul.f32 0.5, %v8566_v32  ;;  %v3812_v7 = vmul.f32 0.5, %v8589_v46  ;;  %v8633_v44 = vadd.f32 %v9363_v53, %v3353_v39 }
 0x48e   : > { %4907 = vtanh.f32 %v3831_v52  ;;  %v3805_v27 = vmul.f32 0.5, %v8616_v13 }
 0x48f   : > { %4909 = vtanh.f32 %v3824_v3  ;;  %v4896_v42 = vpop.eup %4895  ;;  %v8625_v3 = vadd.f32 %v9361_v9, %v8515_v57  ;;  %v3806_v19 = vmul.f32 0.5, %v8633_v44 }
 0x490   : > { %4911 = vtanh.f32 %v3823_v43  ;;  %v9362_v43 = vld [vmem:[#allocation30_spill] sm:$0xff]  ;;  %v3953_v35 = vmul.f32 0.5, %v4896_v42 }
 0x491   : > { %4913 = vtanh.f32 %v3822_v55  ;;  %v8628_v52 = vadd.f32 %v9362_v43, %v3353_v39  ;;  %v3811_v55 = vmul.f32 0.5, %v8596_v36 }
 0x492   : > { %4915 = vtanh.f32 %v3821_v37  ;;  %v3803_v37 = vmul.f32 0.5, %v8600_v62 }
 0x493   : > { %4917 = vtanh.f32 %v3820_v29  ;;  %v4898_v58 = vpop.eup %4897  ;;  %v3810_v29 = vmul.f32 0.5, %v8603_v49  ;;  %v3807_v39 = vmul.f32 0.5, %v8628_v52 }
 0x494   : > { %4919 = vtanh.f32 %v3819_v20  ;;  %v3809_v20 = vmul.f32 0.5, %v8611_v45  ;;  %v3955_v56 = vmul.f32 0.5, %v4898_v58 }
 0x495   : > { %4921 = vtanh.f32 %v3818_v0 }
 0x496   : > { %4923 = vtanh.f32 %v3817_v61  ;;  %v3808_v61 = vmul.f32 0.5, %v8620_v11 }
 0x497   : > { %v4900_v2 = vpop.eup %4899  ;;  %4925 = vtanh.f32 %v3816_v16 }
 0x498   : > { %v4902_v59 = vpop.eup %4901  ;;  %4927 = vtanh.f32 %v3815_v25  ;;  %v3957_v57 = vmul.f32 0.5, %v4900_v2 }
 0x499   : > { %v4904_v12 = vpop.eup %4903  ;;  %4929 = vtanh.f32 %v3814_v54  ;;  %v3956_v16 = vmul.f32 0.5, %v4902_v59 }
 0x49a   : > { %v4906_v24 = vpop.eup %4905  ;;  %4931 = vtanh.f32 %v3813_v63  ;;  %v3958_v33 = vmul.f32 0.5, %v4904_v12  ;;  %v4021_v9 = vadd.f32 0.5, %v3957_v57 }
 0x49b   : > { %v4908_v0 = vpop.eup %4907  ;;  %4933 = vtanh.f32 %v3812_v7  ;;  %v3954_v63 = vmul.f32 0.5, %v4906_v24  ;;  %v3804_v7 = vmul.f32 0.5, %v8625_v3  ;;  %v4020_v53 = vadd.f32 0.5, %v3956_v16 }
 0x49c   : > { %v4910_v25 = vpop.eup %4909  ;;  %4935 = vtanh.f32 %v3811_v55  ;;  %v3959_v40 = vmul.f32 0.5, %v4908_v0  ;;  %v4022_v2 = vadd.f32 0.5, %v3958_v33  ;;  %v4019_v0 = vadd.f32 0.5, %v3955_v56 }
 0x49d   : > { %v4912_v54 = vpop.eup %4911  ;;  %4937 = vtanh.f32 %v3810_v29  ;;  %v3952_v59 = vmul.f32 0.5, %v4910_v25  ;;  %v4018_v33 = vadd.f32 0.5, %v3954_v63  ;;  %v4084_v56 = vmul.f32 %v4020_v53, %v8502_v47 }
 0x49e   : > { %v4914_v41 = vpop.eup %4913  ;;  %4939 = vtanh.f32 %v3809_v20  ;;  %v4023_v43 = vadd.f32 0.5, %v3959_v40  ;;  %v3951_v58 = vmul.f32 0.5, %v4912_v54  ;;  %v4086_v42 = vmul.f32 %v4022_v2, %v8522_v10 }
 0x49f   : > { %v4916_v12 = vpop.eup %4915  ;;  %4941 = vtanh.f32 %v3808_v61  ;;  %v3950_v24 = vmul.f32 0.5, %v4914_v41  ;;  %v4017_v40 = vadd.f32 0.5, %v3953_v35  ;;  %v4085_v61 = vmul.f32 %v4021_v9, %v8509_v31 }
 0x4a0   : > { %v4918_v55 = vpop.eup %4917  ;;  %4943 = vtanh.f32 %v3807_v39  ;;  %v4087_v38 = vmul.f32 %v4023_v43, %v8534_v60  ;;  %v3949_v57 = vmul.f32 0.5, %v4916_v12  ;;  %v4016_v39 = vadd.f32 0.5, %v3952_v59 }
 0x4a1   : > { %v4920_v29 = vpop.eup %4919  ;;  %4945 = vtanh.f32 %v3806_v19  ;;  %v3948_v25 = vmul.f32 0.5, %v4918_v55  ;;  %v4015_v19 = vadd.f32 0.5, %v3951_v58  ;;  %v4083_v10 = vmul.f32 %v4019_v0, %v8498_v26 }
 0x4a2   : > { %v4922_v20 = vpop.eup %4921  ;;  %4947 = vtanh.f32 %v3805_v27  ;;  %4124 = vmatprep.subr.mxu0 %v4087_v38  ;;  %v3947_v54 = vmul.f32 0.5, %v4920_v29  ;;  %v4014_v31 = vadd.f32 0.5, %v3950_v24  ;;  %v4082_v38 = vmul.f32 %v4018_v33, %v8505_v5 }
 0x4a3   : > { %v4924_v16 = vpop.eup %4923  ;;  %4949 = vtanh.f32 %v3804_v7  ;;  %4125 = vmatpush2.msra.mxu0 %v4086_v42  ;;  %v3946_v63 = vmul.f32 0.5, %v4922_v20  ;;  %v4013_v41 = vadd.f32 0.5, %v3949_v57  ;;  %v4012_v9 = vadd.f32 0.5, %v3948_v25 }
 0x4a4   : > { %v4926_v60 = vpop.eup %4925  ;;  %4951 = vtanh.f32 %v3803_v37  ;;  %4126 = vmatprep.subr.mxu0 %v4085_v61  ;;  %v3945_v47 = vmul.f32 0.5, %v4924_v16  ;;  %v4081_v37 = vmul.f32 %v4017_v40, %v8493_v22  ;;  %v4011_v5 = vadd.f32 0.5, %v3947_v54 }
 0x4a5   : > { %v4928_v27 = vpop.eup %4927  ;;  %4953 = vtanh.f32 %v8607_v51  ;;  %4127 = vmatpush2.msra.mxu0 %v4084_v56  ;;  %v3944_v26 = vmul.f32 0.5, %v4926_v60  ;;  %v4080_v51 = vmul.f32 %v4016_v39, %v8512_v30  ;;  %v4079_v7 = vmul.f32 %v4015_v19, %v8518_v18 }
 0x4a6   : > { %v4930_v2 = vpop.eup %4929  ;;  %4955 = vtanh.f32 %v8593_v34  ;;  %4128 = vmatprep.subr.mxu0 %v4083_v10  ;;  %v3943_v12 = vmul.f32 0.5, %v4928_v27  ;;  %v4010_v53 = vadd.f32 0.5, %v3946_v63  ;;  %v4078_v22 = vmul.f32 %v4014_v31, %v8525_v28 }
 0x4a7   : > { %v4932_v35 = vpop.eup %4931  ;;  %4957 = vtanh.f32 %v8585_v8  ;;  %4129 = vmatpush2.msra.mxu0 %v4082_v38  ;;  %v3942_v59 = vmul.f32 0.5, %v4930_v2  ;;  %v4009_v8 = vadd.f32 0.5, %v3945_v47  ;;  %v4077_v0 = vmul.f32 %v4013_v41, %v8530_v6 }
 0x4a8   : > { %v4934_v43 = vpop.eup %4933  ;;  %4130 = vmatprep.subr.mxu0 %v4081_v37  ;;  %v3941_v58 = vmul.f32 0.5, %v4932_v35  ;;  %v4008_v24 = vadd.f32 0.5, %v3944_v26  ;;  %v4076_v33 = vmul.f32 %v4012_v9, %v8538_v17  ;;  %v4007_v20 = vadd.f32 0.5, %v3943_v12 }
 0x4a9   : > { %v4936_v34 = vpop.eup %4935  ;;  %4131 = vmatpush2.msra.mxu0 %v4080_v51  ;;  %v3940_v29 = vmul.f32 0.5, %v4934_v43  ;;  %v4075_v57 = vmul.f32 %v4011_v5, %v8543_v4  ;;  %v4006_v61 = vadd.f32 0.5, %v3942_v59  ;;  %v4074_v16 = vmul.f32 %v4010_v53, %v8549_v15 }
 0x4aa   : > { %v4938_v55 = vpop.eup %4937  ;;  %4132 = vmatprep.subr.mxu0 %v4079_v7  ;;  %v3939_v42 = vmul.f32 0.5, %v4936_v34  ;;  %v4005_v39 = vadd.f32 0.5, %v3941_v58  ;;  %v4073_v56 = vmul.f32 %v4009_v8, %v8554_v14  ;;  %v4072_v19 = vmul.f32 %v4008_v24, %v8562_v48 }
 0x4ab   : > { %v4940_v30 = vpop.eup %4939  ;;  %4133 = vmatpush2.msra.mxu0 %v4078_v22  ;;  %v3938_v40 = vmul.f32 0.5, %v4938_v55  ;;  %v4004_v54 = vadd.f32 0.5, %v3940_v29  ;;  %v4071_v63 = vmul.f32 %v4007_v20, %v8569_v50  ;;  %v4070_v2 = vmul.f32 %v4006_v61, %v8573_v21  ;;  %v4169_v20 = vpop.permute.xlu0 %4168 }
 0x4ac   : > { %v4942_v18 = vpop.eup %4941  ;;  %4134 = vmatprep.subr.mxu0 %v4077_v0  ;;  %v3937_v25 = vmul.f32 0.5, %v4940_v30  ;;  %v4003_v27 = vadd.f32 0.5, %v3939_v42  ;;  %v4069_v37 = vmul.f32 %v4005_v39, %v8581_v1 }
 0x4ad   : > { %v4944_v28 = vpop.eup %4943  ;;  %4135 = vmatpush2.msra.mxu0 %v4076_v33  ;;  %v3936_v60 = vmul.f32 0.5, %v4942_v18  ;;  %v4002_v38 = vadd.f32 0.5, %v3938_v40  ;;  %v4068_v9 = vmul.f32 %v4004_v54, %v8589_v46 }
 0x4ae   : > { %v4946_v6 = vpop.eup %4945  ;;  %4136 = vmatprep.subr.mxu0 %v4075_v57  ;;  %v3935_v10 = vmul.f32 0.5, %v4944_v28  ;;  %v4001_v41 = vadd.f32 0.5, %v3937_v25  ;;  %v4067_v12 = vmul.f32 %v4003_v27, %v8596_v36 }
 0x4af   : > { %v4948_v17 = vpop.eup %4947  ;;  %4137 = vmatpush2.msra.mxu0 %v4074_v16  ;;  %v3934_v31 = vmul.f32 0.5, %v4946_v6  ;;  %v4000_v26 = vadd.f32 0.5, %v3936_v60  ;;  %v4066_v7 = vmul.f32 %v4002_v38, %v8603_v49 }
 0x4b0   : > { %v4950_v4 = vpop.eup %4949  ;;  %4138 = vmatprep.subr.mxu0 %v4073_v56  ;;  %v3933_v47 = vmul.f32 0.5, %v4948_v17  ;;  %v3999_v43 = vadd.f32 0.5, %v3935_v10  ;;  %v4065_v59 = vmul.f32 %v4001_v41, %v8611_v45 }
 0x4b1   : > { %v4952_v15 = vpop.eup %4951  ;;  %4139 = vmatpush2.msra.mxu0 %v4072_v19  ;;  %v3932_v35 = vmul.f32 0.5, %v4950_v4  ;;  %v3998_v5 = vadd.f32 0.5, %v3934_v31  ;;  %v4064_v46 = vmul.f32 %v4000_v26, %v8620_v11 }
 0x4b2   : > { %v4954_v14 = vpop.eup %4953  ;;  %4140 = vmatprep.subr.mxu0 %v4071_v63  ;;  %v3931_v51 = vmul.f32 0.5, %v4952_v15  ;;  %v3997_v1 = vadd.f32 0.5, %v3933_v47  ;;  %v4063_v58 = vmul.f32 %v3999_v43, %v8628_v52 }
 0x4b3   : > { %v4956_v48 = vpop.eup %4955  ;;  %4141 = vmatpush2.msra.mxu0 %v4070_v2  ;;  %v3930_v21 = vmul.f32 0.5, %v4954_v14  ;;  %v3996_v22 = vadd.f32 0.5, %v3932_v35  ;;  %v4062_v8 = vmul.f32 %v3998_v5, %v8633_v44  ;;  %v9364_v44 = vld [vmem:[#allocation93_spill] sm:$0xff] }
 0x4b4   : > { %v4958_v50 = vpop.eup %4957  ;;  %4142 = vmatprep.subr.mxu0 %v4069_v37  ;;  %v3929_v34 = vmul.f32 0.5, %v4956_v48  ;;  %v3995_v55 = vadd.f32 0.5, %v3931_v51  ;;  %v4061_v0 = vmul.f32 %v3997_v1, %v8616_v13  ;;  %v4962_v13 = vld [vmem:[%s8699_s3 + $0x18] sm:$0xff] }
 0x4b5   : > { %4143 = vmatpush2.msra.mxu0 %v4068_v9  ;;  %v3928_v53 = vmul.f32 0.5, %v4958_v50  ;;  %v3994_v36 = vadd.f32 0.5, %v3930_v21  ;;  %v4060_v45 = vmul.f32 %v3996_v22, %v8625_v3 }
 0x4b6   : > { %4144 = vmatprep.subr.mxu0 %v4067_v12  ;;  %v3993_v49 = vadd.f32 0.5, %v3929_v34  ;;  %v4059_v29 = vmul.f32 %v3995_v55, %v8600_v62  ;;  %v9365_v62 = vld [vmem:[#allocation108_spill] sm:$0xff] }
 0x4b7   : > { %4145 = vmatpush2.msra.mxu0 %v4066_v7  ;;  %v3992_v30 = vadd.f32 0.5, %v3928_v53  ;;  %v4058_v11 = vmul.f32 %v3994_v36, %v8577_v23  ;;  %v9366_v23 = vld [vmem:[#allocation15_spill] sm:$0xff] }
 0x4b8   : > { %4146 = vmatprep.subr.mxu0 %v4065_v59  ;;  %v4057_v52 = vmul.f32 %v3993_v49, %v8566_v32 }
 0x4b9   : > { %4147 = vmatpush2.msra.mxu0 %v4064_v46  ;;  %v4056_v24 = vmul.f32 %v3992_v30, %v9364_v44 }
 0x4ba   : > { %4148 = vmatprep.subr.mxu0 %v4063_v58 }
 0x4bb   : > { %4149 = vmatpush2.msra.mxu0 %v4062_v8 }
 0x4bc   : > { %4150 = vmatprep.subr.mxu0 %v4061_v0 }
 0x4bd   : > { %4151 = vmatpush2.msra.mxu0 %v4060_v45 }
 0x4be   : > { %4152 = vmatprep.subr.mxu0 %v4059_v29 }
 0x4bf   : > { %4153 = vmatpush2.msra.mxu0 %v4058_v11 }
 0x4c0   : > { %4154 = vmatprep.subr.mxu0 %v4057_v52 }
 0x4c1   : > { %4155 = vmatpush2.msra.mxu0 %v4056_v24 }
 0x4c2   : > { %4157 = vmatmul.mubr.f32.vlgmr.msra.gmra.mxu0 %v4962_v13 }
 0x582   : > { %v4158_v3 = vpop.f32.mrf.mxu0 }
 0x583   : > { %v4163_v33 = vadd.f32 %v4158_v3, %v9365_v62 }
 0x584   : > { %v4160_v18 = vpop.f32.mrf.mxu0 }
 0x585   : > { %v4164_v42 = vadd.f32 %v4160_v18, %v9366_v23  ;;  %v4171_v57 = vadd.f32 %v4169_v20, %v4163_v33 }
 0x587   : > { %v4172_v32 = vadd.f32 %v4169_v20, %v4164_v42 }
 0x589   : > { %v4175_v28 = vcombine.low %v4171_v57, %v4172_v32 }
 0x58b   : > { %4177 = vst [vmem:[%s262_s12] sm:$0xff] %v4175_v28 }
 0x58c PF: > { %s15_s20 = sadd.s32 1, %s4985_s20   ;;  %s9367_s18 = smov %s4981_s19 }
 0x58d   : > { %p12_p5 = scmp.ge.s32.totalorder %s15_s20, 4   ;;  %s9368_s19 = smov %s9370_s21 }
 0x58f   :  { %14 = sbr.rel (!%p12_p5) target bundleno = 2 (0x2), region = 70 }

</bundles_post_ra>
